<compile_context>
chip_gen: v5e
topology: v5e:2x2
jax: 0.10.0
libtpu: 0.0.40
codegen_flags: <defaults>
</compile_context>

<pallas_src>
import numpy as np
import jax
import jax.numpy as jnp
from jax.experimental import pallas as pl
from jax.experimental.pallas import tpu as pltpu

BT = 8  # images per grid step (all matmul row counts are multiples of 8; raise to amortize)


# ----------------------------- fused Pallas kernel ----------------------------------

def _fused_kernel(x_ref, w1_ref, b1_ref, w2_ref, b2_ref, wfc_ref, bfc_ref, o_ref):
    bt = x_ref.shape[0]
    f32 = jnp.float32

    # ---------------- conv1 + ReLU + 2x2 max-pool (banded MXU matmuls) ----------------
    # x_ref: (bt, 4, 8, 32): [b, m, t, q] = zero-padded 32x32 image, row 4*t+m, column q.
    x2 = x_ref[...].reshape(bt * 32, 32)            # merge major dims (layout-preserving)
    w1 = w1_ref[...]                                # (6, 32, 128), index k = dy*2 + s
    g = []
    for k in range(6):
        gk = jnp.dot(x2, w1[k], preferred_element_type=f32)      # (bt*32, 128)
        g.append(gk.reshape(bt, 4, 8, 128))

    b1 = b1_ref[...]                                # (1, 128)
    zrow = jnp.zeros((bt, 1, 128), f32)

    # Y frames: Y_e[b, t, c*16 + wp] = zero-padded pooled conv1 output at padded row 2t+e,
    # padded column wp (0..15), channel c (0..7).
    y_frames = []
    for e in range(2):
        best = None
        for r in range(2):                          # pool row phase
            for s in range(2):                      # pool column phase
                tot = None
                for dy in range(3):                 # conv row tap
                    a = 2 * e - 2 + r + dy          # padded image row = 4*t + a
                    slab = g[dy * 2 + s][:, a % 4]  # (bt, 8, 128)
                    if a < 0:                       # needs previous frame row (t-1)
                        slab = jnp.concatenate([zrow, slab[:, :7, :]], axis=1)
                    tot = slab if tot is None else tot + slab
                best = tot if best is None else jnp.maximum(best, tot)
        ye = jnp.maximum(best + b1, 0.0)            # bias + ReLU (after pool max)
        # zero the spatial-padding row of the frame (t=0 for e=0, t=7 for e=1)
        if e == 0:
            ye = jnp.concatenate([zrow, ye[:, 1:, :]], axis=1)
        else:
            ye = jnp.concatenate([ye[:, :7, :], zrow], axis=1)
        y_frames.append(ye)

    # ---------------- conv2 + ReLU + 2x2 max-pool (banded MXU matmuls) ----------------
    y_all = jnp.stack(y_frames, axis=0).reshape(2 * bt * 8, 128)
    w2 = w2_ref[...]                                # (6, 128, 112)
    h = []
    for k in range(6):
        hk = jnp.dot(y_all, w2[k], preferred_element_type=f32)   # (2*bt*8, 112)
        h.append(hk.reshape(2, bt, 8, 112))

    b2 = b2_ref[...]                                # (1, 112)
    best2 = None
    for r in range(2):
        for s in range(2):
            tot = None
            for dy in range(3):
                a = r + dy                          # padded y1 row = 2*(ii + (a>>1)) + (a&1)
                u, qa = a & 1, a >> 1
                slab = h[dy * 2 + s][u][:, qa:qa + 7, :]          # (bt, 7, 112)
                tot = slab if tot is None else tot + slab
            best2 = tot if best2 is None else jnp.maximum(best2, tot)
    p2 = jnp.maximum(best2 + b2, 0.0)               # (bt, 7, 112), lane = d*7 + jj

    # ---------------- fc + log_softmax ----------------
    wfc = wfc_ref[...]                              # (7, 112, 128)
    acc = None
    for ii in range(7):
        t = jnp.dot(p2[:, ii, :], wfc[ii], preferred_element_type=f32)    # (bt, 128)
        acc = t if acc is None else acc + t
    logits = acc + bfc_ref[...]                     # padded class lanes get -1e30 bias

    m = jnp.max(logits, axis=-1, keepdims=True)
    lse = jnp.log(jnp.sum(jnp.exp(logits - m), axis=-1, keepdims=True)) + m
    o_ref[...] = (logits - lse)[:, :10].astype(o_ref.dtype)


# ----------------------------- one-time host-side weight prep -----------------------

def _prepare_params(params):
    """Build banded / lane-padded weight matrices (host side, done once)."""
    w1, b1, w2, b2, wfc, bfc = (np.asarray(p, np.float32) for p in params)

    # conv1 banded weights: [dy*2+s, q, c*16+wp], q = 2*(wp-1) + s + dx (padded image col)
    w1b = np.zeros((6, 32, 128), np.float32)
    for dy in range(3):
        for s in range(2):
            for dx in range(3):
                for c in range(8):
                    for wp in range(1, 15):
                        w1b[dy * 2 + s, 2 * (wp - 1) + s + dx, c * 16 + wp] = w1[c, 0, dy, dx]

    # conv1 bias over lanes c*16+wp (zero on wp = 0/15 spatial-padding lanes)
    b1r = np.zeros((1, 128), np.float32)
    for c in range(8):
        b1r[0, c * 16 + 1: c * 16 + 15] = b1[c]

    # conv2 banded weights: [dy*2+s, c*16+wp, d*7+jj], wp = 2*jj + s + dx (padded y1 col)
    w2b = np.zeros((6, 128, 112), np.float32)
    for dy in range(3):
        for s in range(2):
            for dx in range(3):
                for c in range(8):
                    for d in range(16):
                        for jj in range(7):
                            w2b[dy * 2 + s, c * 16 + 2 * jj + s + dx, d * 7 + jj] = w2[d, c, dy, dx]

    b2r = np.repeat(b2, 7)[None, :].astype(np.float32)            # (1, 112), lane d*7+jj

    # fc weights regrouped by pooled row ii; output lanes padded 10 -> 128
    wfcb = np.zeros((7, 112, 128), np.float32)
    for n in range(10):
        for d in range(16):
            for ii in range(7):
                for jj in range(7):
                    wfcb[ii, d * 7 + jj, n] = wfc[n, d * 49 + ii * 7 + jj]

    bfcr = np.full((1, 128), -1e30, np.float32)                   # padded classes -> -inf-ish
    bfcr[0, :10] = bfc

    return tuple(jnp.asarray(a) for a in (w1b, b1r, w2b, b2r, wfcb, bfcr))


# ----------------------------- forward wrapper ---------------------------------------

@jax.jit
def light_mnist_forward(x_nchw, prep):
    w1b, b1r, w2b, b2r, wfcb, bfcr = prep
    B = x_nchw.shape[0]
    bp = ((B + BT - 1) // BT) * BT                  # pad batch to a multiple of BT

    # Only input-side glue: zero-pad the 28x28 image into a 32x32 frame (conv padding +
    # row filler) and split rows by (row mod 4) so every in-kernel access is a static slice.
    x = x_nchw.reshape(B, 28, 28)
    xp = jnp.pad(x, ((0, bp - B), (1, 3), (1, 3)))                # (bp, 32, 32)
    xfr = xp.reshape(bp, 8, 4, 32).transpose(0, 2, 1, 3)          # (bp, 4, 8, 32)

    out = pl.pallas_call(
        _fused_kernel,
        out_shape=jax.ShapeDtypeStruct((bp, 10), jnp.float32),
        grid=(bp // BT,),
        in_specs=[
            pl.BlockSpec((BT, 4, 8, 32), lambda i: (i, 0, 0, 0)),   # image block
            pl.BlockSpec((6, 32, 128), lambda i: (0, 0, 0)),        # conv1 banded weights
            pl.BlockSpec((1, 128), lambda i: (0, 0)),               # conv1 bias row
            pl.BlockSpec((6, 128, 112), lambda i: (0, 0, 0)),       # conv2 banded weights
            pl.BlockSpec((1, 112), lambda i: (0, 0)),               # conv2 bias row
            pl.BlockSpec((7, 112, 128), lambda i: (0, 0, 0)),       # fc weights (per pooled row)
            pl.BlockSpec((1, 128), lambda i: (0, 0)),               # fc bias (padded lanes -1e30)
        ],
        out_specs=pl.BlockSpec((BT, 10), lambda i: (i, 0)),
        compiler_params=pltpu.CompilerParams(
            dimension_semantics=("parallel",),
            vmem_limit_bytes=32 * 1024 * 1024,
        ),
    )(xfr, w1b, b1r, w2b, b2r, wfcb, bfcr)
    return out[:B]


# ----------------------------- pure-JAX reference ------------------------------------

def reference_forward(x_nchw, params):
    w1, b1, w2, b2, wfc, bfc = params

    def conv(x, w, b):
        y = jax.lax.conv_general_dilated(
            x, w, (1, 1), ((1, 1), (1, 1)),
            dimension_numbers=("NCHW", "OIHW", "NCHW"))
        return jax.nn.relu(y + b[None, :, None, None])

    def pool(x):
        return jax.lax.reduce_window(x, -jnp.inf, jax.lax.max,
                                     (1, 1, 2, 2), (1, 1, 2, 2), "VALID")

    y = pool(conv(x_nchw, w1, b1))
    y = pool(conv(y, w2, b2))
    y = y.reshape(y.shape[0], -1)
    logits = y @ wfc.T + bfc
    return jax.nn.log_softmax(logits, axis=-1)


# ----------------------------- main ---------------------------------------------------

if __name__ == "__main__":
    key = jax.random.PRNGKey(0)
    ks = jax.random.split(key, 7)

    # Deterministic synthetic parameters (shapes from LightMNIST.__init__)
    w1 = 0.1 * jax.random.normal(ks[0], (8, 1, 3, 3), jnp.float32)     # conv1.weight
    b1 = 0.1 * jax.random.normal(ks[1], (8,), jnp.float32)             # conv1.bias
    w2 = 0.1 * jax.random.normal(ks[2], (16, 8, 3, 3), jnp.float32)    # conv2.weight
    b2 = 0.1 * jax.random.normal(ks[3], (16,), jnp.float32)            # conv2.bias
    wfc = 0.05 * jax.random.normal(ks[4], (10, 16 * 7 * 7), jnp.float32)   # fc.weight
    bfc = 0.1 * jax.random.normal(ks[5], (10,), jnp.float32)               # fc.bias
    params = (w1, b1, w2, b2, wfc, bfc)

    # MNIST-shaped input: 28x28 is required so the flatten is exactly 16*7*7.
    x = jax.random.normal(ks[6], (2, 1, 28, 28), jnp.float32)

    prep = _prepare_params(params)
    out = jax.block_until_ready(light_mnist_forward(x, prep))
    ref = jax.block_until_ready(reference_forward(x, params))

    assert out.shape == (2, 10), out.shape
    max_err = float(jnp.max(jnp.abs(out - ref)))
    assert max_err < 1e-3, f"max abs err = {max_err}"
    print("KERNEL_OK")
</pallas_src>

<mosaic_0001>
module attributes {stable_mosaic.version = 11 : i64} {
  func.func @_fused_kernel(%arg0: i32, %arg1: memref<8x4x8x32xf32, #tpu.memory_space<vmem>>, %arg2: memref<6x32x128xf32, #tpu.memory_space<vmem>>, %arg3: memref<1x128xf32, #tpu.memory_space<vmem>>, %arg4: memref<6x128x112xf32, #tpu.memory_space<vmem>>, %arg5: memref<1x112xf32, #tpu.memory_space<vmem>>, %arg6: memref<7x112x128xf32, #tpu.memory_space<vmem>>, %arg7: memref<1x128xf32, #tpu.memory_space<vmem>>, %arg8: memref<8x10xf32, #tpu.memory_space<vmem>>) attributes {dimension_semantics = [#tpu.dimension_semantics<parallel>], iteration_bounds = array<i64: 1>, scalar_prefetch = 0 : i64, scratch_operands = 0 : i64, tpu.core_type = #tpu.core_type<tc>, window_params = [{transform_indices = @transform_0, window_bounds = array<i64: 8, 4, 8, 32>}, {pipeline_mode = #tpu.pipeline_mode<synchronous>, transform_indices = @transform_1, window_bounds = array<i64: 6, 32, 128>}, {pipeline_mode = #tpu.pipeline_mode<synchronous>, transform_indices = @transform_2, window_bounds = array<i64: 1, 128>}, {pipeline_mode = #tpu.pipeline_mode<synchronous>, transform_indices = @transform_3, window_bounds = array<i64: 6, 128, 112>}, {pipeline_mode = #tpu.pipeline_mode<synchronous>, transform_indices = @transform_4, window_bounds = array<i64: 1, 112>}, {pipeline_mode = #tpu.pipeline_mode<synchronous>, transform_indices = @transform_5, window_bounds = array<i64: 7, 112, 128>}, {pipeline_mode = #tpu.pipeline_mode<synchronous>, transform_indices = @transform_6, window_bounds = array<i64: 1, 128>}, {transform_indices = @transform_7, window_bounds = array<i64: 8, 10>}]} {
    %c0 = arith.constant 0 : index
    %c0_0 = arith.constant 0 : index
    %c0_1 = arith.constant 0 : index
    %c0_2 = arith.constant 0 : index
    %0 = vector.load %arg1[%c0, %c0_0, %c0_1, %c0_2] : memref<8x4x8x32xf32, #tpu.memory_space<vmem>>, vector<8x4x8x32xf32>
    %1 = vector.shape_cast %0 : vector<8x4x8x32xf32> to vector<256x32xf32>
    %c0_3 = arith.constant 0 : index
    %c0_4 = arith.constant 0 : index
    %c0_5 = arith.constant 0 : index
    %2 = vector.load %arg2[%c0_3, %c0_4, %c0_5] : memref<6x32x128xf32, #tpu.memory_space<vmem>>, vector<6x32x128xf32>
    %3 = vector.extract_strided_slice %2 {offsets = [0, 0, 0], sizes = [1, 32, 128], strides = [1, 1, 1]} : vector<6x32x128xf32> to vector<1x32x128xf32>
    %4 = vector.shape_cast %3 : vector<1x32x128xf32> to vector<32x128xf32>
    %cst = arith.constant dense<0.000000e+00> : vector<256x128xf32>
    %5 = tpu.matmul %1, %4, %cst {dimension_numbers = #tpu.dot_dimension_numbers<[1], [0], [0], [1], [0, 0, 1, 1], [], []>} : vector<256x32xf32>, vector<32x128xf32>, vector<256x128xf32> -> vector<256x128xf32>
    %6 = vector.shape_cast %5 : vector<256x128xf32> to vector<8x4x8x128xf32>
    %7 = vector.extract_strided_slice %2 {offsets = [1, 0, 0], sizes = [1, 32, 128], strides = [1, 1, 1]} : vector<6x32x128xf32> to vector<1x32x128xf32>
    %8 = vector.shape_cast %7 : vector<1x32x128xf32> to vector<32x128xf32>
    %cst_6 = arith.constant dense<0.000000e+00> : vector<256x128xf32>
    %9 = tpu.matmul %1, %8, %cst_6 {dimension_numbers = #tpu.dot_dimension_numbers<[1], [0], [0], [1], [0, 0, 1, 1], [], []>} : vector<256x32xf32>, vector<32x128xf32>, vector<256x128xf32> -> vector<256x128xf32>
    %10 = vector.shape_cast %9 : vector<256x128xf32> to vector<8x4x8x128xf32>
    %11 = vector.extract_strided_slice %2 {offsets = [2, 0, 0], sizes = [1, 32, 128], strides = [1, 1, 1]} : vector<6x32x128xf32> to vector<1x32x128xf32>
    %12 = vector.shape_cast %11 : vector<1x32x128xf32> to vector<32x128xf32>
    %cst_7 = arith.constant dense<0.000000e+00> : vector<256x128xf32>
    %13 = tpu.matmul %1, %12, %cst_7 {dimension_numbers = #tpu.dot_dimension_numbers<[1], [0], [0], [1], [0, 0, 1, 1], [], []>} : vector<256x32xf32>, vector<32x128xf32>, vector<256x128xf32> -> vector<256x128xf32>
    %14 = vector.shape_cast %13 : vector<256x128xf32> to vector<8x4x8x128xf32>
    %15 = vector.extract_strided_slice %2 {offsets = [3, 0, 0], sizes = [1, 32, 128], strides = [1, 1, 1]} : vector<6x32x128xf32> to vector<1x32x128xf32>
    %16 = vector.shape_cast %15 : vector<1x32x128xf32> to vector<32x128xf32>
    %cst_8 = arith.constant dense<0.000000e+00> : vector<256x128xf32>
    %17 = tpu.matmul %1, %16, %cst_8 {dimension_numbers = #tpu.dot_dimension_numbers<[1], [0], [0], [1], [0, 0, 1, 1], [], []>} : vector<256x32xf32>, vector<32x128xf32>, vector<256x128xf32> -> vector<256x128xf32>
    %18 = vector.shape_cast %17 : vector<256x128xf32> to vector<8x4x8x128xf32>
    %19 = vector.extract_strided_slice %2 {offsets = [4, 0, 0], sizes = [1, 32, 128], strides = [1, 1, 1]} : vector<6x32x128xf32> to vector<1x32x128xf32>
    %20 = vector.shape_cast %19 : vector<1x32x128xf32> to vector<32x128xf32>
    %cst_9 = arith.constant dense<0.000000e+00> : vector<256x128xf32>
    %21 = tpu.matmul %1, %20, %cst_9 {dimension_numbers = #tpu.dot_dimension_numbers<[1], [0], [0], [1], [0, 0, 1, 1], [], []>} : vector<256x32xf32>, vector<32x128xf32>, vector<256x128xf32> -> vector<256x128xf32>
    %22 = vector.shape_cast %21 : vector<256x128xf32> to vector<8x4x8x128xf32>
    %23 = vector.extract_strided_slice %2 {offsets = [5, 0, 0], sizes = [1, 32, 128], strides = [1, 1, 1]} : vector<6x32x128xf32> to vector<1x32x128xf32>
    %24 = vector.shape_cast %23 : vector<1x32x128xf32> to vector<32x128xf32>
    %cst_10 = arith.constant dense<0.000000e+00> : vector<256x128xf32>
    %25 = tpu.matmul %1, %24, %cst_10 {dimension_numbers = #tpu.dot_dimension_numbers<[1], [0], [0], [1], [0, 0, 1, 1], [], []>} : vector<256x32xf32>, vector<32x128xf32>, vector<256x128xf32> -> vector<256x128xf32>
    %26 = vector.shape_cast %25 : vector<256x128xf32> to vector<8x4x8x128xf32>
    %c0_11 = arith.constant 0 : index
    %c0_12 = arith.constant 0 : index
    %27 = vector.load %arg3[%c0_11, %c0_12] : memref<1x128xf32, #tpu.memory_space<vmem>>, vector<1x128xf32>
    %cst_13 = arith.constant 0.000000e+00 : f32
    %28 = vector.broadcast %cst_13 : f32 to vector<8x1x128xf32>
    %29 = vector.extract_strided_slice %6 {offsets = [0, 2, 0, 0], sizes = [8, 1, 8, 128], strides = [1, 1, 1, 1]} : vector<8x4x8x128xf32> to vector<8x1x8x128xf32>
    %30 = vector.shape_cast %29 : vector<8x1x8x128xf32> to vector<8x8x128xf32>
    %31 = vector.extract_strided_slice %30 {offsets = [0, 0, 0], sizes = [8, 7, 128], strides = [1, 1, 1]} : vector<8x8x128xf32> to vector<8x7x128xf32>
    %32 = tpu.concatenate %28, %31 in 1 : vector<8x1x128xf32>, vector<8x7x128xf32> -> vector<8x8x128xf32>
    %33 = vector.extract_strided_slice %14 {offsets = [0, 3, 0, 0], sizes = [8, 1, 8, 128], strides = [1, 1, 1, 1]} : vector<8x4x8x128xf32> to vector<8x1x8x128xf32>
    %34 = vector.shape_cast %33 : vector<8x1x8x128xf32> to vector<8x8x128xf32>
    %35 = vector.extract_strided_slice %34 {offsets = [0, 0, 0], sizes = [8, 7, 128], strides = [1, 1, 1]} : vector<8x8x128xf32> to vector<8x7x128xf32>
    %36 = tpu.concatenate %28, %35 in 1 : vector<8x1x128xf32>, vector<8x7x128xf32> -> vector<8x8x128xf32>
    %37 = arith.addf %32, %36 : vector<8x8x128xf32>
    %38 = vector.extract_strided_slice %22 {offsets = [0, 0, 0, 0], sizes = [8, 1, 8, 128], strides = [1, 1, 1, 1]} : vector<8x4x8x128xf32> to vector<8x1x8x128xf32>
    %39 = vector.shape_cast %38 : vector<8x1x8x128xf32> to vector<8x8x128xf32>
    %40 = arith.addf %37, %39 : vector<8x8x128xf32>
    %41 = vector.extract_strided_slice %10 {offsets = [0, 2, 0, 0], sizes = [8, 1, 8, 128], strides = [1, 1, 1, 1]} : vector<8x4x8x128xf32> to vector<8x1x8x128xf32>
    %42 = vector.shape_cast %41 : vector<8x1x8x128xf32> to vector<8x8x128xf32>
    %43 = vector.extract_strided_slice %42 {offsets = [0, 0, 0], sizes = [8, 7, 128], strides = [1, 1, 1]} : vector<8x8x128xf32> to vector<8x7x128xf32>
    %44 = tpu.concatenate %28, %43 in 1 : vector<8x1x128xf32>, vector<8x7x128xf32> -> vector<8x8x128xf32>
    %45 = vector.extract_strided_slice %18 {offsets = [0, 3, 0, 0], sizes = [8, 1, 8, 128], strides = [1, 1, 1, 1]} : vector<8x4x8x128xf32> to vector<8x1x8x128xf32>
    %46 = vector.shape_cast %45 : vector<8x1x8x128xf32> to vector<8x8x128xf32>
    %47 = vector.extract_strided_slice %46 {offsets = [0, 0, 0], sizes = [8, 7, 128], strides = [1, 1, 1]} : vector<8x8x128xf32> to vector<8x7x128xf32>
    %48 = tpu.concatenate %28, %47 in 1 : vector<8x1x128xf32>, vector<8x7x128xf32> -> vector<8x8x128xf32>
    %49 = arith.addf %44, %48 : vector<8x8x128xf32>
    %50 = vector.extract_strided_slice %26 {offsets = [0, 0, 0, 0], sizes = [8, 1, 8, 128], strides = [1, 1, 1, 1]} : vector<8x4x8x128xf32> to vector<8x1x8x128xf32>
    %51 = vector.shape_cast %50 : vector<8x1x8x128xf32> to vector<8x8x128xf32>
    %52 = arith.addf %49, %51 : vector<8x8x128xf32>
    %53 = arith.maximumf %40, %52 : vector<8x8x128xf32>
    %54 = vector.extract_strided_slice %6 {offsets = [0, 3, 0, 0], sizes = [8, 1, 8, 128], strides = [1, 1, 1, 1]} : vector<8x4x8x128xf32> to vector<8x1x8x128xf32>
    %55 = vector.shape_cast %54 : vector<8x1x8x128xf32> to vector<8x8x128xf32>
    %56 = vector.extract_strided_slice %55 {offsets = [0, 0, 0], sizes = [8, 7, 128], strides = [1, 1, 1]} : vector<8x8x128xf32> to vector<8x7x128xf32>
    %57 = tpu.concatenate %28, %56 in 1 : vector<8x1x128xf32>, vector<8x7x128xf32> -> vector<8x8x128xf32>
    %58 = vector.extract_strided_slice %14 {offsets = [0, 0, 0, 0], sizes = [8, 1, 8, 128], strides = [1, 1, 1, 1]} : vector<8x4x8x128xf32> to vector<8x1x8x128xf32>
    %59 = vector.shape_cast %58 : vector<8x1x8x128xf32> to vector<8x8x128xf32>
    %60 = arith.addf %57, %59 : vector<8x8x128xf32>
    %61 = vector.extract_strided_slice %22 {offsets = [0, 1, 0, 0], sizes = [8, 1, 8, 128], strides = [1, 1, 1, 1]} : vector<8x4x8x128xf32> to vector<8x1x8x128xf32>
    %62 = vector.shape_cast %61 : vector<8x1x8x128xf32> to vector<8x8x128xf32>
    %63 = arith.addf %60, %62 : vector<8x8x128xf32>
    %64 = arith.maximumf %53, %63 : vector<8x8x128xf32>
    %65 = vector.extract_strided_slice %10 {offsets = [0, 3, 0, 0], sizes = [8, 1, 8, 128], strides = [1, 1, 1, 1]} : vector<8x4x8x128xf32> to vector<8x1x8x128xf32>
    %66 = vector.shape_cast %65 : vector<8x1x8x128xf32> to vector<8x8x128xf32>
    %67 = vector.extract_strided_slice %66 {offsets = [0, 0, 0], sizes = [8, 7, 128], strides = [1, 1, 1]} : vector<8x8x128xf32> to vector<8x7x128xf32>
    %68 = tpu.concatenate %28, %67 in 1 : vector<8x1x128xf32>, vector<8x7x128xf32> -> vector<8x8x128xf32>
    %69 = vector.extract_strided_slice %18 {offsets = [0, 0, 0, 0], sizes = [8, 1, 8, 128], strides = [1, 1, 1, 1]} : vector<8x4x8x128xf32> to vector<8x1x8x128xf32>
    %70 = vector.shape_cast %69 : vector<8x1x8x128xf32> to vector<8x8x128xf32>
    %71 = arith.addf %68, %70 : vector<8x8x128xf32>
    %72 = vector.extract_strided_slice %26 {offsets = [0, 1, 0, 0], sizes = [8, 1, 8, 128], strides = [1, 1, 1, 1]} : vector<8x4x8x128xf32> to vector<8x1x8x128xf32>
    %73 = vector.shape_cast %72 : vector<8x1x8x128xf32> to vector<8x8x128xf32>
    %74 = arith.addf %71, %73 : vector<8x8x128xf32>
    %75 = arith.maximumf %64, %74 : vector<8x8x128xf32>
    %76 = vector.shape_cast %27 : vector<1x128xf32> to vector<1x1x128xf32>
    %77 = vector.broadcast %76 : vector<1x1x128xf32> to vector<8x8x128xf32>
    %78 = arith.addf %75, %77 : vector<8x8x128xf32>
    %cst_14 = arith.constant 0.000000e+00 : f32
    %79 = vector.broadcast %cst_14 : f32 to vector<8x8x128xf32>
    %80 = arith.maximumf %78, %79 : vector<8x8x128xf32>
    %81 = vector.extract_strided_slice %80 {offsets = [0, 1, 0], sizes = [8, 7, 128], strides = [1, 1, 1]} : vector<8x8x128xf32> to vector<8x7x128xf32>
    %82 = tpu.concatenate %28, %81 in 1 : vector<8x1x128xf32>, vector<8x7x128xf32> -> vector<8x8x128xf32>
    %83 = vector.extract_strided_slice %6 {offsets = [0, 0, 0, 0], sizes = [8, 1, 8, 128], strides = [1, 1, 1, 1]} : vector<8x4x8x128xf32> to vector<8x1x8x128xf32>
    %84 = vector.shape_cast %83 : vector<8x1x8x128xf32> to vector<8x8x128xf32>
    %85 = vector.extract_strided_slice %14 {offsets = [0, 1, 0, 0], sizes = [8, 1, 8, 128], strides = [1, 1, 1, 1]} : vector<8x4x8x128xf32> to vector<8x1x8x128xf32>
    %86 = vector.shape_cast %85 : vector<8x1x8x128xf32> to vector<8x8x128xf32>
    %87 = arith.addf %84, %86 : vector<8x8x128xf32>
    %88 = vector.extract_strided_slice %22 {offsets = [0, 2, 0, 0], sizes = [8, 1, 8, 128], strides = [1, 1, 1, 1]} : vector<8x4x8x128xf32> to vector<8x1x8x128xf32>
    %89 = vector.shape_cast %88 : vector<8x1x8x128xf32> to vector<8x8x128xf32>
    %90 = arith.addf %87, %89 : vector<8x8x128xf32>
    %91 = vector.extract_strided_slice %10 {offsets = [0, 0, 0, 0], sizes = [8, 1, 8, 128], strides = [1, 1, 1, 1]} : vector<8x4x8x128xf32> to vector<8x1x8x128xf32>
    %92 = vector.shape_cast %91 : vector<8x1x8x128xf32> to vector<8x8x128xf32>
    %93 = vector.extract_strided_slice %18 {offsets = [0, 1, 0, 0], sizes = [8, 1, 8, 128], strides = [1, 1, 1, 1]} : vector<8x4x8x128xf32> to vector<8x1x8x128xf32>
    %94 = vector.shape_cast %93 : vector<8x1x8x128xf32> to vector<8x8x128xf32>
    %95 = arith.addf %92, %94 : vector<8x8x128xf32>
    %96 = vector.extract_strided_slice %26 {offsets = [0, 2, 0, 0], sizes = [8, 1, 8, 128], strides = [1, 1, 1, 1]} : vector<8x4x8x128xf32> to vector<8x1x8x128xf32>
    %97 = vector.shape_cast %96 : vector<8x1x8x128xf32> to vector<8x8x128xf32>
    %98 = arith.addf %95, %97 : vector<8x8x128xf32>
    %99 = arith.maximumf %90, %98 : vector<8x8x128xf32>
    %100 = vector.extract_strided_slice %6 {offsets = [0, 1, 0, 0], sizes = [8, 1, 8, 128], strides = [1, 1, 1, 1]} : vector<8x4x8x128xf32> to vector<8x1x8x128xf32>
    %101 = vector.shape_cast %100 : vector<8x1x8x128xf32> to vector<8x8x128xf32>
    %102 = vector.extract_strided_slice %14 {offsets = [0, 2, 0, 0], sizes = [8, 1, 8, 128], strides = [1, 1, 1, 1]} : vector<8x4x8x128xf32> to vector<8x1x8x128xf32>
    %103 = vector.shape_cast %102 : vector<8x1x8x128xf32> to vector<8x8x128xf32>
    %104 = arith.addf %101, %103 : vector<8x8x128xf32>
    %105 = vector.extract_strided_slice %22 {offsets = [0, 3, 0, 0], sizes = [8, 1, 8, 128], strides = [1, 1, 1, 1]} : vector<8x4x8x128xf32> to vector<8x1x8x128xf32>
    %106 = vector.shape_cast %105 : vector<8x1x8x128xf32> to vector<8x8x128xf32>
    %107 = arith.addf %104, %106 : vector<8x8x128xf32>
    %108 = arith.maximumf %99, %107 : vector<8x8x128xf32>
    %109 = vector.extract_strided_slice %10 {offsets = [0, 1, 0, 0], sizes = [8, 1, 8, 128], strides = [1, 1, 1, 1]} : vector<8x4x8x128xf32> to vector<8x1x8x128xf32>
    %110 = vector.shape_cast %109 : vector<8x1x8x128xf32> to vector<8x8x128xf32>
    %111 = vector.extract_strided_slice %18 {offsets = [0, 2, 0, 0], sizes = [8, 1, 8, 128], strides = [1, 1, 1, 1]} : vector<8x4x8x128xf32> to vector<8x1x8x128xf32>
    %112 = vector.shape_cast %111 : vector<8x1x8x128xf32> to vector<8x8x128xf32>
    %113 = arith.addf %110, %112 : vector<8x8x128xf32>
    %114 = vector.extract_strided_slice %26 {offsets = [0, 3, 0, 0], sizes = [8, 1, 8, 128], strides = [1, 1, 1, 1]} : vector<8x4x8x128xf32> to vector<8x1x8x128xf32>
    %115 = vector.shape_cast %114 : vector<8x1x8x128xf32> to vector<8x8x128xf32>
    %116 = arith.addf %113, %115 : vector<8x8x128xf32>
    %117 = arith.maximumf %108, %116 : vector<8x8x128xf32>
    %118 = vector.shape_cast %27 : vector<1x128xf32> to vector<1x1x128xf32>
    %119 = vector.broadcast %118 : vector<1x1x128xf32> to vector<8x8x128xf32>
    %120 = arith.addf %117, %119 : vector<8x8x128xf32>
    %cst_15 = arith.constant 0.000000e+00 : f32
    %121 = vector.broadcast %cst_15 : f32 to vector<8x8x128xf32>
    %122 = arith.maximumf %120, %121 : vector<8x8x128xf32>
    %123 = vector.extract_strided_slice %122 {offsets = [0, 0, 0], sizes = [8, 7, 128], strides = [1, 1, 1]} : vector<8x8x128xf32> to vector<8x7x128xf32>
    %124 = tpu.concatenate %123, %28 in 1 : vector<8x7x128xf32>, vector<8x1x128xf32> -> vector<8x8x128xf32>
    %125 = vector.shape_cast %82 : vector<8x8x128xf32> to vector<1x8x8x128xf32>
    %126 = vector.shape_cast %124 : vector<8x8x128xf32> to vector<1x8x8x128xf32>
    %127 = tpu.concatenate %125, %126 in 0 : vector<1x8x8x128xf32>, vector<1x8x8x128xf32> -> vector<2x8x8x128xf32>
    %128 = vector.shape_cast %127 : vector<2x8x8x128xf32> to vector<128x128xf32>
    %c0_16 = arith.constant 0 : index
    %c0_17 = arith.constant 0 : index
    %c0_18 = arith.constant 0 : index
    %129 = vector.load %arg4[%c0_16, %c0_17, %c0_18] : memref<6x128x112xf32, #tpu.memory_space<vmem>>, vector<6x128x112xf32>
    %130 = vector.extract_strided_slice %129 {offsets = [0, 0, 0], sizes = [1, 128, 112], strides = [1, 1, 1]} : vector<6x128x112xf32> to vector<1x128x112xf32>
    %131 = vector.shape_cast %130 : vector<1x128x112xf32> to vector<128x112xf32>
    %cst_19 = arith.constant dense<0.000000e+00> : vector<128x112xf32>
    %132 = tpu.matmul %128, %131, %cst_19 {dimension_numbers = #tpu.dot_dimension_numbers<[1], [0], [0], [1], [0, 0, 1, 1], [], []>} : vector<128x128xf32>, vector<128x112xf32>, vector<128x112xf32> -> vector<128x112xf32>
    %133 = vector.shape_cast %132 : vector<128x112xf32> to vector<2x8x8x112xf32>
    %134 = vector.extract_strided_slice %129 {offsets = [1, 0, 0], sizes = [1, 128, 112], strides = [1, 1, 1]} : vector<6x128x112xf32> to vector<1x128x112xf32>
    %135 = vector.shape_cast %134 : vector<1x128x112xf32> to vector<128x112xf32>
    %cst_20 = arith.constant dense<0.000000e+00> : vector<128x112xf32>
    %136 = tpu.matmul %128, %135, %cst_20 {dimension_numbers = #tpu.dot_dimension_numbers<[1], [0], [0], [1], [0, 0, 1, 1], [], []>} : vector<128x128xf32>, vector<128x112xf32>, vector<128x112xf32> -> vector<128x112xf32>
    %137 = vector.shape_cast %136 : vector<128x112xf32> to vector<2x8x8x112xf32>
    %138 = vector.extract_strided_slice %129 {offsets = [2, 0, 0], sizes = [1, 128, 112], strides = [1, 1, 1]} : vector<6x128x112xf32> to vector<1x128x112xf32>
    %139 = vector.shape_cast %138 : vector<1x128x112xf32> to vector<128x112xf32>
    %cst_21 = arith.constant dense<0.000000e+00> : vector<128x112xf32>
    %140 = tpu.matmul %128, %139, %cst_21 {dimension_numbers = #tpu.dot_dimension_numbers<[1], [0], [0], [1], [0, 0, 1, 1], [], []>} : vector<128x128xf32>, vector<128x112xf32>, vector<128x112xf32> -> vector<128x112xf32>
    %141 = vector.shape_cast %140 : vector<128x112xf32> to vector<2x8x8x112xf32>
    %142 = vector.extract_strided_slice %129 {offsets = [3, 0, 0], sizes = [1, 128, 112], strides = [1, 1, 1]} : vector<6x128x112xf32> to vector<1x128x112xf32>
    %143 = vector.shape_cast %142 : vector<1x128x112xf32> to vector<128x112xf32>
    %cst_22 = arith.constant dense<0.000000e+00> : vector<128x112xf32>
    %144 = tpu.matmul %128, %143, %cst_22 {dimension_numbers = #tpu.dot_dimension_numbers<[1], [0], [0], [1], [0, 0, 1, 1], [], []>} : vector<128x128xf32>, vector<128x112xf32>, vector<128x112xf32> -> vector<128x112xf32>
    %145 = vector.shape_cast %144 : vector<128x112xf32> to vector<2x8x8x112xf32>
    %146 = vector.extract_strided_slice %129 {offsets = [4, 0, 0], sizes = [1, 128, 112], strides = [1, 1, 1]} : vector<6x128x112xf32> to vector<1x128x112xf32>
    %147 = vector.shape_cast %146 : vector<1x128x112xf32> to vector<128x112xf32>
    %cst_23 = arith.constant dense<0.000000e+00> : vector<128x112xf32>
    %148 = tpu.matmul %128, %147, %cst_23 {dimension_numbers = #tpu.dot_dimension_numbers<[1], [0], [0], [1], [0, 0, 1, 1], [], []>} : vector<128x128xf32>, vector<128x112xf32>, vector<128x112xf32> -> vector<128x112xf32>
    %149 = vector.shape_cast %148 : vector<128x112xf32> to vector<2x8x8x112xf32>
    %150 = vector.extract_strided_slice %129 {offsets = [5, 0, 0], sizes = [1, 128, 112], strides = [1, 1, 1]} : vector<6x128x112xf32> to vector<1x128x112xf32>
    %151 = vector.shape_cast %150 : vector<1x128x112xf32> to vector<128x112xf32>
    %cst_24 = arith.constant dense<0.000000e+00> : vector<128x112xf32>
    %152 = tpu.matmul %128, %151, %cst_24 {dimension_numbers = #tpu.dot_dimension_numbers<[1], [0], [0], [1], [0, 0, 1, 1], [], []>} : vector<128x128xf32>, vector<128x112xf32>, vector<128x112xf32> -> vector<128x112xf32>
    %153 = vector.shape_cast %152 : vector<128x112xf32> to vector<2x8x8x112xf32>
    %c0_25 = arith.constant 0 : index
    %c0_26 = arith.constant 0 : index
    %154 = vector.load %arg5[%c0_25, %c0_26] : memref<1x112xf32, #tpu.memory_space<vmem>>, vector<1x112xf32>
    %155 = vector.extract_strided_slice %133 {offsets = [0, 0, 0, 0], sizes = [1, 8, 8, 112], strides = [1, 1, 1, 1]} : vector<2x8x8x112xf32> to vector<1x8x8x112xf32>
    %156 = vector.shape_cast %155 : vector<1x8x8x112xf32> to vector<8x8x112xf32>
    %157 = vector.extract_strided_slice %156 {offsets = [0, 0, 0], sizes = [8, 7, 112], strides = [1, 1, 1]} : vector<8x8x112xf32> to vector<8x7x112xf32>
    %158 = vector.extract_strided_slice %141 {offsets = [1, 0, 0, 0], sizes = [1, 8, 8, 112], strides = [1, 1, 1, 1]} : vector<2x8x8x112xf32> to vector<1x8x8x112xf32>
    %159 = vector.shape_cast %158 : vector<1x8x8x112xf32> to vector<8x8x112xf32>
    %160 = vector.extract_strided_slice %159 {offsets = [0, 0, 0], sizes = [8, 7, 112], strides = [1, 1, 1]} : vector<8x8x112xf32> to vector<8x7x112xf32>
    %161 = arith.addf %157, %160 : vector<8x7x112xf32>
    %162 = vector.extract_strided_slice %149 {offsets = [0, 0, 0, 0], sizes = [1, 8, 8, 112], strides = [1, 1, 1, 1]} : vector<2x8x8x112xf32> to vector<1x8x8x112xf32>
    %163 = vector.shape_cast %162 : vector<1x8x8x112xf32> to vector<8x8x112xf32>
    %164 = vector.extract_strided_slice %163 {offsets = [0, 1, 0], sizes = [8, 7, 112], strides = [1, 1, 1]} : vector<8x8x112xf32> to vector<8x7x112xf32>
    %165 = arith.addf %161, %164 : vector<8x7x112xf32>
    %166 = vector.extract_strided_slice %137 {offsets = [0, 0, 0, 0], sizes = [1, 8, 8, 112], strides = [1, 1, 1, 1]} : vector<2x8x8x112xf32> to vector<1x8x8x112xf32>
    %167 = vector.shape_cast %166 : vector<1x8x8x112xf32> to vector<8x8x112xf32>
    %168 = vector.extract_strided_slice %167 {offsets = [0, 0, 0], sizes = [8, 7, 112], strides = [1, 1, 1]} : vector<8x8x112xf32> to vector<8x7x112xf32>
    %169 = vector.extract_strided_slice %145 {offsets = [1, 0, 0, 0], sizes = [1, 8, 8, 112], strides = [1, 1, 1, 1]} : vector<2x8x8x112xf32> to vector<1x8x8x112xf32>
    %170 = vector.shape_cast %169 : vector<1x8x8x112xf32> to vector<8x8x112xf32>
    %171 = vector.extract_strided_slice %170 {offsets = [0, 0, 0], sizes = [8, 7, 112], strides = [1, 1, 1]} : vector<8x8x112xf32> to vector<8x7x112xf32>
    %172 = arith.addf %168, %171 : vector<8x7x112xf32>
    %173 = vector.extract_strided_slice %153 {offsets = [0, 0, 0, 0], sizes = [1, 8, 8, 112], strides = [1, 1, 1, 1]} : vector<2x8x8x112xf32> to vector<1x8x8x112xf32>
    %174 = vector.shape_cast %173 : vector<1x8x8x112xf32> to vector<8x8x112xf32>
    %175 = vector.extract_strided_slice %174 {offsets = [0, 1, 0], sizes = [8, 7, 112], strides = [1, 1, 1]} : vector<8x8x112xf32> to vector<8x7x112xf32>
    %176 = arith.addf %172, %175 : vector<8x7x112xf32>
    %177 = arith.maximumf %165, %176 : vector<8x7x112xf32>
    %178 = vector.extract_strided_slice %133 {offsets = [1, 0, 0, 0], sizes = [1, 8, 8, 112], strides = [1, 1, 1, 1]} : vector<2x8x8x112xf32> to vector<1x8x8x112xf32>
    %179 = vector.shape_cast %178 : vector<1x8x8x112xf32> to vector<8x8x112xf32>
    %180 = vector.extract_strided_slice %179 {offsets = [0, 0, 0], sizes = [8, 7, 112], strides = [1, 1, 1]} : vector<8x8x112xf32> to vector<8x7x112xf32>
    %181 = vector.extract_strided_slice %141 {offsets = [0, 0, 0, 0], sizes = [1, 8, 8, 112], strides = [1, 1, 1, 1]} : vector<2x8x8x112xf32> to vector<1x8x8x112xf32>
    %182 = vector.shape_cast %181 : vector<1x8x8x112xf32> to vector<8x8x112xf32>
    %183 = vector.extract_strided_slice %182 {offsets = [0, 1, 0], sizes = [8, 7, 112], strides = [1, 1, 1]} : vector<8x8x112xf32> to vector<8x7x112xf32>
    %184 = arith.addf %180, %183 : vector<8x7x112xf32>
    %185 = vector.extract_strided_slice %149 {offsets = [1, 0, 0, 0], sizes = [1, 8, 8, 112], strides = [1, 1, 1, 1]} : vector<2x8x8x112xf32> to vector<1x8x8x112xf32>
    %186 = vector.shape_cast %185 : vector<1x8x8x112xf32> to vector<8x8x112xf32>
    %187 = vector.extract_strided_slice %186 {offsets = [0, 1, 0], sizes = [8, 7, 112], strides = [1, 1, 1]} : vector<8x8x112xf32> to vector<8x7x112xf32>
    %188 = arith.addf %184, %187 : vector<8x7x112xf32>
    %189 = arith.maximumf %177, %188 : vector<8x7x112xf32>
    %190 = vector.extract_strided_slice %137 {offsets = [1, 0, 0, 0], sizes = [1, 8, 8, 112], strides = [1, 1, 1, 1]} : vector<2x8x8x112xf32> to vector<1x8x8x112xf32>
    %191 = vector.shape_cast %190 : vector<1x8x8x112xf32> to vector<8x8x112xf32>
    %192 = vector.extract_strided_slice %191 {offsets = [0, 0, 0], sizes = [8, 7, 112], strides = [1, 1, 1]} : vector<8x8x112xf32> to vector<8x7x112xf32>
    %193 = vector.extract_strided_slice %145 {offsets = [0, 0, 0, 0], sizes = [1, 8, 8, 112], strides = [1, 1, 1, 1]} : vector<2x8x8x112xf32> to vector<1x8x8x112xf32>
    %194 = vector.shape_cast %193 : vector<1x8x8x112xf32> to vector<8x8x112xf32>
    %195 = vector.extract_strided_slice %194 {offsets = [0, 1, 0], sizes = [8, 7, 112], strides = [1, 1, 1]} : vector<8x8x112xf32> to vector<8x7x112xf32>
    %196 = arith.addf %192, %195 : vector<8x7x112xf32>
    %197 = vector.extract_strided_slice %153 {offsets = [1, 0, 0, 0], sizes = [1, 8, 8, 112], strides = [1, 1, 1, 1]} : vector<2x8x8x112xf32> to vector<1x8x8x112xf32>
    %198 = vector.shape_cast %197 : vector<1x8x8x112xf32> to vector<8x8x112xf32>
    %199 = vector.extract_strided_slice %198 {offsets = [0, 1, 0], sizes = [8, 7, 112], strides = [1, 1, 1]} : vector<8x8x112xf32> to vector<8x7x112xf32>
    %200 = arith.addf %196, %199 : vector<8x7x112xf32>
    %201 = arith.maximumf %189, %200 : vector<8x7x112xf32>
    %202 = vector.shape_cast %154 : vector<1x112xf32> to vector<1x1x112xf32>
    %203 = vector.broadcast %202 : vector<1x1x112xf32> to vector<8x7x112xf32>
    %204 = arith.addf %201, %203 : vector<8x7x112xf32>
    %cst_27 = arith.constant 0.000000e+00 : f32
    %205 = vector.broadcast %cst_27 : f32 to vector<8x7x112xf32>
    %206 = arith.maximumf %204, %205 : vector<8x7x112xf32>
    %c0_28 = arith.constant 0 : index
    %c0_29 = arith.constant 0 : index
    %c0_30 = arith.constant 0 : index
    %207 = vector.load %arg6[%c0_28, %c0_29, %c0_30] : memref<7x112x128xf32, #tpu.memory_space<vmem>>, vector<7x112x128xf32>
    %208 = vector.extract_strided_slice %206 {offsets = [0, 0, 0], sizes = [8, 1, 112], strides = [1, 1, 1]} : vector<8x7x112xf32> to vector<8x1x112xf32>
    %209 = vector.shape_cast %208 : vector<8x1x112xf32> to vector<8x112xf32>
    %210 = vector.extract_strided_slice %207 {offsets = [0, 0, 0], sizes = [1, 112, 128], strides = [1, 1, 1]} : vector<7x112x128xf32> to vector<1x112x128xf32>
    %211 = vector.shape_cast %210 : vector<1x112x128xf32> to vector<112x128xf32>
    %cst_31 = arith.constant dense<0.000000e+00> : vector<8x128xf32>
    %212 = tpu.matmul %209, %211, %cst_31 {dimension_numbers = #tpu.dot_dimension_numbers<[1], [0], [0], [1], [0, 0, 1, 1], [], []>} : vector<8x112xf32>, vector<112x128xf32>, vector<8x128xf32> -> vector<8x128xf32>
    %213 = vector.extract_strided_slice %206 {offsets = [0, 1, 0], sizes = [8, 1, 112], strides = [1, 1, 1]} : vector<8x7x112xf32> to vector<8x1x112xf32>
    %214 = vector.shape_cast %213 : vector<8x1x112xf32> to vector<8x112xf32>
    %215 = vector.extract_strided_slice %207 {offsets = [1, 0, 0], sizes = [1, 112, 128], strides = [1, 1, 1]} : vector<7x112x128xf32> to vector<1x112x128xf32>
    %216 = vector.shape_cast %215 : vector<1x112x128xf32> to vector<112x128xf32>
    %cst_32 = arith.constant dense<0.000000e+00> : vector<8x128xf32>
    %217 = tpu.matmul %214, %216, %cst_32 {dimension_numbers = #tpu.dot_dimension_numbers<[1], [0], [0], [1], [0, 0, 1, 1], [], []>} : vector<8x112xf32>, vector<112x128xf32>, vector<8x128xf32> -> vector<8x128xf32>
    %218 = arith.addf %212, %217 : vector<8x128xf32>
    %219 = vector.extract_strided_slice %206 {offsets = [0, 2, 0], sizes = [8, 1, 112], strides = [1, 1, 1]} : vector<8x7x112xf32> to vector<8x1x112xf32>
    %220 = vector.shape_cast %219 : vector<8x1x112xf32> to vector<8x112xf32>
    %221 = vector.extract_strided_slice %207 {offsets = [2, 0, 0], sizes = [1, 112, 128], strides = [1, 1, 1]} : vector<7x112x128xf32> to vector<1x112x128xf32>
    %222 = vector.shape_cast %221 : vector<1x112x128xf32> to vector<112x128xf32>
    %cst_33 = arith.constant dense<0.000000e+00> : vector<8x128xf32>
    %223 = tpu.matmul %220, %222, %cst_33 {dimension_numbers = #tpu.dot_dimension_numbers<[1], [0], [0], [1], [0, 0, 1, 1], [], []>} : vector<8x112xf32>, vector<112x128xf32>, vector<8x128xf32> -> vector<8x128xf32>
    %224 = arith.addf %218, %223 : vector<8x128xf32>
    %225 = vector.extract_strided_slice %206 {offsets = [0, 3, 0], sizes = [8, 1, 112], strides = [1, 1, 1]} : vector<8x7x112xf32> to vector<8x1x112xf32>
    %226 = vector.shape_cast %225 : vector<8x1x112xf32> to vector<8x112xf32>
    %227 = vector.extract_strided_slice %207 {offsets = [3, 0, 0], sizes = [1, 112, 128], strides = [1, 1, 1]} : vector<7x112x128xf32> to vector<1x112x128xf32>
    %228 = vector.shape_cast %227 : vector<1x112x128xf32> to vector<112x128xf32>
    %cst_34 = arith.constant dense<0.000000e+00> : vector<8x128xf32>
    %229 = tpu.matmul %226, %228, %cst_34 {dimension_numbers = #tpu.dot_dimension_numbers<[1], [0], [0], [1], [0, 0, 1, 1], [], []>} : vector<8x112xf32>, vector<112x128xf32>, vector<8x128xf32> -> vector<8x128xf32>
    %230 = arith.addf %224, %229 : vector<8x128xf32>
    %231 = vector.extract_strided_slice %206 {offsets = [0, 4, 0], sizes = [8, 1, 112], strides = [1, 1, 1]} : vector<8x7x112xf32> to vector<8x1x112xf32>
    %232 = vector.shape_cast %231 : vector<8x1x112xf32> to vector<8x112xf32>
    %233 = vector.extract_strided_slice %207 {offsets = [4, 0, 0], sizes = [1, 112, 128], strides = [1, 1, 1]} : vector<7x112x128xf32> to vector<1x112x128xf32>
    %234 = vector.shape_cast %233 : vector<1x112x128xf32> to vector<112x128xf32>
    %cst_35 = arith.constant dense<0.000000e+00> : vector<8x128xf32>
    %235 = tpu.matmul %232, %234, %cst_35 {dimension_numbers = #tpu.dot_dimension_numbers<[1], [0], [0], [1], [0, 0, 1, 1], [], []>} : vector<8x112xf32>, vector<112x128xf32>, vector<8x128xf32> -> vector<8x128xf32>
    %236 = arith.addf %230, %235 : vector<8x128xf32>
    %237 = vector.extract_strided_slice %206 {offsets = [0, 5, 0], sizes = [8, 1, 112], strides = [1, 1, 1]} : vector<8x7x112xf32> to vector<8x1x112xf32>
    %238 = vector.shape_cast %237 : vector<8x1x112xf32> to vector<8x112xf32>
    %239 = vector.extract_strided_slice %207 {offsets = [5, 0, 0], sizes = [1, 112, 128], strides = [1, 1, 1]} : vector<7x112x128xf32> to vector<1x112x128xf32>
    %240 = vector.shape_cast %239 : vector<1x112x128xf32> to vector<112x128xf32>
    %cst_36 = arith.constant dense<0.000000e+00> : vector<8x128xf32>
    %241 = tpu.matmul %238, %240, %cst_36 {dimension_numbers = #tpu.dot_dimension_numbers<[1], [0], [0], [1], [0, 0, 1, 1], [], []>} : vector<8x112xf32>, vector<112x128xf32>, vector<8x128xf32> -> vector<8x128xf32>
    %242 = arith.addf %236, %241 : vector<8x128xf32>
    %243 = vector.extract_strided_slice %206 {offsets = [0, 6, 0], sizes = [8, 1, 112], strides = [1, 1, 1]} : vector<8x7x112xf32> to vector<8x1x112xf32>
    %244 = vector.shape_cast %243 : vector<8x1x112xf32> to vector<8x112xf32>
    %245 = vector.extract_strided_slice %207 {offsets = [6, 0, 0], sizes = [1, 112, 128], strides = [1, 1, 1]} : vector<7x112x128xf32> to vector<1x112x128xf32>
    %246 = vector.shape_cast %245 : vector<1x112x128xf32> to vector<112x128xf32>
    %cst_37 = arith.constant dense<0.000000e+00> : vector<8x128xf32>
    %247 = tpu.matmul %244, %246, %cst_37 {dimension_numbers = #tpu.dot_dimension_numbers<[1], [0], [0], [1], [0, 0, 1, 1], [], []>} : vector<8x112xf32>, vector<112x128xf32>, vector<8x128xf32> -> vector<8x128xf32>
    %248 = arith.addf %242, %247 : vector<8x128xf32>
    %c0_38 = arith.constant 0 : index
    %c0_39 = arith.constant 0 : index
    %249 = vector.load %arg7[%c0_38, %c0_39] : memref<1x128xf32, #tpu.memory_space<vmem>>, vector<1x128xf32>
    %250 = vector.broadcast %249 : vector<1x128xf32> to vector<8x128xf32>
    %251 = arith.addf %248, %250 : vector<8x128xf32>
    %cst_40 = arith.constant dense<0xFF800000> : vector<8xf32>
    %252 = vector.multi_reduction <maximumf>, %251, %cst_40 [1] : vector<8x128xf32> to vector<8xf32>
    %253 = vector.shape_cast %252 : vector<8xf32> to vector<8x1xf32>
    %254 = vector.broadcast %253 : vector<8x1xf32> to vector<8x128xf32>
    %255 = arith.subf %251, %254 : vector<8x128xf32>
    %256 = math.exp %255 : vector<8x128xf32>
    %cst_41 = arith.constant dense<0.000000e+00> : vector<8xf32>
    %257 = vector.multi_reduction <add>, %256, %cst_41 [1] : vector<8x128xf32> to vector<8xf32>
    %258 = vector.shape_cast %257 : vector<8xf32> to vector<8x1xf32>
    %259 = math.log %258 : vector<8x1xf32>
    %260 = arith.addf %259, %253 : vector<8x1xf32>
    %261 = vector.broadcast %260 : vector<8x1xf32> to vector<8x128xf32>
    %262 = arith.subf %251, %261 : vector<8x128xf32>
    %263 = vector.extract_strided_slice %262 {offsets = [0, 0], sizes = [8, 10], strides = [1, 1]} : vector<8x128xf32> to vector<8x10xf32>
    %c0_42 = arith.constant 0 : index
    %c0_43 = arith.constant 0 : index
    %264 = vector.load %arg8[%c0_42, %c0_43] : memref<8x10xf32, #tpu.memory_space<vmem>>, vector<8x10xf32>
    tpu.vector_store %arg8[%c0_42, %c0_43], %263 {strides = array<i32>} : memref<8x10xf32, #tpu.memory_space<vmem>>, vector<8x10xf32>,
    return
  }
  func.func @transform_0(%arg0: i32) -> (i32, i32, i32, i32) {
    %c0_i32 = arith.constant 0 : i32
    %c0_i32_0 = arith.constant 0 : i32
    %c0_i32_1 = arith.constant 0 : i32
    %c0_i32_2 = arith.constant 0 : i32
    return %arg0, %c0_i32, %c0_i32_0, %c0_i32_1 : i32, i32, i32, i32
  }
  func.func @transform_1(%arg0: i32) -> (i32, i32, i32) {
    %c0_i32 = arith.constant 0 : i32
    %c0_i32_0 = arith.constant 0 : i32
    %c0_i32_1 = arith.constant 0 : i32
    %c0_i32_2 = arith.constant 0 : i32
    return %c0_i32, %c0_i32_0, %c0_i32_1 : i32, i32, i32
  }
  func.func @transform_2(%arg0: i32) -> (i32, i32) {
    %c0_i32 = arith.constant 0 : i32
    %c0_i32_0 = arith.constant 0 : i32
    %c0_i32_1 = arith.constant 0 : i32
    return %c0_i32, %c0_i32_0 : i32, i32
  }
  func.func @transform_3(%arg0: i32) -> (i32, i32, i32) {
    %c0_i32 = arith.constant 0 : i32
    %c0_i32_0 = arith.constant 0 : i32
    %c0_i32_1 = arith.constant 0 : i32
    %c0_i32_2 = arith.constant 0 : i32
    return %c0_i32, %c0_i32_0, %c0_i32_1 : i32, i32, i32
  }
  func.func @transform_4(%arg0: i32) -> (i32, i32) {
    %c0_i32 = arith.constant 0 : i32
    %c0_i32_0 = arith.constant 0 : i32
    %c0_i32_1 = arith.constant 0 : i32
    return %c0_i32, %c0_i32_0 : i32, i32
  }
  func.func @transform_5(%arg0: i32) -> (i32, i32, i32) {
    %c0_i32 = arith.constant 0 : i32
    %c0_i32_0 = arith.constant 0 : i32
    %c0_i32_1 = arith.constant 0 : i32
    %c0_i32_2 = arith.constant 0 : i32
    return %c0_i32, %c0_i32_0, %c0_i32_1 : i32, i32, i32
  }
  func.func @transform_6(%arg0: i32) -> (i32, i32) {
    %c0_i32 = arith.constant 0 : i32
    %c0_i32_0 = arith.constant 0 : i32
    %c0_i32_1 = arith.constant 0 : i32
    return %c0_i32, %c0_i32_0 : i32, i32
  }
  func.func @transform_7(%arg0: i32) -> (i32, i32) {
    %c0_i32 = arith.constant 0 : i32
    %c0_i32_0 = arith.constant 0 : i32
    return %arg0, %c0_i32 : i32, i32
  }
}

</mosaic_0001>

<bundles_post_ra>
// kernel: light_mnist_forward.1
= control target key start
LH: loop header
LB: loop body
LE: loop exit
PB: predicated region body
PF: predicated region fallthrough
CT: control target
= control target key end

     0   :  { %vm82_vm0 = vcmask 261120   ;;  %vm882_vm1 = vcmask 1040384   ;;  %vm1270_vm3 = vcmask 1046528   ;;  %vm2124_vm4 = vcmask 1041409   ;;  %s5091_s1 = inlined_call_operand.vmem [shape: f32[6,32,128], index: 1, kind: input, shape index: {}]   ;;  %s5092_s0 = inlined_call_operand.vmem [shape: f32[8,4,8,32], index: 0, kind: input, shape index: {}]   ;;  %s5093_s2 = inlined_call_operand.vmem [shape: f32[1,128], index: 2, kind: input, shape index: {}]   ;;  %s5094_s3 = inlined_call_operand.vmem [shape: f32[6,128,112], index: 3, kind: input, shape index: {}]   ;;  %s5095_s4 = inlined_call_operand.vmem [shape: f32[1,112], index: 4, kind: input, shape index: {}]   ;;  %s5096_s5 = inlined_call_operand.vmem [shape: f32[7,112,128], index: 5, kind: input, shape index: {}]   ;;  %s5097_s6 = inlined_call_operand.vmem [shape: f32[1,128], index: 6, kind: input, shape index: {}]   ;;  %s5098_s7 = inlined_call_operand.vmem [shape: f32[8,10], index: 7, kind: output, shape index: {}]  }
   0x1   :  { %v61_v0 = vld [vmem:[%s5091_s1 + $0x18] sm:$0xff]  ;;  %v60_v2 = vld [vmem:[%s5091_s1 + $0x10] sm:$0xff]  ;;  %v59_v4 = vld [vmem:[%s5091_s1 + $0x8] sm:$0xff]  ;;  %vm2127_vm5 = vcmask 1042434   ;;  %vm2130_vm6 = vcmask 1043459   ;;  %vm2133_vm7 = vcmask 1044484  }
   0x2   :  { %v65_v1 = vld [vmem:[%s5091_s1 + $0x38] sm:$0xff]  ;;  %191 = vmatpush.msra.mxu0 %v61_v0  ;;  %2753 = vmatpush.msra.mxu2 %v61_v0  ;;  %v64_v3 = vld [vmem:[%s5091_s1 + $0x30] sm:$0xff]  ;;  %v63_v5 = vld [vmem:[%s5091_s1 + $0x28] sm:$0xff]  ;;  %vm2136_vm8 = vcmask 1045509   ;;  %vm2139_vm9 = vcmask 1046534   ;;  %vm2142_vm10 = vcmask 1047559  }
   0x3   :  { %2754 = vmatpush.msra.mxu3 %v61_v0  ;;  %304 = vmatpush.msra.mxu1 %v65_v1  ;;  %v58_v6 = vld [vmem:[%s5091_s1] sm:$0xff]  ;;  %v2848_v9 = vld [vmem:[%s5092_s0 + $0xe8] sm:$0xff]  ;;  %v2853_v10 = vld [vmem:[%s5092_s0 + $0xf0] sm:$0xff]  ;;  %vm2144_vm11 = vcmask 916480   ;;  %vm2404_vm12 = vcmask 80896  }
   0x4   :  { %192 = vmatpush.msra.mxu0 %v60_v2  ;;  %2755 = vmatpush.msra.mxu2 %v60_v2  ;;  %v62_v7 = vld [vmem:[%s5091_s1 + $0x20] sm:$0xff]  ;;  %v69_v11 = vld [vmem:[%s5091_s1 + $0x58] sm:$0xff]  ;;  %v68_v14 = vld [vmem:[%s5091_s1 + $0x50] sm:$0xff] }
   0x5   :  { %2756 = vmatpush.msra.mxu3 %v60_v2  ;;  %305 = vmatpush.msra.mxu1 %v64_v3  ;;  %v2843_v8 = vld [vmem:[%s5092_s0] sm:$0xff]  ;;  %v77_v12 = vld [vmem:[%s5091_s1 + $0x98] sm:$0xff]  ;;  %v67_v15 = vld [vmem:[%s5091_s1 + $0x48] sm:$0xff] }
   0x6   :  { %193 = vmatpush.msra.mxu0 %v59_v4  ;;  %2757 = vmatpush.msra.mxu2 %v59_v4  ;;  %v81_v13 = vld [vmem:[%s5091_s1 + $0xb8] sm:$0xff]  ;;  %v66_v16 = vld [vmem:[%s5091_s1 + $0x40] sm:$0xff]  ;;  %v2884_v17 = vld [vmem:[%s5092_s0 + $0x8] sm:$0xff] }
   0x7   :  { %2758 = vmatpush.msra.mxu3 %v59_v4  ;;  %306 = vmatpush.msra.mxu1 %v63_v5  ;;  %v2889_v18 = vld [vmem:[%s5092_s0 + $0xf8] sm:$0xff]  ;;  %v72_v20 = vld [vmem:[%s5091_s1 + $0x70] sm:$0xff]  ;;  %v71_v21 = vld [vmem:[%s5091_s1 + $0x68] sm:$0xff] }
   0x8   :  { %194 = vmatpush.msra.mxu0 %v58_v6  ;;  %2759 = vmatpush.msra.mxu2 %v58_v6  ;;  %v73_v19 = vld [vmem:[%s5091_s1 + $0x78] sm:$0xff]  ;;  %v2911_v22 = vld [vmem:[%s5092_s0 + $0x10] sm:$0xff]  ;;  %v70_v23 = vld [vmem:[%s5091_s1 + $0x60] sm:$0xff] }
   0x9   :  { %2760 = vmatpush.msra.mxu3 %v58_v6  ;;  %307 = vmatpush.msra.mxu1 %v62_v7  ;;  %v2927_v24 = vld [vmem:[%s5092_s0 + $0x18] sm:$0xff]  ;;  %v2940_v25 = vld [vmem:[%s5092_s0 + $0x20] sm:$0xff]  ;;  %v2953_v26 = vld [vmem:[%s5092_s0 + $0x28] sm:$0xff] }
   0xa   :  { %2410 = vmatmul.msk.f32.vlgmr.msra.gmra.mxu0 %vm82_vm0, %v2843_v8  ;;  %2439 = vmatmul.msk.f32.vlgmr.msra.gmra.mxu2 %vm82_vm0, %v2848_v9  ;;  %v76_v27 = vld [vmem:[%s5091_s1 + $0x90] sm:$0xff]  ;;  %v2985_v30 = vld [vmem:[%s5092_s0 + $0x38] sm:$0xff]  ;;  %v2998_v31 = vld [vmem:[%s5092_s0 + $0x40] sm:$0xff] }
   0xb   :  { %2440 = vmatmul.msk.f32.vlgmr.msra.gmra.mxu3 %vm82_vm0, %v2853_v10  ;;  %2442 = vmatmul.msk.f32.vlgmr.msra.gmra.mxu1 %vm82_vm0, %v2843_v8  ;;  %v80_v28 = vld [vmem:[%s5091_s1 + $0xb0] sm:$0xff]  ;;  %v3011_v32 = vld [vmem:[%s5092_s0 + $0x48] sm:$0xff]  ;;  %v3037_v34 = vld [vmem:[%s5092_s0 + $0x58] sm:$0xff] }
   0xc   :  { %417 = vmatpush.msrb.mxu2 %v69_v11  ;;  %2761 = vmatpush.msrb.mxu3 %v65_v1  ;;  %v2972_v29 = vld [vmem:[%s5092_s0 + $0x30] sm:$0xff]  ;;  %v3050_v35 = vld [vmem:[%s5092_s0 + $0x60] sm:$0xff]  ;;  %v3063_v36 = vld [vmem:[%s5092_s0 + $0x68] sm:$0xff] }
   0xd   :  { %643 = vmatpush.msrb.mxu0 %v77_v12  ;;  %756 = vmatpush.msrb.mxu1 %v81_v13  ;;  %v3024_v33 = vld [vmem:[%s5092_s0 + $0x50] sm:$0xff]  ;;  %v75_v37 = vld [vmem:[%s5091_s1 + $0x88] sm:$0xff]  ;;  %v3095_v40 = vld [vmem:[%s5092_s0 + $0x78] sm:$0xff] }
   0xe   :  { %418 = vmatpush.msrb.mxu2 %v68_v14  ;;  %2762 = vmatpush.msrb.mxu3 %v64_v3  ;;  %v79_v38 = vld [vmem:[%s5091_s1 + $0xa8] sm:$0xff]  ;;  %v3082_v39 = vld [vmem:[%s5092_s0 + $0x70] sm:$0xff]  ;;  %v3108_v42 = vld [vmem:[%s5092_s0 + $0x80] sm:$0xff] }
   0xf   :  { %644 = vmatpush.msrb.mxu0 %v76_v27  ;;  %757 = vmatpush.msrb.mxu1 %v80_v28  ;;  %v3127_v47 = vld [vmem:[%s5092_s0 + $0x88] sm:$0xff]  ;;  %v3148_v52 = vld [vmem:[%s5092_s0 + $0x90] sm:$0xff]  ;;  %v3167_v57 = vld [vmem:[%s5092_s0 + $0x98] sm:$0xff] }
  0x10   :  { %419 = vmatpush.msrb.mxu2 %v67_v15  ;;  %2763 = vmatpush.msrb.mxu3 %v63_v5  ;;  %v3186_v63 = vld [vmem:[%s5092_s0 + $0xa0] sm:$0xff]  ;;  %v3210_v6 = vld [vmem:[%s5092_s0 + $0xa8] sm:$0xff]  ;;  %v3234_v15 = vld [vmem:[%s5092_s0 + $0xb0] sm:$0xff] }
  0x11   :  { %645 = vmatpush.msrb.mxu0 %v75_v37  ;;  %758 = vmatpush.msrb.mxu1 %v79_v38  ;;  %v74_v2 = vld [vmem:[%s5091_s1 + $0x80] sm:$0xff]  ;;  %v3254_v27 = vld [vmem:[%s5092_s0 + $0xb8] sm:$0xff]  ;;  %vm3665_vm2 = vmneg %vm882_vm1 }
  0x12   :  { %420 = vmatpush.msrb.mxu2 %v66_v16  ;;  %2411 = vmatmul.msk.f32.gmra.mxu0 %vm82_vm0, %v2884_v17  ;;  %v78_v11 = vld [vmem:[%s5091_s1 + $0xa0] sm:$0xff] }
  0x13   :  { %2441 = vmatmul.msk.f32.gmra.mxu3 %vm82_vm0, %v2889_v18  ;;  %2443 = vmatmul.msk.f32.gmra.mxu1 %vm82_vm0, %v2884_v17 }
  0x14   :  { %2474 = vmatmul.msk.f32.vlgmr.msrb.gmra.mxu2 %vm82_vm0, %v2843_v8  ;;  %2764 = vmatpush.msrb.mxu3 %v62_v7 }
  0x15   :  { %646 = vmatpush.msrb.mxu0 %v74_v2  ;;  %759 = vmatpush.msrb.mxu1 %v78_v11 }
  0x16   :  { %530 = vmatpush.msra.mxu3 %v73_v19 }
  0x18   :  { %531 = vmatpush.msra.mxu3 %v72_v20 }
  0x1a   :  { %532 = vmatpush.msra.mxu3 %v71_v21  ;;  %2412 = vmatmul.msk.f32.gmra.mxu0 %vm82_vm0, %v2911_v22 }
  0x1b   :  { %2444 = vmatmul.msk.f32.gmra.mxu1 %vm82_vm0, %v2911_v22  ;;  %2471 = vmatmul.msk.f32.vlgmr.msrb.gmra.mxu3 %vm82_vm0, %v2848_v9 }
  0x1c   :  { %2475 = vmatmul.msk.f32.gmra.mxu2 %vm82_vm0, %v2884_v17  ;;  %533 = vmatpush.msra.mxu3 %v70_v23 }
  0x22   :  { %2413 = vmatmul.msk.f32.gmra.mxu0 %vm82_vm0, %v2927_v24 }
  0x23   :  { %2445 = vmatmul.msk.f32.gmra.mxu1 %vm82_vm0, %v2927_v24  ;;  %2472 = vmatmul.msk.f32.gmra.mxu3 %vm82_vm0, %v2853_v10 }
  0x24   :  { %2476 = vmatmul.msk.f32.gmra.mxu2 %vm82_vm0, %v2911_v22 }
  0x2a   :  { %2414 = vmatmul.msk.f32.gmra.mxu0 %vm82_vm0, %v2940_v25 }
  0x2b   :  { %2446 = vmatmul.msk.f32.gmra.mxu1 %vm82_vm0, %v2940_v25  ;;  %2473 = vmatmul.msk.f32.gmra.mxu3 %vm82_vm0, %v2889_v18 }
  0x2c   :  { %2477 = vmatmul.msk.f32.gmra.mxu2 %vm82_vm0, %v2927_v24 }
  0x32   :  { %2415 = vmatmul.msk.f32.gmra.mxu0 %vm82_vm0, %v2953_v26 }
  0x33   :  { %2447 = vmatmul.msk.f32.gmra.mxu1 %vm82_vm0, %v2953_v26  ;;  %2506 = vmatmul.msk.f32.vlgmr.msra.gmra.mxu3 %vm82_vm0, %v2843_v8 }
  0x34   :  { %2478 = vmatmul.msk.f32.gmra.mxu2 %vm82_vm0, %v2940_v25 }
  0x3a   :  { %2416 = vmatmul.msk.f32.gmra.mxu0 %vm82_vm0, %v2972_v29 }
  0x3b   :  { %2448 = vmatmul.msk.f32.gmra.mxu1 %vm82_vm0, %v2972_v29  ;;  %2507 = vmatmul.msk.f32.gmra.mxu3 %vm82_vm0, %v2884_v17 }
  0x3c   :  { %2479 = vmatmul.msk.f32.gmra.mxu2 %vm82_vm0, %v2953_v26 }
  0x42   :  { %2417 = vmatmul.msk.f32.gmra.mxu0 %vm82_vm0, %v2985_v30 }
  0x43   :  { %2449 = vmatmul.msk.f32.gmra.mxu1 %vm82_vm0, %v2985_v30  ;;  %2508 = vmatmul.msk.f32.gmra.mxu3 %vm82_vm0, %v2911_v22 }
  0x44   :  { %2480 = vmatmul.msk.f32.gmra.mxu2 %vm82_vm0, %v2972_v29 }
  0x4a   :  { %2418 = vmatmul.msk.f32.gmra.mxu0 %vm82_vm0, %v2998_v31 }
  0x4b   :  { %2450 = vmatmul.msk.f32.gmra.mxu1 %vm82_vm0, %v2998_v31  ;;  %2509 = vmatmul.msk.f32.gmra.mxu3 %vm82_vm0, %v2927_v24 }
  0x4c   :  { %2481 = vmatmul.msk.f32.gmra.mxu2 %vm82_vm0, %v2985_v30 }
  0x52   :  { %2419 = vmatmul.msk.f32.gmra.mxu0 %vm82_vm0, %v3011_v32 }
  0x53   :  { %2451 = vmatmul.msk.f32.gmra.mxu1 %vm82_vm0, %v3011_v32  ;;  %2510 = vmatmul.msk.f32.gmra.mxu3 %vm82_vm0, %v2940_v25 }
  0x54   :  { %2482 = vmatmul.msk.f32.gmra.mxu2 %vm82_vm0, %v2998_v31 }
  0x5a   :  { %2420 = vmatmul.msk.f32.gmra.mxu0 %vm82_vm0, %v3024_v33 }
  0x5b   :  { %2452 = vmatmul.msk.f32.gmra.mxu1 %vm82_vm0, %v3024_v33  ;;  %2511 = vmatmul.msk.f32.gmra.mxu3 %vm82_vm0, %v2953_v26 }
  0x5c   :  { %2483 = vmatmul.msk.f32.gmra.mxu2 %vm82_vm0, %v3011_v32 }
  0x62   :  { %2421 = vmatmul.msk.f32.gmra.mxu0 %vm82_vm0, %v3037_v34 }
  0x63   :  { %2453 = vmatmul.msk.f32.gmra.mxu1 %vm82_vm0, %v3037_v34  ;;  %2512 = vmatmul.msk.f32.gmra.mxu3 %vm82_vm0, %v2972_v29 }
  0x64   :  { %2484 = vmatmul.msk.f32.gmra.mxu2 %vm82_vm0, %v3024_v33 }
  0x6a   :  { %2422 = vmatmul.msk.f32.gmra.mxu0 %vm82_vm0, %v3050_v35 }
  0x6b   :  { %2454 = vmatmul.msk.f32.gmra.mxu1 %vm82_vm0, %v3050_v35  ;;  %2513 = vmatmul.msk.f32.gmra.mxu3 %vm82_vm0, %v2985_v30 }
  0x6c   :  { %2485 = vmatmul.msk.f32.gmra.mxu2 %vm82_vm0, %v3037_v34 }
  0x72   :  { %2423 = vmatmul.msk.f32.gmra.mxu0 %vm82_vm0, %v3063_v36 }
  0x73   :  { %2455 = vmatmul.msk.f32.gmra.mxu1 %vm82_vm0, %v3063_v36  ;;  %2514 = vmatmul.msk.f32.gmra.mxu3 %vm82_vm0, %v2998_v31 }
  0x74   :  { %2486 = vmatmul.msk.f32.gmra.mxu2 %vm82_vm0, %v3050_v35 }
  0x7a   :  { %2424 = vmatmul.msk.f32.gmra.mxu0 %vm82_vm0, %v3082_v39 }
  0x7b   :  { %2456 = vmatmul.msk.f32.gmra.mxu1 %vm82_vm0, %v3082_v39  ;;  %2515 = vmatmul.msk.f32.gmra.mxu3 %vm82_vm0, %v3011_v32 }
  0x7c   :  { %2487 = vmatmul.msk.f32.gmra.mxu2 %vm82_vm0, %v3063_v36 }
  0x82   :  { %2425 = vmatmul.msk.f32.gmra.mxu0 %vm82_vm0, %v3095_v40 }
  0x83   :  { %2457 = vmatmul.msk.f32.gmra.mxu1 %vm82_vm0, %v3095_v40  ;;  %2516 = vmatmul.msk.f32.gmra.mxu3 %vm82_vm0, %v3024_v33 }
  0x84   :  { %2488 = vmatmul.msk.f32.gmra.mxu2 %vm82_vm0, %v3082_v39 }
  0x87   :  { %v196_v41 = vpop.f32.mrf.mxu0 }
  0x88   :  { %v3110_v43 = vpop.f32.mrf.mxu1 }
  0x8a   :  { %2426 = vmatmul.msk.f32.gmra.mxu0 %vm82_vm0, %v3108_v42 }
  0x8b   :  { %2458 = vmatmul.msk.f32.gmra.mxu1 %vm82_vm0, %v3108_v42  ;;  %2517 = vmatmul.msk.f32.gmra.mxu3 %vm82_vm0, %v3037_v34 }
  0x8c   :  { %2489 = vmatmul.msk.f32.gmra.mxu2 %vm82_vm0, %v3095_v40 }
  0x8d   :  { %v3120_v44 = vpop.f32.mrf.mxu2 }
  0x8e   :  { %5099 = vst [vmem:[#allocation2_spill] sm:$0xff] %v3120_v44  ;;  %v3122_v45 = vpop.f32.mrf.mxu3 }
  0x8f   :  { %5100 = vst [vmem:[#allocation3_spill] sm:$0xff] %v3122_v45  ;;  %v199_v46 = vpop.f32.mrf.mxu0 }
  0x90   :  { %v3129_v48 = vpop.f32.mrf.mxu1 }
  0x92   :  { %2427 = vmatmul.msk.f32.gmra.mxu0 %vm82_vm0, %v3127_v47 }
  0x93   :  { %2459 = vmatmul.msk.f32.gmra.mxu1 %vm82_vm0, %v3127_v47  ;;  %2518 = vmatmul.msk.f32.gmra.mxu3 %vm82_vm0, %v3050_v35 }
  0x94   :  { %2490 = vmatmul.msk.f32.gmra.mxu2 %vm82_vm0, %v3108_v42 }
  0x96   :  { %v3139_v49 = vpop.f32.mrf.mxu3 }
  0x97   :  { %5101 = vst [vmem:[#allocation4_spill] sm:$0xff] %v3139_v49  ;;  %v3141_v50 = vpop.f32.mrf.mxu2  ;;  %v3143_v51 = vpop.f32.mrf.mxu0  ;;  %v3336_v49 = vld [vmem:[%s5092_s0 + $0xd8] sm:$0xff] }
  0x98   :  { %v3150_v53 = vpop.f32.mrf.mxu1 }
  0x9a   :  { %2428 = vmatmul.msk.f32.gmra.mxu0 %vm82_vm0, %v3148_v52 }
  0x9b   :  { %2460 = vmatmul.msk.f32.gmra.mxu1 %vm82_vm0, %v3148_v52  ;;  %2519 = vmatmul.msk.f32.gmra.mxu3 %vm82_vm0, %v3063_v36 }
  0x9c   :  { %2491 = vmatmul.msk.f32.gmra.mxu2 %vm82_vm0, %v3127_v47 }
  0x9e   :  { %v3160_v54 = vpop.f32.mrf.mxu3 }
  0x9f   :  { %5102 = vst [vmem:[#allocation5_spill] sm:$0xff] %v3160_v54  ;;  %v425_v55 = vpop.f32.mrf.mxu2  ;;  %v3162_v56 = vpop.f32.mrf.mxu0 }
  0xa0   :  { %v3169_v58 = vadd.f32 %v425_v55, %v196_v41  ;;  %v3171_v59 = vpop.f32.mrf.mxu1  ;;  %v3276_v55 = vld [vmem:[%s5092_s0 + $0xc0] sm:$0xff] }
  0xa2   :  { %2429 = vmatmul.msk.f32.gmra.mxu0 %vm82_vm0, %v3167_v57 }
  0xa3   :  { %2461 = vmatmul.msk.f32.gmra.mxu1 %vm82_vm0, %v3167_v57  ;;  %2520 = vmatmul.msk.f32.gmra.mxu3 %vm82_vm0, %v3082_v39 }
  0xa4   :  { %2492 = vmatmul.msk.f32.gmra.mxu2 %vm82_vm0, %v3148_v52 }
  0xa6   :  { %v3181_v60 = vpop.f32.mrf.mxu3 }
  0xa7   :  { %5103 = vst [vmem:[#allocation6_spill] sm:$0xff] %v3181_v60  ;;  %v428_v61 = vpop.f32.mrf.mxu2  ;;  %v208_v62 = vpop.f32.mrf.mxu0 }
  0xa8   :  { %v3188_v0 = vadd.f32 %v428_v61, %v199_v46  ;;  %v3190_v1 = vpop.f32.mrf.mxu1 }
  0xaa   :  { %2430 = vmatmul.msk.f32.gmra.mxu0 %vm82_vm0, %v3186_v63 }
  0xab   :  { %2462 = vmatmul.msk.f32.gmra.mxu1 %vm82_vm0, %v3186_v63  ;;  %2521 = vmatmul.msk.f32.gmra.mxu3 %vm82_vm0, %v3095_v40 }
  0xac   :  { %2493 = vmatmul.msk.f32.gmra.mxu2 %vm82_vm0, %v3167_v57 }
  0xae   :  { %v3203_v3 = vpop.f32.mrf.mxu3 }
  0xaf   :  { %5104 = vst [vmem:[#allocation7_spill] sm:$0xff] %v3203_v3  ;;  %v3205_v4 = vpop.f32.mrf.mxu2  ;;  %v211_v5 = vpop.f32.mrf.mxu0 }
  0xb0   :  { %v3212_v7 = vpop.f32.mrf.mxu1 }
  0xb2   :  { %2431 = vmatmul.msk.f32.gmra.mxu0 %vm82_vm0, %v3210_v6 }
  0xb3   :  { %2463 = vmatmul.msk.f32.gmra.mxu1 %vm82_vm0, %v3210_v6  ;;  %2522 = vmatmul.msk.f32.gmra.mxu3 %vm82_vm0, %v3108_v42 }
  0xb4   :  { %2494 = vmatmul.msk.f32.gmra.mxu2 %vm82_vm0, %v3186_v63 }
  0xb6   :  { %v3225_v12 = vpop.f32.mrf.mxu3 }
  0xb7   :  { %v3227_v13 = vpop.f32.mrf.mxu2  ;;  %v3229_v14 = vpop.f32.mrf.mxu0 }
  0xb8   :  { %v3236_v16 = vpop.f32.mrf.mxu1 }
  0xba   :  { %2432 = vmatmul.msk.f32.gmra.mxu0 %vm82_vm0, %v3234_v15 }
  0xbb   :  { %2464 = vmatmul.msk.f32.gmra.mxu1 %vm82_vm0, %v3234_v15  ;;  %2523 = vmatmul.msk.f32.gmra.mxu3 %vm82_vm0, %v3127_v47 }
  0xbc   :  { %2495 = vmatmul.msk.f32.gmra.mxu2 %vm82_vm0, %v3210_v6 }
  0xbe   :  { %v538_v19 = vpop.f32.mrf.mxu3 }
  0xbf   :  { %v437_v20 = vpop.f32.mrf.mxu2  ;;  %v3247_v21 = vadd.f32 %v538_v19, %v3110_v43  ;;  %v3249_v23 = vpop.f32.mrf.mxu0 }
  0xc0   :  { %v3256_v28 = vadd.f32 %v437_v20, %v208_v62  ;;  %v3258_v37 = vpop.f32.mrf.mxu1 }
  0xc2   :  { %2433 = vmatmul.msk.f32.gmra.mxu0 %vm82_vm0, %v3254_v27 }
  0xc3   :  { %2465 = vmatmul.msk.f32.gmra.mxu1 %vm82_vm0, %v3254_v27  ;;  %2524 = vmatmul.msk.f32.gmra.mxu3 %vm82_vm0, %v3148_v52 }
  0xc4   :  { %2496 = vmatmul.msk.f32.gmra.mxu2 %vm82_vm0, %v3234_v15 }
  0xc6   :  { %v541_v38 = vpop.f32.mrf.mxu3 }
  0xc7   :  { %v440_v41 = vpop.f32.mrf.mxu2  ;;  %v3269_v43 = vadd.f32 %v541_v38, %v3129_v48  ;;  %v3271_v46 = vpop.f32.mrf.mxu0  ;;  %v3316_v38 = vld [vmem:[%s5092_s0 + $0xd0] sm:$0xff] }
  0xc8   :  { %v3278_v61 = vadd.f32 %v440_v41, %v211_v5  ;;  %v3280_v62 = vpop.f32.mrf.mxu1  ;;  %v3297_v5 = vld [vmem:[%s5092_s0 + $0xc8] sm:$0xff] }
  0xca   :  { %2434 = vmatmul.msk.f32.gmra.mxu0 %vm82_vm0, %v3276_v55 }
  0xcb   :  { %2466 = vmatmul.msk.f32.gmra.mxu1 %vm82_vm0, %v3276_v55  ;;  %2525 = vmatmul.msk.f32.gmra.mxu3 %vm82_vm0, %v3167_v57 }
  0xcc   :  { %2497 = vmatmul.msk.f32.gmra.mxu2 %vm82_vm0, %v3254_v27 }
  0xce   :  { %v3290_v48 = vpop.f32.mrf.mxu3 }
  0xcf   :  { %v3292_v2 = vpop.f32.mrf.mxu0 }
  0xd0   :  { %5105 = vst [vmem:[#allocation8_spill] sm:$0xff] %v3292_v2  ;;  %v3299_v11 = vpop.f32.mrf.mxu1 }
  0xd1   :  { %5106 = vst [vmem:[#allocation9_spill] sm:$0xff] %v3299_v11  ;;  %v3356_v11 = vld [vmem:[%s5092_s0 + $0xe0] sm:$0xff] }
  0xd2   :  { %2435 = vmatmul.msk.f32.gmra.mxu0 %vm82_vm0, %v3297_v5 }
  0xd3   :  { %2467 = vmatmul.msk.f32.gmra.mxu1 %vm82_vm0, %v3297_v5  ;;  %2526 = vmatmul.msk.f32.gmra.mxu3 %vm82_vm0, %v3186_v63 }
  0xd4   :  { %2498 = vmatmul.msk.f32.gmra.mxu2 %vm82_vm0, %v3276_v55 }
  0xd6   :  { %v3309_v19 = vpop.f32.mrf.mxu3 }
  0xd7   :  { %v3311_v20 = vpop.f32.mrf.mxu0 }
  0xd8   :  { %v3318_v41 = vpop.f32.mrf.mxu1 }
  0xda   :  { %2436 = vmatmul.msk.f32.gmra.mxu0 %vm82_vm0, %v3316_v38 }
  0xdb   :  { %2468 = vmatmul.msk.f32.gmra.mxu1 %vm82_vm0, %v3316_v38  ;;  %2527 = vmatmul.msk.f32.gmra.mxu3 %vm82_vm0, %v3210_v6 }
  0xdc   :  { %2499 = vmatmul.msk.f32.gmra.mxu2 %vm82_vm0, %v3297_v5 }
  0xde   :  { %v550_v54 = vpop.f32.mrf.mxu3 }
  0xdf   :  { %v3329_v44 = vadd.f32 %v550_v54, %v3190_v1  ;;  %v3331_v3 = vpop.f32.mrf.mxu0 }
  0xe0   :  { %v3338_v60 = vpop.f32.mrf.mxu1 }
  0xe2   :  { %2437 = vmatmul.msk.f32.gmra.mxu0 %vm82_vm0, %v3336_v49 }
  0xe3   :  { %2469 = vmatmul.msk.f32.gmra.mxu1 %vm82_vm0, %v3336_v49  ;;  %2528 = vmatmul.msk.f32.gmra.mxu3 %vm82_vm0, %v3234_v15 }
  0xe4   :  { %2500 = vmatmul.msk.f32.gmra.mxu2 %vm82_vm0, %v3316_v38 }
  0xe6   :  { %v553_v54 = vpop.f32.mrf.mxu3 }
  0xe7   :  { %v3349_v1 = vadd.f32 %v553_v54, %v3212_v7  ;;  %v3351_v45 = vpop.f32.mrf.mxu0 }
  0xe8   :  { %5107 = vst [vmem:[#allocation10_spill] sm:$0xff] %v3351_v45  ;;  %v3358_v2 = vpop.f32.mrf.mxu1 }
  0xe9   :  { %5108 = vst [vmem:[#allocation11_spill] sm:$0xff] %v3358_v2 }
  0xea   :  { %2438 = vmatmul.msk.f32.gmra.mxu0 %vm82_vm0, %v3356_v11 }
  0xeb   :  { %2470 = vmatmul.msk.f32.gmra.mxu1 %vm82_vm0, %v3356_v11  ;;  %2529 = vmatmul.msk.f32.gmra.mxu3 %vm82_vm0, %v3254_v27 }
  0xec   :  { %2501 = vmatmul.msk.f32.gmra.mxu2 %vm82_vm0, %v3336_v49 }
  0xef   :  { %v3368_v7 = vpop.f32.mrf.mxu0 }
  0xf0   :  { %5109 = vst [vmem:[#allocation12_spill] sm:$0xff] %v3368_v7  ;;  %v3370_v54 = vpop.f32.mrf.mxu1 }
  0xf1   :  { %5110 = vst [vmem:[#allocation13_spill] sm:$0xff] %v3370_v54 }
  0xf2   :  { %2538 = vmatmul.msk.f32.vlgmr.msrb.gmra.mxu0 %vm82_vm0, %v2843_v8 }
  0xf3   :  { %2530 = vmatmul.msk.f32.gmra.mxu3 %vm82_vm0, %v3276_v55  ;;  %2570 = vmatmul.msk.f32.vlgmr.msrb.gmra.mxu1 %vm82_vm0, %v2843_v8 }
  0xf4   :  { %2502 = vmatmul.msk.f32.gmra.mxu2 %vm82_vm0, %v3356_v11 }
  0xf7   :  { %v3380_v2 = vpop.f32.mrf.mxu0 }
  0xf8   :  { %v3382_v45 = vpop.f32.mrf.mxu1 }
  0xfa   :  { %2539 = vmatmul.msk.f32.gmra.mxu0 %vm82_vm0, %v2884_v17 }
  0xfb   :  { %2531 = vmatmul.msk.f32.gmra.mxu3 %vm82_vm0, %v3297_v5  ;;  %2571 = vmatmul.msk.f32.gmra.mxu1 %vm82_vm0, %v2884_v17 }
  0xfc   :  { %2503 = vmatmul.msk.f32.gmra.mxu2 %vm82_vm0, %v2848_v9 }
  0xff   :  { %v3392_v8 = vpop.f32.mrf.mxu0 }
 0x100   :  { %5111 = vst [vmem:[#allocation14_spill] sm:$0xff] %v3392_v8  ;;  %v3394_v54 = vpop.f32.mrf.mxu1 }
 0x101   :  { %5112 = vst [vmem:[#allocation15_spill] sm:$0xff] %v3394_v54  ;;  %v3414_v54 = vpop.f32.mrf.mxu2 }
 0x102   :  { %2540 = vmatmul.msk.f32.gmra.mxu0 %vm82_vm0, %v2911_v22 }
 0x103   :  { %2532 = vmatmul.msk.f32.gmra.mxu3 %vm82_vm0, %v3316_v38  ;;  %2572 = vmatmul.msk.f32.gmra.mxu1 %vm82_vm0, %v2911_v22 }
 0x104   :  { %2504 = vmatmul.msk.f32.gmra.mxu2 %vm82_vm0, %v2853_v10 }
 0x107   :  { %v3404_v17 = vpop.f32.mrf.mxu0 }
 0x108   :  { %5113 = vst [vmem:[#allocation16_spill] sm:$0xff] %v3404_v17  ;;  %v3406_v7 = vpop.f32.mrf.mxu1  ;;  %v1310_v17 = vld [vmem:[%s5094_s3 + $0xf8] sm:$0xff] }
 0x109   :  { %5114 = vst [vmem:[#allocation17_spill] sm:$0xff] %v3406_v7  ;;  %1440 = vmatpush.msrb.mxu3 %v1310_v17 }
 0x10a   :  { %2541 = vmatmul.msk.f32.gmra.mxu0 %vm82_vm0, %v2927_v24 }
 0x10b   :  { %2533 = vmatmul.msk.f32.gmra.mxu3 %vm82_vm0, %v3336_v49  ;;  %2573 = vmatmul.msk.f32.gmra.mxu1 %vm82_vm0, %v2927_v24 }
 0x10c   :  { %2505 = vmatmul.msk.f32.gmra.mxu2 %vm82_vm0, %v2889_v18 }
 0x10f   :  { %v3418_v22 = vpop.f32.mrf.mxu0 }
 0x110   :  { %5115 = vst [vmem:[#allocation18_spill] sm:$0xff] %v3418_v22  ;;  %v3420_v8 = vpop.f32.mrf.mxu1 }
 0x111   :  { %5116 = vst [vmem:[#allocation19_spill] sm:$0xff] %v3420_v8 }
 0x112   :  { %2542 = vmatmul.msk.f32.gmra.mxu0 %vm82_vm0, %v2940_v25 }
 0x113   :  { %2534 = vmatmul.msk.f32.gmra.mxu3 %vm82_vm0, %v3356_v11  ;;  %2574 = vmatmul.msk.f32.gmra.mxu1 %vm82_vm0, %v2940_v25  ;;  %v1294_v25 = vld [vmem:[%s5094_s3 + $0x78] sm:$0xff] }
 0x114   :  { %1375 = vmatpush.msra.mxu2 %v1294_v25  ;;  %v1309_v25 = vld [vmem:[%s5094_s3 + $0xf0] sm:$0xff] }
 0x115   :  { %1441 = vmatpush.msrb.mxu3 %v1309_v25 }
 0x117   :  { %v3428_v7 = vpop.f32.mrf.mxu0 }
 0x118   :  { %v3430_v24 = vpop.f32.mrf.mxu1 }
 0x11a   :  { %2543 = vmatmul.msk.f32.gmra.mxu0 %vm82_vm0, %v2953_v26 }
 0x11b   :  { %2535 = vmatmul.msk.f32.gmra.mxu3 %vm82_vm0, %v2848_v9  ;;  %2575 = vmatmul.msk.f32.gmra.mxu1 %vm82_vm0, %v2953_v26 }
 0x11f   :  { %v3438_v8 = vpop.f32.mrf.mxu0 }
 0x120   :  { %5117 = vst [vmem:[#allocation20_spill] sm:$0xff] %v3438_v8  ;;  %v3440_v22 = vpop.f32.mrf.mxu1 }
 0x121   :  { %5118 = vst [vmem:[#allocation21_spill] sm:$0xff] %v3440_v22  ;;  %v3460_v22 = vpop.f32.mrf.mxu3 }
 0x122   :  { %2544 = vmatmul.msk.f32.gmra.mxu0 %vm82_vm0, %v2972_v29 }
 0x123   :  { %2536 = vmatmul.msk.f32.gmra.mxu3 %vm82_vm0, %v2853_v10  ;;  %2576 = vmatmul.msk.f32.gmra.mxu1 %vm82_vm0, %v2972_v29  ;;  %v1293_v29 = vld [vmem:[%s5094_s3 + $0x70] sm:$0xff] }
 0x124   :  { %1376 = vmatpush.msra.mxu2 %v1293_v29  ;;  %v1308_v29 = vld [vmem:[%s5094_s3 + $0xe8] sm:$0xff] }
 0x125   :  { %1442 = vmatpush.msrb.mxu3 %v1308_v29 }
 0x127   :  { %v3454_v9 = vpop.f32.mrf.mxu0 }
 0x128   :  { %5119 = vst [vmem:[#allocation22_spill] sm:$0xff] %v3454_v9  ;;  %v3456_v26 = vpop.f32.mrf.mxu1  ;;  %v1307_v9 = vld [vmem:[%s5094_s3 + $0xe0] sm:$0xff] }
 0x129   :  { %5120 = vst [vmem:[#allocation23_spill] sm:$0xff] %v3456_v26  ;;  %v1291_v26 = vld [vmem:[%s5094_s3 + $0x60] sm:$0xff]  ;;  %1443 = vmatpush.msrb.mxu3 %v1307_v9  ;;  %v1289_v9 = vld [vmem:[%s5094_s3 + $0x50] sm:$0xff] }
 0x12a   :  { %2545 = vmatmul.msk.f32.gmra.mxu0 %vm82_vm0, %v2985_v30 }
 0x12b   :  { %2537 = vmatmul.msk.f32.gmra.mxu3 %vm82_vm0, %v2889_v18  ;;  %2577 = vmatmul.msk.f32.gmra.mxu1 %vm82_vm0, %v2985_v30 }
 0x12f   :  { %v3466_v17 = vpop.f32.mrf.mxu0 }
 0x130   :  { %5121 = vst [vmem:[#allocation24_spill] sm:$0xff] %v3466_v17  ;;  %v3468_v10 = vpop.f32.mrf.mxu1 }
 0x131   :  { %5122 = vst [vmem:[#allocation25_spill] sm:$0xff] %v3468_v10 }
 0x132   :  { %2546 = vmatmul.msk.f32.gmra.mxu0 %vm82_vm0, %v2998_v31 }
 0x133   :  { %2578 = vmatmul.msk.f32.gmra.mxu1 %vm82_vm0, %v2998_v31  ;;  %v1292_v31 = vld [vmem:[%s5094_s3 + $0x68] sm:$0xff] }
 0x134   :  { %1377 = vmatpush.msra.mxu2 %v1292_v31  ;;  %v1306_v31 = vld [vmem:[%s5094_s3 + $0xd8] sm:$0xff] }
 0x135   :  { %1444 = vmatpush.msrb.mxu3 %v1306_v31  ;;  %v1287_v31 = vld [vmem:[%s5094_s3 + $0x40] sm:$0xff] }
 0x136   :  { %1378 = vmatpush.msra.mxu2 %v1291_v26  ;;  %v1305_v26 = vld [vmem:[%s5094_s3 + $0xd0] sm:$0xff] }
 0x137   :  { %v3480_v18 = vpop.f32.mrf.mxu0  ;;  %1445 = vmatpush.msrb.mxu3 %v1305_v26  ;;  %v1302_v26 = vld [vmem:[%s5094_s3 + $0xb8] sm:$0xff] }
 0x138   :  { %5123 = vst [vmem:[#allocation26_spill] sm:$0xff] %v3480_v18  ;;  %v3482_v30 = vpop.f32.mrf.mxu1 }
 0x139   :  { %5124 = vst [vmem:[#allocation27_spill] sm:$0xff] %v3482_v30 }
 0x13a   :  { %2547 = vmatmul.msk.f32.gmra.mxu0 %vm82_vm0, %v3011_v32 }
 0x13b   :  { %2579 = vmatmul.msk.f32.gmra.mxu1 %vm82_vm0, %v3011_v32 }
 0x13f   :  { %v3488_v10 = vpop.f32.mrf.mxu0 }
 0x140   :  { %5125 = vst [vmem:[#allocation28_spill] sm:$0xff] %v3488_v10  ;;  %v3490_v17 = vpop.f32.mrf.mxu1  ;;  %v947_v10 = vrot.slane %v3150_v53, 7 }
 0x141   :  { %5126 = vst [vmem:[#allocation29_spill] sm:$0xff] %v3490_v17 }
 0x142   :  { %2548 = vmatmul.msk.f32.gmra.mxu0 %vm82_vm0, %v3024_v33 }
 0x143   :  { %2580 = vmatmul.msk.f32.gmra.mxu1 %vm82_vm0, %v3024_v33  ;;  %v1290_v33 = vld [vmem:[%s5094_s3 + $0x58] sm:$0xff] }
 0x144   :  { %1379 = vmatpush.msra.mxu2 %v1290_v33  ;;  %v1304_v33 = vld [vmem:[%s5094_s3 + $0xc8] sm:$0xff] }
 0x145   :  { %1446 = vmatpush.msrb.mxu3 %v1304_v33  ;;  %v1285_v33 = vld [vmem:[%s5094_s3 + $0x30] sm:$0xff] }
 0x146   :  { %1380 = vmatpush.msra.mxu2 %v1289_v9  ;;  %v1303_v9 = vld [vmem:[%s5094_s3 + $0xc0] sm:$0xff] }
 0x147   :  { %v3502_v32 = vpop.f32.mrf.mxu0  ;;  %1447 = vmatpush.msrb.mxu3 %v1303_v9  ;;  %v1284_v9 = vld [vmem:[%s5094_s3 + $0x28] sm:$0xff] }
 0x148   :  { %5127 = vst [vmem:[#allocation30_spill] sm:$0xff] %v3502_v32  ;;  %v3504_v25 = vpop.f32.mrf.mxu1 }
 0x149   :  { %5128 = vst [vmem:[#allocation31_spill] sm:$0xff] %v3504_v25  ;;  %v1288_v25 = vld [vmem:[%s5094_s3 + $0x48] sm:$0xff]  ;;  %1448 = vmatpush.msrb.mxu3 %v1302_v26  ;;  %v1283_v26 = vld [vmem:[%s5094_s3 + $0x20] sm:$0xff] }
 0x14a   :  { %2549 = vmatmul.msk.f32.gmra.mxu0 %vm82_vm0, %v3037_v34  ;;  %1381 = vmatpush.msra.mxu2 %v1288_v25  ;;  %v1286_v25 = vld [vmem:[%s5094_s3 + $0x38] sm:$0xff] }
 0x14b   :  { %2581 = vmatmul.msk.f32.gmra.mxu1 %vm82_vm0, %v3037_v34 }
 0x14c   :  { %1382 = vmatpush.msra.mxu2 %v1287_v31 }
 0x14e   :  { %1383 = vmatpush.msra.mxu2 %v1286_v25  ;;  %v1300_v25 = vld [vmem:[%s5094_s3 + $0xa8] sm:$0xff] }
 0x14f   :  { %v3528_v29 = vpop.f32.mrf.mxu0 }
 0x150   :  { %5129 = vst [vmem:[#allocation32_spill] sm:$0xff] %v3528_v29  ;;  %v3530_v34 = vpop.f32.mrf.mxu1  ;;  %1384 = vmatpush.msra.mxu2 %v1285_v33  ;;  %v1299_v33 = vld [vmem:[%s5094_s3 + $0xa0] sm:$0xff]  ;;  %v1281_v29 = vld [vmem:[%s5094_s3 + $0x10] sm:$0xff] }
 0x151   :  { %5130 = vst [vmem:[#allocation33_spill] sm:$0xff] %v3530_v34 }
 0x152   :  { %2550 = vmatmul.msk.f32.gmra.mxu0 %vm82_vm0, %v3050_v35  ;;  %1385 = vmatpush.msra.mxu2 %v1284_v9  ;;  %v1298_v9 = vld [vmem:[%s5094_s3 + $0x98] sm:$0xff] }
 0x153   :  { %2582 = vmatmul.msk.f32.gmra.mxu1 %vm82_vm0, %v3050_v35  ;;  %v1301_v35 = vld [vmem:[%s5094_s3 + $0xb0] sm:$0xff] }
 0x154   :  { %1449 = vmatpush.msrb.mxu3 %v1301_v35  ;;  %1386 = vmatpush.msra.mxu2 %v1283_v26  ;;  %v1282_v35 = vld [vmem:[%s5094_s3 + $0x18] sm:$0xff]  ;;  %v3594_v26 = vpop.f32.mrf.mxu3 }
 0x156   :  { %1450 = vmatpush.msrb.mxu3 %v1300_v25  ;;  %1387 = vmatpush.msra.mxu2 %v1282_v35  ;;  %v3586_v25 = vpop.f32.mrf.mxu2  ;;  %v1280_v35 = vld [vmem:[%s5094_s3 + $0x8] sm:$0xff] }
 0x157   :  { %v3560_v31 = vpop.f32.mrf.mxu0 }
 0x158   :  { %5131 = vst [vmem:[#allocation34_spill] sm:$0xff] %v3560_v31  ;;  %v3562_v34 = vpop.f32.mrf.mxu1  ;;  %1451 = vmatpush.msrb.mxu3 %v1299_v33  ;;  %1388 = vmatpush.msra.mxu2 %v1281_v29  ;;  %v1279_v29 = vld [vmem:[%s5094_s3] sm:$0xff]  ;;  %v866_v31 = vrot.slane %v3143_v51, 7 }
 0x159   :  { %5132 = vst [vmem:[#allocation35_spill] sm:$0xff] %v3562_v34 }
 0x15a   :  { %2551 = vmatmul.msk.f32.gmra.mxu0 %vm82_vm0, %v3063_v36  ;;  %1452 = vmatpush.msrb.mxu3 %v1298_v9  ;;  %v1296_v9 = vld [vmem:[%s5094_s3 + $0x88] sm:$0xff] }
 0x15b   :  { %2583 = vmatmul.msk.f32.gmra.mxu1 %vm82_vm0, %v3063_v36  ;;  %v1297_v36 = vld [vmem:[%s5094_s3 + $0x90] sm:$0xff]  ;;  %1389 = vmatpush.msra.mxu2 %v1280_v35 }
 0x15c   :  { %1453 = vmatpush.msrb.mxu3 %v1297_v36  ;;  %v1295_v36 = vld [vmem:[%s5094_s3 + $0x80] sm:$0xff]  ;;  %v3625_v17 = vpop.f32.mrf.mxu3 }
 0x15d   :  { %1390 = vmatpush.msra.mxu2 %v1279_v29  ;;  %v963_v29 = vsel %vm882_vm1, 0.0, %v947_v10 }
 0x15e   :  { %1454 = vmatpush.msrb.mxu3 %v1296_v9  ;;  %v3620_v9 = vpop.f32.mrf.mxu2 }
 0x15f   :  { %v3596_v33 = vpop.f32.mrf.mxu0 }
 0x160   :  { %5133 = vst [vmem:[#allocation36_spill] sm:$0xff] %v3596_v33  ;;  %v3598_v32 = vpop.f32.mrf.mxu1  ;;  %1455 = vmatpush.msrb.mxu3 %v1295_v36  ;;  %v979_v33 = vrot.slane %v3290_v48, 7  ;;  %v883_v48 = vsel %vm882_vm1, 0.0, %v866_v31  ;;  %v1035_v36 = vrot.slane %v3162_v56, 7 }
 0x161   :  { %5134 = vst [vmem:[#allocation37_spill] sm:$0xff] %v3598_v32  ;;  %v899_v32 = vrot.slane %v3205_v4, 7 }
 0x162   :  { %2552 = vmatmul.msk.f32.gmra.mxu0 %vm82_vm0, %v3082_v39  ;;  %v995_v4 = vsel %vm882_vm1, 0.0, %v979_v33 }
 0x163   :  { %2584 = vmatmul.msk.f32.gmra.mxu1 %vm82_vm0, %v3082_v39  ;;  %v915_v39 = vsel %vm882_vm1, 0.0, %v899_v32  ;;  %v1091_v32 = vrot.slane %v3171_v59, 7  ;;  %v3653_v59 = vld [vmem:[%s5093_s2] ss:$0 sm:$0xff] }
 0x164   :  { %v923_v51 = vadd.f32 %v915_v39, %v883_v48  ;;  %v3643_v31 = vpop.f32.mrf.mxu3 }
 0x166   :  { %v3637_v8 = vpop.f32.mrf.mxu2 }
 0x167   :  { %v3617_v35 = vpop.f32.mrf.mxu0 }
 0x168   :  { %5135 = vst [vmem:[#allocation38_spill] sm:$0xff] %v3617_v35  ;;  %v3622_v34 = vpop.f32.mrf.mxu1  ;;  %v1003_v35 = vadd.f32 %v995_v4, %v963_v29 }
 0x169   :  { %5136 = vst [vmem:[#allocation39_spill] sm:$0xff] %v3622_v34 }
 0x16a   :  { %2553 = vmatmul.msk.f32.gmra.mxu0 %vm82_vm0, %v3095_v40 }
 0x16b   :  { %2585 = vmatmul.msk.f32.gmra.mxu1 %vm82_vm0, %v3095_v40  ;;  %v1051_v40 = vsel %vm882_vm1, 0.0, %v1035_v36 }
 0x16c   :  { %v1059_v56 = vadd.f32 %v1051_v40, %v3141_v50 }
 0x16f   :  { %v648_v34 = vpop.f32.mrf.mxu0 }
 0x170   :  { %v931_v53 = vadd.f32 %v923_v51, %v648_v34  ;;  %v761_v30 = vpop.f32.mrf.mxu1  ;;  %v1107_v34 = vsel %vm882_vm1, 0.0, %v1091_v32 }
 0x171   :  { %v1011_v18 = vadd.f32 %v1003_v35, %v761_v30  ;;  %v1115_v33 = vadd.f32 %v1107_v34, %v3225_v12  ;;  %v980_v34 = vrot.slane %v3460_v22, 7 }
 0x172   :  { %2554 = vmatmul.msk.f32.gmra.mxu0 %vm82_vm0, %v3108_v42 }
 0x173   :  { %v1019_v10 = vmax.f32 %v931_v53, %v1011_v18  ;;  %2586 = vmatmul.msk.f32.gmra.mxu1 %vm82_vm0, %v3108_v42  ;;  %v3659_v42 = vpop.f32.mrf.mxu2  ;;  %v3661_v18 = vpop.f32.mrf.mxu3 }
 0x177   :  { %v651_v30 = vpop.f32.mrf.mxu0 }
 0x178   :  { %v1067_v35 = vadd.f32 %v1059_v56, %v651_v30  ;;  %v764_v39 = vpop.f32.mrf.mxu1 }
 0x179   :  { %v1123_v48 = vadd.f32 %v1115_v33, %v764_v39 }
 0x17a   :  { %v1075_v4 = vmax.f32 %v1019_v10, %v1067_v35  ;;  %2555 = vmatmul.msk.f32.gmra.mxu0 %vm82_vm0, %v3127_v47  ;;  %v867_v35 = vrot.slane %v3229_v14, 7 }
 0x17b   :  { %2587 = vmatmul.msk.f32.gmra.mxu1 %vm82_vm0, %v3127_v47  ;;  %v3683_v10 = vpop.f32.mrf.mxu2 }
 0x17c   :  { %v1131_v50 = vmax.f32 %v1075_v4, %v1123_v48 }
 0x17e   :  { %v1142_v12 = vadd.f32 %v3653_v59, %v1131_v50 }
 0x17f   :  { %v654_v29 = vpop.f32.mrf.mxu0 }
 0x180   :  { %v3669_v36 = vmax.f32 %v1142_v12, 0.0  ;;  %v1174_v53 = vadd.f32 %v3169_v58, %v654_v29  ;;  %v767_v40 = vpop.f32.mrf.mxu1  ;;  %v900_v58 = vrot.slane %v3414_v54, 7 }
 0x181   :  { %v1190_v47 = vadd.f32 %v3247_v21, %v767_v40  ;;  %v3686_v21 = vpop.f32.mrf.mxu3 }
 0x182   :  { %2556 = vmatmul.msk.f32.gmra.mxu0 %vm82_vm0, %v3148_v52  ;;  %2603 = vmatmul.msk.f32.vlgmr.msra.gmra.mxu2 %vm3665_vm2, %v3669_v36  ;;  %v916_v54 = vsel %vm882_vm1, 0.0, %v900_v58  ;;  %v1092_v58 = vrot.slane %v3258_v37, 7 }
 0x183   :  { %v1198_v32 = vmax.f32 %v1174_v53, %v1190_v47  ;;  %2588 = vmatmul.msk.f32.gmra.mxu1 %vm82_vm0, %v3148_v52  ;;  %2627 = vmatmul.msk.f32.vlgmr.msrb.gmra.mxu3 %vm3665_vm2, %v3669_v36  ;;  %v948_v52 = vrot.slane %v3236_v16, 7  ;;  %v884_v16 = vsel %vm882_vm1, 0.0, %v867_v35  ;;  %v3708_v29 = vpop.f32.mrf.mxu2 }
 0x184   :  { %v924_v48 = vadd.f32 %v916_v54, %v884_v16 }
 0x185   :  { %v964_v22 = vsel %vm882_vm1, 0.0, %v948_v52 }
 0x187   :  { %v657_v56 = vpop.f32.mrf.mxu0 }
 0x188   :  { %v1214_v30 = vadd.f32 %v3188_v0, %v657_v56  ;;  %v770_v33 = vpop.f32.mrf.mxu1  ;;  %v996_v0 = vsel %vm882_vm1, 0.0, %v980_v34  ;;  %v1108_v34 = vsel %vm882_vm1, 0.0, %v1092_v58  ;;  %v901_v58 = vrot.slane %v3659_v42, 7 }
 0x189   :  { %v3695_v4 = vadd.f32 %v3269_v43, %v770_v33  ;;  %v1036_v43 = vrot.slane %v3249_v23, 7  ;;  %v1004_v12 = vadd.f32 %v996_v0, %v964_v22  ;;  %v3710_v47 = vpop.f32.mrf.mxu3  ;;  %v1116_v33 = vadd.f32 %v1108_v34, %v3309_v19 }
 0x18a   :  { %v3692_v39 = vmax.f32 %v1198_v32, %v1214_v30  ;;  %2557 = vmatmul.msk.f32.gmra.mxu0 %vm82_vm0, %v3167_v57  ;;  %v949_v34 = vrot.slane %v3318_v41, 7 }
 0x18b   :  { %2589 = vmatmul.msk.f32.gmra.mxu1 %vm82_vm0, %v3167_v57  ;;  %v1052_v32 = vsel %vm882_vm1, 0.0, %v1036_v43  ;;  %v3721_v54 = vpop.f32.mrf.mxu2 }
 0x18c   :  { %v1246_v14 = vmax.f32 %v3692_v39, %v3695_v4  ;;  %v1060_v23 = vadd.f32 %v1052_v32, %v3227_v13  ;;  %v965_v41 = vsel %vm882_vm1, 0.0, %v949_v34  ;;  %v1316_v39 = vld [vmem:[%s5094_s3 + $0x128] sm:$0xff] }
 0x18d   :  { %v1332_v4 = vld [vmem:[%s5094_s3 + $0x1a8] sm:$0xff] }
 0x18f   :  { %v660_v50 = vpop.f32.mrf.mxu0 }
 0x190   :  { %v932_v53 = vadd.f32 %v924_v48, %v660_v50  ;;  %v773_v40 = vpop.f32.mrf.mxu1 }
 0x191   :  { %v1012_v57 = vadd.f32 %v1004_v12, %v773_v40  ;;  %v3725_v37 = vpop.f32.mrf.mxu3 }
 0x192   :  { %2558 = vmatmul.msk.f32.gmra.mxu0 %vm82_vm0, %v3186_v63 }
 0x193   :  { %v1020_v56 = vmax.f32 %v932_v53, %v1012_v57  ;;  %2590 = vmatmul.msk.f32.gmra.mxu1 %vm82_vm0, %v3186_v63 }
 0x197   :  { %v663_v30 = vpop.f32.mrf.mxu0 }
 0x198   :  { %v1068_v35 = vadd.f32 %v1060_v23, %v663_v30  ;;  %v776_v52 = vpop.f32.mrf.mxu1 }
 0x199   :  { %v1124_v16 = vadd.f32 %v1116_v33, %v776_v52  ;;  %v917_v33 = vsel %vm882_vm1, 0.0, %v901_v58  ;;  %v1356_v58 = vld [vmem:[%s5094_s3 + $0x268] sm:$0xff] }
 0x19a   :  { %v1076_v0 = vmax.f32 %v1020_v56, %v1068_v35  ;;  %2559 = vmatmul.msk.f32.gmra.mxu0 %vm82_vm0, %v3210_v6  ;;  %v981_v56 = vrot.slane %v3661_v18, 7 }
 0x19b   :  { %2591 = vmatmul.msk.f32.gmra.mxu1 %vm82_vm0, %v3210_v6  ;;  %v1358_v6 = vld [vmem:[%s5094_s3 + $0x278] sm:$0xff] }
 0x19c   :  { %v1132_v63 = vmax.f32 %v1076_v0, %v1124_v16  ;;  %1635 = vmatpush.msra.mxu0 %v1358_v6  ;;  %v997_v42 = vsel %vm882_vm1, 0.0, %v981_v56  ;;  %v1372_v56 = vld [vmem:[%s5094_s3 + $0x2e8] sm:$0xff] }
 0x19d   :  { %v1005_v16 = vadd.f32 %v997_v42, %v965_v41  ;;  %v1354_v42 = vld [vmem:[%s5094_s3 + $0x258] sm:$0xff]  ;;  %v1184_v41 = vadd.f32 %v3625_v17, %v3280_v62  ;;  %v1351_v62 = vld [vmem:[%s5094_s3 + $0x240] sm:$0xff] }
 0x19e   :  { %v1143_v13 = vadd.f32 %v3653_v59, %v1132_v63  ;;  %v1093_v63 = vrot.slane %v3338_v60, 7 }
 0x19f   :  { %v666_v22 = vpop.f32.mrf.mxu0 }
 0x1a0   :  { %v3730_v48 = vmax.f32 %v1143_v13, 0.0  ;;  %v1175_v19 = vadd.f32 %v3256_v28, %v666_v22  ;;  %v779_v43 = vpop.f32.mrf.mxu1  ;;  %v3749_v28 = vpop.f32.mrf.mxu3  ;;  %v1357_v13 = vld [vmem:[%s5094_s3 + $0x270] sm:$0xff] }
 0x1a1   :  { %v1191_v50 = vadd.f32 %v3329_v44, %v779_v43  ;;  %v3747_v44 = vpop.f32.mrf.mxu2  ;;  %v1373_v22 = vld [vmem:[%s5094_s3 + $0x2f0] sm:$0xff]  ;;  %1636 = vmatpush.msra.mxu0 %v1357_v13  ;;  %v1368_v13 = vld [vmem:[%s5094_s3 + $0x2c8] sm:$0xff] }
 0x1a2   :  { %2560 = vmatmul.msk.f32.gmra.mxu0 %vm82_vm0, %v3234_v15  ;;  %2605 = vmatmul.msk.f32.gmra.mxu2 %vm3665_vm2, %v3730_v48 }
 0x1a3   :  { %v1199_v12 = vmax.f32 %v1175_v19, %v1191_v50  ;;  %2592 = vmatmul.msk.f32.gmra.mxu1 %vm82_vm0, %v3234_v15  ;;  %2629 = vmatmul.msk.f32.gmra.mxu3 %vm3665_vm2, %v3730_v48 }
 0x1a4   :  { %1637 = vmatpush.msra.mxu0 %v1356_v58 }
 0x1a7   :  { %v669_v53 = vpop.f32.mrf.mxu0 }
 0x1a8   :  { %v1215_v40 = vadd.f32 %v3278_v61, %v669_v53  ;;  %v782_v57 = vpop.f32.mrf.mxu1  ;;  %v868_v61 = vrot.slane %v3311_v20, 7  ;;  %v3772_v35 = vpop.f32.mrf.mxu3 }
 0x1a9   :  { %v3755_v15 = vadd.f32 %v3349_v1, %v782_v57  ;;  %v3767_v30 = vpop.f32.mrf.mxu2  ;;  %v1037_v1 = vrot.slane %v3331_v3, 7 }
 0x1aa   :  { %v3752_v32 = vmax.f32 %v1199_v12, %v1215_v40  ;;  %2561 = vmatmul.msk.f32.gmra.mxu0 %vm82_vm0, %v3254_v27  ;;  %v885_v20 = vsel %vm882_vm1, 0.0, %v868_v61  ;;  %v1109_v12 = vsel %vm882_vm1, 0.0, %v1093_v63 }
 0x1ab   :  { %2593 = vmatmul.msk.f32.gmra.mxu1 %vm82_vm0, %v3254_v27  ;;  %v1374_v27 = vld [vmem:[%s5094_s3 + $0x2f8] sm:$0xff]  ;;  %v925_v0 = vadd.f32 %v917_v33, %v885_v20  ;;  %v1053_v3 = vsel %vm882_vm1, 0.0, %v1037_v1  ;;  %v1117_v6 = vadd.f32 %v1109_v12, %v3594_v26  ;;  %v1355_v26 = vld [vmem:[%s5094_s3 + $0x260] sm:$0xff]  ;;  %v1369_v20 = vld [vmem:[%s5094_s3 + $0x2d0] sm:$0xff] }
 0x1ac   :  { %v1247_v23 = vmax.f32 %v3752_v32, %v3755_v15  ;;  %1700 = vmatpush.msra.mxu1 %v1374_v27  ;;  %v1061_v50 = vadd.f32 %v1053_v3, %v3586_v25  ;;  %v1371_v1 = vld [vmem:[%s5094_s3 + $0x2e0] sm:$0xff]  ;;  %1638 = vmatpush.msra.mxu0 %v1355_v26  ;;  %v1366_v12 = vld [vmem:[%s5094_s3 + $0x2b8] sm:$0xff] }
 0x1ad   :  { %v1315_v32 = vld [vmem:[%s5094_s3 + $0x120] sm:$0xff] }
 0x1ae   :  { %1701 = vmatpush.msra.mxu1 %v1373_v22  ;;  %1639 = vmatpush.msra.mxu0 %v1354_v42  ;;  %v982_v42 = vrot.slane %v3749_v28, 7  ;;  %v869_v28 = vrot.slane %v3380_v2, 7  ;;  %v1331_v15 = vld [vmem:[%s5094_s3 + $0x1a0] sm:$0xff] }
 0x1af   :  { %v672_v18 = vpop.f32.mrf.mxu0 }
 0x1b0   :  { %v785_v52 = vpop.f32.mrf.mxu1  ;;  %v933_v19 = vadd.f32 %v925_v0, %v672_v18  ;;  %v3802_v61 = vpop.f32.mrf.mxu3  ;;  %1702 = vmatpush.msra.mxu1 %v1372_v56  ;;  %v1370_v18 = vld [vmem:[%s5094_s3 + $0x2d8] sm:$0xff]  ;;  %v998_v2 = vsel %vm882_vm1, 0.0, %v982_v42 }
 0x1b1   :  { %v1013_v43 = vadd.f32 %v1005_v16, %v785_v52  ;;  %v1168_v52 = vadd.f32 %v3620_v9, %v3271_v46  ;;  %v1352_v9 = vld [vmem:[%s5094_s3 + $0x248] sm:$0xff] }
 0x1b2   :  { %2562 = vmatmul.msk.f32.gmra.mxu0 %vm82_vm0, %v3276_v55  ;;  %1703 = vmatpush.msra.mxu1 %v1371_v1 }
 0x1b3   :  { %2594 = vmatmul.msk.f32.gmra.mxu1 %vm82_vm0, %v3276_v55  ;;  %v3794_v55 = vpop.f32.mrf.mxu2  ;;  %v1021_v53 = vmax.f32 %v933_v19, %v1013_v43  ;;  %v1367_v43 = vld [vmem:[%s5094_s3 + $0x2c0] sm:$0xff] }
 0x1b4   :  { %1704 = vmatpush.msra.mxu1 %v1370_v18  ;;  %v1363_v18 = vld [vmem:[%s5094_s3 + $0x2a0] sm:$0xff] }
 0x1b6   :  { %1705 = vmatpush.msra.mxu1 %v1369_v20  ;;  %v1362_v20 = vld [vmem:[%s5094_s3 + $0x298] sm:$0xff] }
 0x1b7   :  { %v675_v60 = vpop.f32.mrf.mxu0 }
 0x1b8   :  { %v1069_v40 = vadd.f32 %v1061_v50, %v675_v60  ;;  %v788_v57 = vpop.f32.mrf.mxu1  ;;  %v3849_v17 = vpop.f32.mrf.mxu3  ;;  %v1350_v50 = vld [vmem:[%s5094_s3 + $0x238] sm:$0xff]  ;;  %1706 = vmatpush.msra.mxu1 %v1368_v13  ;;  %v5139_v60 = vld [vmem:[#allocation8_spill] sm:$0xff]  ;;  %v1344_v13 = vld [vmem:[%s5094_s3 + $0x208] sm:$0xff] }
 0x1b9   :  { %v1125_v34 = vadd.f32 %v1117_v6, %v788_v57  ;;  %v1208_v6 = vadd.f32 %v3637_v8, %v5139_v60  ;;  %v5140_v57 = vld [vmem:[#allocation9_spill] sm:$0xff]  ;;  %v1364_v8 = vld [vmem:[%s5094_s3 + $0x2a8] sm:$0xff] }
 0x1ba   :  { %v1077_v25 = vmax.f32 %v1021_v53, %v1069_v40  ;;  %2563 = vmatmul.msk.f32.gmra.mxu0 %vm82_vm0, %v3297_v5  ;;  %1707 = vmatpush.msra.mxu1 %v1367_v43  ;;  %v1365_v40 = vld [vmem:[%s5094_s3 + $0x2b0] sm:$0xff]  ;;  %v1232_v58 = vadd.f32 %v3643_v31, %v5140_v57  ;;  %v1347_v31 = vld [vmem:[%s5094_s3 + $0x220] sm:$0xff]  ;;  %v1360_v43 = vld [vmem:[%s5094_s3 + $0x288] sm:$0xff] }
 0x1bb   :  { %2595 = vmatmul.msk.f32.gmra.mxu1 %vm82_vm0, %v3297_v5  ;;  %v1353_v5 = vld [vmem:[%s5094_s3 + $0x250] sm:$0xff]  ;;  %v3839_v22 = vpop.f32.mrf.mxu2 }
 0x1bc   :  { %v1133_v33 = vmax.f32 %v1077_v25, %v1125_v34  ;;  %1640 = vmatpush.msra.mxu0 %v1353_v5  ;;  %1708 = vmatpush.msra.mxu1 %v1366_v12  ;;  %v1348_v34 = vld [vmem:[%s5094_s3 + $0x228] sm:$0xff]  ;;  %v950_v5 = vrot.slane %v3382_v45, 7  ;;  %v1361_v45 = vld [vmem:[%s5094_s3 + $0x290] sm:$0xff] }
 0x1be   :  { %v1144_v27 = vadd.f32 %v3653_v59, %v1133_v33  ;;  %1641 = vmatpush.msra.mxu0 %v1352_v9  ;;  %1709 = vmatpush.msra.mxu1 %v1365_v40  ;;  %v902_v33 = vrot.slane %v3747_v44, 7  ;;  %v1346_v44 = vld [vmem:[%s5094_s3 + $0x218] sm:$0xff]  ;;  %v1359_v40 = vld [vmem:[%s5094_s3 + $0x280] sm:$0xff] }
 0x1bf   :  { %v678_v0 = vpop.f32.mrf.mxu0 }
 0x1c0   :  { %v3831_v16 = vmax.f32 %v1144_v27, 0.0  ;;  %v1176_v3 = vadd.f32 %v1168_v52, %v678_v0  ;;  %v791_v46 = vpop.f32.mrf.mxu1  ;;  %1642 = vmatpush.msra.mxu0 %v1351_v62  ;;  %1710 = vmatpush.msra.mxu1 %v1364_v8  ;;  %v5141_v0 = vld [vmem:[#allocation14_spill] sm:$0xff]  ;;  %v886_v62 = vsel %vm882_vm1, 0.0, %v869_v28 }
 0x1c1   :  { %v1192_v63 = vadd.f32 %v1184_v41, %v791_v46  ;;  %v1345_v41 = vld [vmem:[%s5094_s3 + $0x210] sm:$0xff]  ;;  %v918_v46 = vsel %vm882_vm1, 0.0, %v902_v33 }
 0x1c2   :  { %2564 = vmatmul.msk.f32.gmra.mxu0 %vm82_vm0, %v3316_v38  ;;  %2607 = vmatmul.msk.f32.gmra.mxu2 %vm3665_vm2, %v3831_v16 }
 0x1c3   :  { %v1200_v19 = vmax.f32 %v1176_v3, %v1192_v63  ;;  %2596 = vmatmul.msk.f32.gmra.mxu1 %vm82_vm0, %v3316_v38  ;;  %2631 = vmatmul.msk.f32.gmra.mxu3 %vm3665_vm2, %v3831_v16  ;;  %v1349_v38 = vld [vmem:[%s5094_s3 + $0x230] sm:$0xff]  ;;  %v3897_v52 = vpop.f32.mrf.mxu2  ;;  %v1038_v3 = vrot.slane %v5141_v0, 7 }
 0x1c4   :  { %1643 = vmatpush.msra.mxu0 %v1350_v50  ;;  %1711 = vmatpush.msra.mxu1 %v1363_v18  ;;  %v926_v50 = vadd.f32 %v918_v46, %v886_v62 }
 0x1c5   :  { %v1054_v60 = vsel %vm882_vm1, 0.0, %v1038_v3 }
 0x1c6   :  { %1644 = vmatpush.msra.mxu0 %v1349_v38  ;;  %1712 = vmatpush.msra.mxu1 %v1362_v20  ;;  %v1343_v38 = vld [vmem:[%s5094_s3 + $0x200] sm:$0xff] }
 0x1c7   :  { %v681_v53 = vpop.f32.mrf.mxu0  ;;  %v5143_v20 = vld [vmem:[#allocation10_spill] sm:$0xff] }
 0x1c8   :  { %v1216_v56 = vadd.f32 %v1208_v6, %v681_v53  ;;  %v794_v25 = vpop.f32.mrf.mxu1  ;;  %1645 = vmatpush.msra.mxu0 %v1348_v34  ;;  %1713 = vmatpush.msra.mxu1 %v1361_v45  ;;  %v5142_v6 = vld [vmem:[#allocation15_spill] sm:$0xff] }
 0x1c9   :  { %v3883_v1 = vadd.f32 %v1232_v58, %v794_v25  ;;  %v1094_v53 = vrot.slane %v5142_v6, 7  ;;  %v1062_v25 = vadd.f32 %v1054_v60, %v3683_v10 }
 0x1ca   :  { %v3881_v26 = vmax.f32 %v1200_v19, %v1216_v56  ;;  %2565 = vmatmul.msk.f32.gmra.mxu0 %vm82_vm0, %v3336_v49  ;;  %v966_v19 = vsel %vm882_vm1, 0.0, %v950_v5  ;;  %1714 = vmatpush.msra.mxu1 %v1360_v43  ;;  %v2772_v5 = vld [vmem:[%s5092_s0 + $0xe8] sm:$0xff] }
 0x1cb   :  { %2597 = vmatmul.msk.f32.gmra.mxu1 %vm82_vm0, %v3336_v49  ;;  %v3906_v49 = vpop.f32.mrf.mxu3  ;;  %1646 = vmatpush.msra.mxu0 %v1347_v31  ;;  %v1006_v12 = vadd.f32 %v998_v2, %v966_v19  ;;  %v3940_v56 = vpop.f32.mrf.mxu2  ;;  %v1110_v34 = vsel %vm882_vm1, 0.0, %v1094_v53  ;;  %v2773_v19 = vld [vmem:[%s5092_s0 + $0xf0] sm:$0xff] }
 0x1cc   :  { %v1248_v27 = vmax.f32 %v3881_v26, %v3883_v1  ;;  %1715 = vmatpush.msra.mxu1 %v1359_v40  ;;  %v1314_v26 = vld [vmem:[%s5094_s3 + $0x118] sm:$0xff] }
 0x1cd   :  { %1647 = vmatpush.msra.mxu0 %v1346_v44  ;;  %v1330_v1 = vld [vmem:[%s5094_s3 + $0x198] sm:$0xff] }
 0x1cf   :  { %v684_v9 = vpop.f32.mrf.mxu0  ;;  %1648 = vmatpush.msra.mxu0 %v1345_v41  ;;  %v1169_v41 = vadd.f32 %v3708_v29, %v5143_v20 }
 0x1d0   :  { %v797_v63 = vpop.f32.mrf.mxu1  ;;  %v934_v57 = vadd.f32 %v926_v50, %v684_v9 }
 0x1d1   :  { %1649 = vmatpush.msra.mxu0 %v1344_v13  ;;  %v1014_v58 = vadd.f32 %v1006_v12, %v797_v63  ;;  %v5146_v12 = vld [vmem:[#allocation13_spill] sm:$0xff] }
 0x1d2   :  { %2566 = vmatmul.msk.f32.gmra.mxu0 %vm82_vm0, %v3356_v11 }
 0x1d3   :  { %2598 = vmatmul.msk.f32.gmra.mxu1 %vm82_vm0, %v3356_v11  ;;  %1650 = vmatpush.msra.mxu0 %v1343_v38  ;;  %v3944_v8 = vpop.f32.mrf.mxu3  ;;  %v1118_v11 = vadd.f32 %v1110_v34, %v3686_v21  ;;  %v1022_v33 = vmax.f32 %v934_v57, %v1014_v58  ;;  %v5144_v21 = vld [vmem:[#allocation11_spill] sm:$0xff]  ;;  %v3957_v2 = vpop.f32.mrf.mxu2  ;;  %v1233_v38 = vadd.f32 %v3725_v37, %v5146_v12  ;;  %v2774_v58 = vld [vmem:[%s5092_s0 + $0xf8] sm:$0xff] }
 0x1d4   :  { %v1185_v3 = vadd.f32 %v3710_v47, %v5144_v21  ;;  %v5145_v47 = vld [vmem:[#allocation12_spill] sm:$0xff] }
 0x1d5   :  { %v1209_v43 = vadd.f32 %v3721_v54, %v5145_v47  ;;  %v903_v54 = vrot.slane %v3897_v52, 7 }
 0x1d7   :  { %v687_v31 = vpop.f32.mrf.mxu0 }
 0x1d8   :  { %v1070_v42 = vadd.f32 %v1062_v25, %v687_v31  ;;  %v800_v18 = vpop.f32.mrf.mxu1  ;;  %v983_v25 = vrot.slane %v3906_v49, 7  ;;  %v870_v31 = vrot.slane %v3428_v7, 7 }
 0x1d9   :  { %v1126_v28 = vadd.f32 %v1118_v11, %v800_v18  ;;  %v951_v11 = vrot.slane %v3430_v24, 7  ;;  %v919_v18 = vsel %vm882_vm1, 0.0, %v903_v54  ;;  %v5148_v24 = vld [vmem:[#allocation21_spill] sm:$0xff] }
 0x1da   :  { %v1078_v44 = vmax.f32 %v1022_v33, %v1070_v42  ;;  %2567 = vmatmul.msk.f32.gmra.mxu0 %vm82_vm0, %v2772_v5  ;;  %v5147_v33 = vld [vmem:[#allocation20_spill] sm:$0xff]  ;;  %v887_v49 = vsel %vm882_vm1, 0.0, %v870_v31 }
 0x1db   :  { %2599 = vmatmul.msk.f32.gmra.mxu1 %vm82_vm0, %v2772_v5  ;;  %v3961_v13 = vpop.f32.mrf.mxu3  ;;  %v3978_v53 = vpop.f32.mrf.mxu2  ;;  %v1039_v42 = vrot.slane %v5147_v33, 7  ;;  %v967_v5 = vsel %vm882_vm1, 0.0, %v951_v11 }
 0x1dc   :  { %v1134_v10 = vmax.f32 %v1078_v44, %v1126_v28  ;;  %v999_v44 = vsel %vm882_vm1, 0.0, %v983_v25 }
 0x1dd   :  { %v1007_v20 = vadd.f32 %v999_v44, %v967_v5  ;;  %v1055_v7 = vsel %vm882_vm1, 0.0, %v1039_v42 }
 0x1de   :  { %v1145_v0 = vadd.f32 %v3653_v59, %v1134_v10  ;;  %v927_v10 = vadd.f32 %v919_v18, %v887_v49 }
 0x1df   :  { %v690_v46 = vpop.f32.mrf.mxu0 }
 0x1e0   :  { %v3959_v9 = vmax.f32 %v1145_v0, 0.0  ;;  %v1177_v45 = vadd.f32 %v1169_v41, %v690_v46  ;;  %v803_v63 = vpop.f32.mrf.mxu1  ;;  %v1095_v41 = vrot.slane %v5148_v24, 7 }
 0x1e1   :  { %v1193_v62 = vadd.f32 %v1185_v3, %v803_v63 }
 0x1e2   :  { %2568 = vmatmul.msk.f32.gmra.mxu0 %vm82_vm0, %v2773_v19  ;;  %2609 = vmatmul.msk.f32.gmra.mxu2 %vm3665_vm2, %v3959_v9  ;;  %v1111_v63 = vsel %vm882_vm1, 0.0, %v1095_v41 }
 0x1e3   :  { %v1201_v29 = vmax.f32 %v1177_v45, %v1193_v62  ;;  %2600 = vmatmul.msk.f32.gmra.mxu1 %vm82_vm0, %v2773_v19  ;;  %2633 = vmatmul.msk.f32.gmra.mxu3 %vm3665_vm2, %v3959_v9  ;;  %v3990_v34 = vpop.f32.mrf.mxu3  ;;  %v491_v0 = vpop.f32.mrf.mxu2  ;;  %v1063_v45 = vadd.f32 %v1055_v7, %v3767_v30  ;;  %v1119_v19 = vadd.f32 %v1111_v63, %v3772_v35  ;;  %v5149_v30 = vld [vmem:[#allocation16_spill] sm:$0xff]  ;;  %v5154_v63 = vld [vmem:[#allocation27_spill] sm:$0xff] }
 0x1e7   :  { %v693_v50 = vpop.f32.mrf.mxu0 }
 0x1e8   :  { %v1217_v60 = vadd.f32 %v1209_v43, %v693_v50  ;;  %v806_v6 = vpop.f32.mrf.mxu1 }
 0x1e9   :  { %v3982_v57 = vadd.f32 %v1233_v38, %v806_v6 }
 0x1ea   :  { %v3980_v40 = vmax.f32 %v1201_v29, %v1217_v60  ;;  %2569 = vmatmul.msk.f32.gmra.mxu0 %vm82_vm0, %v2774_v58  ;;  %v1170_v60 = vadd.f32 %v3794_v55, %v5149_v30 }
 0x1eb   :  { %2601 = vmatmul.msk.f32.gmra.mxu1 %vm82_vm0, %v2774_v58  ;;  %v604_v46 = vpop.f32.mrf.mxu3  ;;  %v4021_v6 = vpop.f32.mrf.mxu2  ;;  %v5150_v58 = vld [vmem:[#allocation17_spill] sm:$0xff] }
 0x1ec   :  { %v1249_v37 = vmax.f32 %v3980_v40, %v3982_v57  ;;  %v1186_v54 = vadd.f32 %v3802_v61, %v5150_v58  ;;  %v5151_v61 = vld [vmem:[#allocation18_spill] sm:$0xff]  ;;  %v5156_v58 = vld [vmem:[#allocation29_spill] sm:$0xff]  ;;  %v1313_v57 = vld [vmem:[%s5094_s3 + $0x110] sm:$0xff] }
 0x1ed   :  { %v1210_v44 = vadd.f32 %v3839_v22, %v5151_v61 }
 0x1ef   :  { %v696_v52 = vpop.f32.mrf.mxu0 }
 0x1f0   :  { %v809_v28 = vpop.f32.mrf.mxu1  ;;  %v935_v21 = vadd.f32 %v927_v10, %v696_v52 }
 0x1f1   :  { %v1015_v3 = vadd.f32 %v1007_v20, %v809_v28  ;;  %v5152_v28 = vld [vmem:[#allocation19_spill] sm:$0xff] }
 0x1f2   :  { %2699 = vmatmul.msk.f32.vlgmr.msra.gmra.mxu0 %vm3665_vm2, %v3669_v36  ;;  %v1234_v49 = vadd.f32 %v3849_v17, %v5152_v28  ;;  %v5153_v17 = vld [vmem:[#allocation26_spill] sm:$0xff] }
 0x1f3   :  { %2723 = vmatmul.msk.f32.vlgmr.msra.gmra.mxu1 %vm3665_vm2, %v3669_v36  ;;  %v1023_v29 = vmax.f32 %v935_v21, %v1015_v3  ;;  %v4026_v25 = vpop.f32.mrf.mxu3  ;;  %v4046_v5 = vpop.f32.mrf.mxu2  ;;  %v904_v21 = vrot.slane %v491_v0, 7  ;;  %v984_v3 = vrot.slane %v604_v46, 7 }
 0x1f5   :  { %v920_v0 = vsel %vm882_vm1, 0.0, %v904_v21  ;;  %v1000_v46 = vsel %vm882_vm1, 0.0, %v984_v3 }
 0x1f7   :  { %v699_v62 = vpop.f32.mrf.mxu0 }
 0x1f8   :  { %v1071_v47 = vadd.f32 %v1063_v45, %v699_v62  ;;  %v812_v43 = vpop.f32.mrf.mxu1  ;;  %v871_v45 = vrot.slane %v5153_v17, 7  ;;  %v952_v62 = vrot.slane %v5154_v63, 7 }
 0x1f9   :  { %v1127_v12 = vadd.f32 %v1119_v19, %v812_v43  ;;  %v5155_v19 = vld [vmem:[#allocation28_spill] sm:$0xff] }
 0x1fa   :  { %v1079_v50 = vmax.f32 %v1023_v29, %v1071_v47  ;;  %2701 = vmatmul.msk.f32.gmra.mxu0 %vm3665_vm2, %v3730_v48  ;;  %v1040_v29 = vrot.slane %v5155_v19, 7  ;;  %v5158_v19 = vld [vmem:[#allocation23_spill] sm:$0xff] }
 0x1fb   :  { %2725 = vmatmul.msk.f32.gmra.mxu1 %vm3665_vm2, %v3730_v48  ;;  %v4048_v7 = vpop.f32.mrf.mxu3 }
 0x1fc   :  { %v1135_v38 = vmax.f32 %v1079_v50, %v1127_v12  ;;  %v888_v50 = vsel %vm882_vm1, 0.0, %v871_v45  ;;  %v968_v12 = vsel %vm882_vm1, 0.0, %v952_v62  ;;  %v5157_v45 = vld [vmem:[#allocation22_spill] sm:$0xff] }
 0x1fd   :  { %v928_v30 = vadd.f32 %v920_v0, %v888_v50  ;;  %v1171_v63 = vadd.f32 %v3957_v2, %v5157_v45  ;;  %v5163_v45 = vld [vmem:[#allocation36_spill] sm:$0xff] }
 0x1fe   :  { %v1146_v35 = vadd.f32 %v3653_v59, %v1135_v38  ;;  %v4069_v38 = vpop.f32.mrf.mxu2 }
 0x1ff   :  { %v702_v31 = vpop.f32.mrf.mxu0 }
 0x200   :  { %v4028_v11 = vmax.f32 %v1146_v35, 0.0  ;;  %v1178_v33 = vadd.f32 %v1170_v60, %v702_v31  ;;  %v815_v42 = vpop.f32.mrf.mxu1  ;;  %v1008_v60 = vadd.f32 %v1000_v46, %v968_v12  ;;  %v1056_v35 = vsel %vm882_vm1, 0.0, %v1040_v29 }
 0x201   :  { %v1194_v18 = vadd.f32 %v1186_v54, %v815_v42  ;;  %v1096_v54 = vrot.slane %v5156_v58, 7 }
 0x202   :  { %2611 = vmatmul.msk.f32.gmra.mxu2 %vm3665_vm2, %v4028_v11  ;;  %2635 = vmatmul.msk.f32.gmra.mxu3 %vm3665_vm2, %v4028_v11 }
 0x203   :  { %v1202_v55 = vmax.f32 %v1178_v33, %v1194_v18  ;;  %2703 = vmatmul.msk.f32.gmra.mxu0 %vm3665_vm2, %v3831_v16  ;;  %2727 = vmatmul.msk.f32.gmra.mxu1 %vm3665_vm2, %v3831_v16  ;;  %v4073_v31 = vpop.f32.mrf.mxu3  ;;  %v1064_v18 = vadd.f32 %v1056_v35, %v3940_v56  ;;  %v1187_v56 = vadd.f32 %v3961_v13, %v5158_v19  ;;  %v5159_v13 = vld [vmem:[#allocation24_spill] sm:$0xff] }
 0x204   :  { %v1211_v12 = vadd.f32 %v3978_v53, %v5159_v13  ;;  %v1341_v35 = vld [vmem:[%s5094_s3 + $0x1f0] sm:$0xff] }
 0x206   :  { %v503_v21 = vpop.f32.mrf.mxu2 }
 0x207   :  { %v705_v52 = vpop.f32.mrf.mxu0 }
 0x208   :  { %v1218_v10 = vadd.f32 %v1210_v44, %v705_v52  ;;  %v818_v20 = vpop.f32.mrf.mxu1 }
 0x209   :  { %v4052_v41 = vadd.f32 %v1234_v49, %v818_v20 }
 0x20a   :  { %v4050_v24 = vmax.f32 %v1202_v55, %v1218_v10  ;;  %v1112_v55 = vsel %vm882_vm1, 0.0, %v1096_v54 }
 0x20b   :  { %2705 = vmatmul.msk.f32.gmra.mxu0 %vm3665_vm2, %v3959_v9  ;;  %2729 = vmatmul.msk.f32.gmra.mxu1 %vm3665_vm2, %v3959_v9  ;;  %v1120_v44 = vadd.f32 %v1112_v55, %v3944_v8  ;;  %v616_v17 = vpop.f32.mrf.mxu3 }
 0x20c   :  { %v1250_v22 = vmax.f32 %v4050_v24, %v4052_v41  ;;  %v1328_v24 = vld [vmem:[%s5094_s3 + $0x188] sm:$0xff] }
 0x20f   :  { %v708_v47 = vpop.f32.mrf.mxu0 }
 0x210   :  { %v821_v43 = vpop.f32.mrf.mxu1  ;;  %v936_v33 = vadd.f32 %v928_v30, %v708_v47  ;;  %v1326_v47 = vld [vmem:[%s5094_s3 + $0x178] sm:$0xff]  ;;  %v4111_v30 = vpop.f32.mrf.mxu2 }
 0x211   :  { %v1016_v42 = vadd.f32 %v1008_v60, %v821_v43  ;;  %v1342_v43 = vld [vmem:[%s5094_s3 + $0x1f8] sm:$0xff]  ;;  %1505 = vmatpush.msrb.mxu2 %v1326_v47  ;;  %v1325_v60 = vld [vmem:[%s5094_s3 + $0x170] sm:$0xff] }
 0x212   :  { %1570 = vmatpush.msra.mxu3 %v1342_v43 }
 0x213   :  { %2707 = vmatmul.msk.f32.gmra.mxu0 %vm3665_vm2, %v4028_v11  ;;  %2731 = vmatmul.msk.f32.gmra.mxu1 %vm3665_vm2, %v4028_v11  ;;  %v1024_v52 = vmax.f32 %v936_v33, %v1016_v42  ;;  %v4119_v58 = vpop.f32.mrf.mxu3  ;;  %v5160_v33 = vld [vmem:[#allocation25_spill] sm:$0xff] }
 0x214   :  { %1506 = vmatpush.msrb.mxu2 %v1325_v60  ;;  %1571 = vmatpush.msra.mxu3 %v1341_v35  ;;  %v1235_v42 = vadd.f32 %v3990_v34, %v5160_v33  ;;  %v1323_v60 = vld [vmem:[%s5094_s3 + $0x160] sm:$0xff] }
 0x215   :  { %v1339_v35 = vld [vmem:[%s5094_s3 + $0x1e0] sm:$0xff] }
 0x217   :  { %v711_v61 = vpop.f32.mrf.mxu0 }
 0x218   :  { %v1072_v28 = vadd.f32 %v1064_v18, %v711_v61  ;;  %v824_v49 = vpop.f32.mrf.mxu1 }
 0x219   :  { %v1128_v20 = vadd.f32 %v1120_v44, %v824_v49  ;;  %v905_v44 = vrot.slane %v503_v21, 7  ;;  %v5161_v49 = vld [vmem:[#allocation34_spill] sm:$0xff]  ;;  %v1324_v21 = vld [vmem:[%s5094_s3 + $0x168] sm:$0xff] }
 0x21a   :  { %v1080_v10 = vmax.f32 %v1024_v52, %v1072_v28  ;;  %v985_v52 = vrot.slane %v616_v17, 7  ;;  %v1340_v17 = vld [vmem:[%s5094_s3 + $0x1e8] sm:$0xff]  ;;  %1507 = vmatpush.msrb.mxu2 %v1324_v21 }
 0x21b   :  { %v921_v34 = vsel %vm882_vm1, 0.0, %v905_v44  ;;  %1572 = vmatpush.msra.mxu3 %v1340_v17 }
 0x21c   :  { %v1136_v3 = vmax.f32 %v1080_v10, %v1128_v20  ;;  %v872_v10 = vrot.slane %v5161_v49, 7  ;;  %v5162_v20 = vld [vmem:[#allocation35_spill] sm:$0xff]  ;;  %v1001_v19 = vsel %vm882_vm1, 0.0, %v985_v52  ;;  %1508 = vmatpush.msrb.mxu2 %v1323_v60 }
 0x21d   :  { %1573 = vmatpush.msra.mxu3 %v1339_v35  ;;  %v1321_v35 = vld [vmem:[%s5094_s3 + $0x150] sm:$0xff] }
 0x21e   :  { %v1147_v62 = vadd.f32 %v3653_v59, %v1136_v3  ;;  %v953_v3 = vrot.slane %v5162_v20, 7 }
 0x21f   :  { %v714_v29 = vpop.f32.mrf.mxu0 }
 0x220   :  { %v4089_v0 = vmax.f32 %v1147_v62, 0.0  ;;  %v1179_v8 = vadd.f32 %v1171_v63, %v714_v29  ;;  %v827_v46 = vpop.f32.mrf.mxu1  ;;  %v1041_v63 = vrot.slane %v5163_v45, 7  ;;  %v969_v47 = vsel %vm882_vm1, 0.0, %v953_v3 }
 0x221   :  { %v1195_v50 = vadd.f32 %v1187_v56, %v827_v46  ;;  %v4134_v56 = vpop.f32.mrf.mxu2  ;;  %v889_v46 = vsel %vm882_vm1, 0.0, %v872_v10 }
 0x222   :  { %2613 = vmatmul.msk.f32.gmra.mxu2 %vm3665_vm2, %v4089_v0  ;;  %2637 = vmatmul.msk.f32.gmra.mxu3 %vm3665_vm2, %v4089_v0  ;;  %v929_v43 = vadd.f32 %v921_v34, %v889_v46  ;;  %v5165_v34 = vld [vmem:[#allocation30_spill] sm:$0xff] }
 0x223   :  { %v1203_v2 = vmax.f32 %v1179_v8, %v1195_v50  ;;  %2709 = vmatmul.msk.f32.gmra.mxu0 %vm3665_vm2, %v4089_v0  ;;  %2733 = vmatmul.msk.f32.gmra.mxu1 %vm3665_vm2, %v4089_v0  ;;  %v4142_v8 = vpop.f32.mrf.mxu3  ;;  %v1009_v50 = vadd.f32 %v1001_v19, %v969_v47  ;;  %v1172_v19 = vadd.f32 %v4046_v5, %v5165_v34 }
 0x227   :  { %v717_v54 = vpop.f32.mrf.mxu0 }
 0x228   :  { %v1219_v18 = vadd.f32 %v1211_v12, %v717_v54  ;;  %v830_v53 = vpop.f32.mrf.mxu1  ;;  %v1057_v12 = vsel %vm882_vm1, 0.0, %v1041_v63 }
 0x229   :  { %v4125_v61 = vadd.f32 %v1235_v42, %v830_v53  ;;  %v1065_v42 = vadd.f32 %v1057_v12, %v4021_v6  ;;  %v4157_v20 = vpop.f32.mrf.mxu2  ;;  %v5167_v12 = vld [vmem:[#allocation32_spill] sm:$0xff] }
 0x22a   :  { %v4123_v55 = vmax.f32 %v1203_v2, %v1219_v18  ;;  %v5164_v2 = vld [vmem:[#allocation37_spill] sm:$0xff]  ;;  %v1212_v60 = vadd.f32 %v4069_v38, %v5167_v12 }
 0x22b   :  { %v1097_v13 = vrot.slane %v5164_v2, 7  ;;  %v4159_v63 = vpop.f32.mrf.mxu3 }
 0x22c   :  { %v1251_v28 = vmax.f32 %v4123_v55, %v4125_v61  ;;  %v5176_v55 = vld [vmem:[#allocation5_spill] sm:$0xff] }
 0x22d   :  { %v1113_v18 = vsel %vm882_vm1, 0.0, %v1097_v13  ;;  %v1237_v61 = vadd.f32 %v4159_v63, %v5176_v55 }
 0x22e   :  { %v1121_v44 = vadd.f32 %v1113_v18, %v4026_v25 }
 0x22f   :  { %v720_v62 = vpop.f32.mrf.mxu0 }
 0x230   :  { %v833_v29 = vpop.f32.mrf.mxu1  ;;  %v937_v54 = vadd.f32 %v929_v43, %v720_v62  ;;  %v1322_v43 = vld [vmem:[%s5094_s3 + $0x158] sm:$0xff] }
 0x231   :  { %v1017_v33 = vadd.f32 %v1009_v50, %v833_v29  ;;  %v5166_v29 = vld [vmem:[#allocation31_spill] sm:$0xff]  ;;  %v1338_v50 = vld [vmem:[%s5094_s3 + $0x1d8] sm:$0xff]  ;;  %1509 = vmatpush.msrb.mxu2 %v1322_v43 }
 0x232   :  { %v1188_v21 = vadd.f32 %v4048_v7, %v5166_v29  ;;  %1574 = vmatpush.msra.mxu3 %v1338_v50  ;;  %v515_v7 = vpop.f32.mrf.mxu2 }
 0x233   :  { %v1025_v52 = vmax.f32 %v937_v54, %v1017_v33  ;;  %v628_v13 = vpop.f32.mrf.mxu3  ;;  %v1337_v54 = vld [vmem:[%s5094_s3 + $0x1d0] sm:$0xff]  ;;  %v5168_v33 = vld [vmem:[#allocation33_spill] sm:$0xff]  ;;  %v906_v18 = vrot.slane %v515_v7, 7  ;;  %1510 = vmatpush.msrb.mxu2 %v1321_v35 }
 0x234   :  { %1575 = vmatpush.msra.mxu3 %v1337_v54  ;;  %v5171_v7 = vld [vmem:[#allocation4_spill] sm:$0xff] }
 0x237   :  { %v723_v53 = vpop.f32.mrf.mxu0 }
 0x238   :  { %v1073_v49 = vadd.f32 %v1065_v42, %v723_v53  ;;  %v836_v10 = vpop.f32.mrf.mxu1  ;;  %v1236_v42 = vadd.f32 %v4073_v31, %v5168_v33  ;;  %v1319_v33 = vld [vmem:[%s5094_s3 + $0x140] sm:$0xff] }
 0x239   :  { %v1129_v45 = vadd.f32 %v1121_v44, %v836_v10  ;;  %v986_v44 = vrot.slane %v628_v13, 7  ;;  %v5169_v10 = vld [vmem:[#allocation3_spill] sm:$0xff]  ;;  %v1042_v13 = vrot.slane %v5171_v7, 7  ;;  %v1317_v7 = vld [vmem:[%s5094_s3 + $0x130] sm:$0xff] }
 0x23a   :  { %v1081_v3 = vmax.f32 %v1025_v52, %v1073_v49  ;;  %v873_v38 = vrot.slane %v5169_v10, 7 }
 0x23c   :  { %v1137_v62 = vmax.f32 %v1081_v3, %v1129_v45  ;;  %v5170_v45 = vld [vmem:[#allocation6_spill] sm:$0xff]  ;;  %v890_v29 = vsel %vm882_vm1, 0.0, %v873_v38 }
 0x23e   :  { %v1148_v6 = vadd.f32 %v3653_v59, %v1137_v62  ;;  %v954_v62 = vrot.slane %v5170_v45, 7 }
 0x23f   :  { %v726_v17 = vpop.f32.mrf.mxu0 }
 0x240   :  { %v4166_v25 = vmax.f32 %v1148_v6, 0.0  ;;  %v1180_v46 = vadd.f32 %v1172_v19, %v726_v17  ;;  %v839_v47 = vpop.f32.mrf.mxu1  ;;  %v922_v19 = vsel %vm882_vm1, 0.0, %v906_v18  ;;  %v1002_v6 = vsel %vm882_vm1, 0.0, %v986_v44 }
 0x241   :  { %v1196_v2 = vadd.f32 %v1188_v21, %v839_v47  ;;  %v930_v21 = vadd.f32 %v922_v19, %v890_v29  ;;  %v970_v17 = vsel %vm882_vm1, 0.0, %v954_v62  ;;  %v1058_v18 = vsel %vm882_vm1, 0.0, %v1042_v13  ;;  %v1318_v19 = vld [vmem:[%s5094_s3 + $0x138] sm:$0xff]  ;;  %v1333_v13 = vld [vmem:[%s5094_s3 + $0x1b0] sm:$0xff] }
 0x242   :  { %2615 = vmatmul.msk.f32.gmra.mxu2 %vm3665_vm2, %v4166_v25  ;;  %2639 = vmatmul.msk.f32.gmra.mxu3 %vm3665_vm2, %v4166_v25  ;;  %v1010_v47 = vadd.f32 %v1002_v6, %v970_v17  ;;  %v1334_v6 = vld [vmem:[%s5094_s3 + $0x1b8] sm:$0xff]  ;;  %v5174_v17 = vld [vmem:[#allocation39_spill] sm:$0xff] }
 0x243   :  { %v1204_v5 = vmax.f32 %v1180_v46, %v1196_v2  ;;  %2711 = vmatmul.msk.f32.gmra.mxu0 %vm3665_vm2, %v4166_v25  ;;  %2735 = vmatmul.msk.f32.gmra.mxu1 %vm3665_vm2, %v4166_v25  ;;  %v1320_v2 = vld [vmem:[%s5094_s3 + $0x148] sm:$0xff] }
 0x244   :  { %1511 = vmatpush.msrb.mxu2 %v1320_v2 }
 0x246   :  { %1512 = vmatpush.msrb.mxu2 %v1319_v33  ;;  %v1312_v33 = vld [vmem:[%s5094_s3 + $0x108] sm:$0xff] }
 0x247   :  { %v729_v53 = vpop.f32.mrf.mxu0 }
 0x248   :  { %v1220_v52 = vadd.f32 %v1212_v60, %v729_v53  ;;  %v842_v49 = vpop.f32.mrf.mxu1  ;;  %v5172_v60 = vld [vmem:[#allocation7_spill] sm:$0xff]  ;;  %v1066_v53 = vadd.f32 %v1058_v18, %v4111_v30  ;;  %1513 = vmatpush.msrb.mxu2 %v1318_v19  ;;  %v5173_v30 = vld [vmem:[#allocation38_spill] sm:$0xff] }
 0x249   :  { %v4197_v3 = vadd.f32 %v1236_v42, %v842_v49  ;;  %v1098_v35 = vrot.slane %v5172_v60, 7  ;;  %v1335_v42 = vld [vmem:[%s5094_s3 + $0x1c0] sm:$0xff] }
 0x24a   :  { %v4200_v34 = vmax.f32 %v1204_v5, %v1220_v52  ;;  %v1336_v5 = vld [vmem:[%s5094_s3 + $0x1c8] sm:$0xff]  ;;  %1514 = vmatpush.msrb.mxu2 %v1317_v7 }
 0x24b   :  { %1576 = vmatpush.msra.mxu3 %v1336_v5  ;;  %v1114_v44 = vsel %vm882_vm1, 0.0, %v1098_v35 }
 0x24c   :  { %v1252_v31 = vmax.f32 %v4200_v34, %v4197_v3  ;;  %v1122_v49 = vadd.f32 %v1114_v44, %v4119_v58  ;;  %1515 = vmatpush.msrb.mxu2 %v1316_v39  ;;  %v5175_v44 = vld [vmem:[#allocation2_spill] sm:$0xff]  ;;  %v4426_v34 = vpop.f32.mrf.mxu2 }
 0x24d   :  { %1577 = vmatpush.msra.mxu3 %v1335_v42  ;;  %v1327_v42 = vld [vmem:[%s5094_s3 + $0x180] sm:$0xff] }
 0x24e   :  { %1516 = vmatpush.msrb.mxu2 %v1315_v32 }
 0x24f   :  { %v732_v46 = vpop.f32.mrf.mxu0  ;;  %1578 = vmatpush.msra.mxu3 %v1334_v6 }
 0x250   :  { %v938_v43 = vadd.f32 %v930_v21, %v732_v46  ;;  %v845_v50 = vpop.f32.mrf.mxu1  ;;  %v1173_v21 = vadd.f32 %v4134_v56, %v5173_v30  ;;  %v1189_v46 = vadd.f32 %v4142_v8, %v5174_v17  ;;  %v4260_v56 = vld [vmem:[%s5093_s2] ss:$0 sm:$0xff]  ;;  %1517 = vmatpush.msrb.mxu2 %v1314_v26 }
 0x251   :  { %v1018_v12 = vadd.f32 %v1010_v47, %v845_v50  ;;  %v1254_v8 = vadd.f32 %v4260_v56, %v1246_v14  ;;  %1579 = vmatpush.msra.mxu3 %v1333_v13  ;;  %v1255_v14 = vadd.f32 %v4260_v56, %v1247_v23  ;;  %v1256_v23 = vadd.f32 %v4260_v56, %v1248_v27 }
 0x252   :  { %v1257_v27 = vadd.f32 %v4260_v56, %v1249_v37  ;;  %v1258_v40 = vadd.f32 %v4260_v56, %v1250_v22  ;;  %v1329_v37 = vld [vmem:[%s5094_s3 + $0x190] sm:$0xff]  ;;  %1518 = vmatpush.msrb.mxu2 %v1313_v57  ;;  %v1311_v22 = vld [vmem:[%s5094_s3 + $0x100] sm:$0xff]  ;;  %v1259_v18 = vadd.f32 %v4260_v56, %v1251_v28  ;;  %v1260_v28 = vadd.f32 %v4260_v56, %v1252_v31  ;;  %v4428_v31 = vpop.f32.mrf.mxu3 }
 0x253   :  { %v1026_v54 = vmax.f32 %v938_v43, %v1018_v12  ;;  %v4272_v12 = vmax.f32 %v1254_v8, 0.0  ;;  %1580 = vmatpush.msra.mxu3 %v1332_v4  ;;  %v4292_v60 = vmax.f32 %v1255_v14, 0.0  ;;  %v4312_v35 = vmax.f32 %v1256_v23, 0.0 }
 0x254   :  { %v4358_v41 = vmax.f32 %v1258_v40, 0.0  ;;  %1519 = vmatpush.msrb.mxu2 %v1312_v33  ;;  %v4436_v6 = vpop.f32.mrf.mxu2  ;;  %v2043_v33 = vld [vmem:[%s5096_s5 + $0xd0] sm:$0xff] }
 0x255   :  { %1581 = vmatpush.msra.mxu3 %v1331_v15 }
 0x256   :  { %1520 = vmatpush.msrb.mxu2 %v1311_v22 }
 0x257   :  { %v735_v52 = vpop.f32.mrf.mxu0  ;;  %1582 = vmatpush.msra.mxu3 %v1330_v1 }
 0x258   :  { %v1074_v10 = vadd.f32 %v1066_v53, %v735_v52  ;;  %v848_v38 = vpop.f32.mrf.mxu1  ;;  %v1213_v52 = vadd.f32 %v4157_v20, %v5175_v44 }
 0x259   :  { %v1130_v62 = vadd.f32 %v1122_v49, %v848_v38  ;;  %1583 = vmatpush.msra.mxu3 %v1329_v37  ;;  %v4380_v49 = vmax.f32 %v1259_v18, 0.0  ;;  %v2030_v37 = vld [vmem:[%s5096_s5 + $0x68] sm:$0xff]  ;;  %v2029_v18 = vld [vmem:[%s5096_s5 + $0x60] sm:$0xff] }
 0x25a   :  { %v1082_v45 = vmax.f32 %v1026_v54, %v1074_v10  ;;  %v4332_v54 = vmax.f32 %v1257_v27, 0.0  ;;  %v2044_v27 = vld [vmem:[%s5096_s5 + $0xd8] sm:$0xff] }
 0x25b   :  { %1584 = vmatpush.msra.mxu3 %v1328_v24  ;;  %2149 = vmatpush.msra.mxu2 %v2044_v27 }
 0x25c   :  { %v1138_v29 = vmax.f32 %v1082_v45, %v1130_v62  ;;  %v4399_v62 = vmax.f32 %v1260_v28, 0.0 }
 0x25d   :  { %1585 = vmatpush.msra.mxu3 %v1327_v42  ;;  %2150 = vmatpush.msra.mxu2 %v2043_v33 }
 0x25e   :  { %v1149_v58 = vadd.f32 %v3653_v59, %v1138_v29  ;;  %v4438_v29 = vpop.f32.mrf.mxu3 }
 0x25f   :  { %v738_v47 = vpop.f32.mrf.mxu0  ;;  %2185 = vmatpush.msrb.mxu3 %v2030_v37 }
 0x260   :  { %v4237_v43 = vmax.f32 %v1149_v58, 0.0  ;;  %v4239_v50 = vadd.f32 %v1173_v21, %v738_v47  ;;  %v851_v2 = vpop.f32.mrf.mxu1 }
 0x261   :  { %v4241_v5 = vadd.f32 %v1189_v46, %v851_v2  ;;  %2186 = vmatpush.msrb.mxu3 %v2029_v18 }
 0x262   :  { %2617 = vmatmul.msk.f32.gmra.mxu2 %vm3665_vm2, %v4237_v43  ;;  %2641 = vmatmul.msk.f32.gmra.mxu3 %vm3665_vm2, %v4237_v43 }
 0x263   :  { %v1205_v59 = vmax.f32 %v4239_v50, %v4241_v5  ;;  %2713 = vmatmul.msk.f32.gmra.mxu0 %vm3665_vm2, %v4237_v43  ;;  %2737 = vmatmul.msk.f32.gmra.mxu1 %vm3665_vm2, %v4237_v43 }
 0x266   :  { %v4448_v30 = vpop.f32.mrf.mxu3 }
 0x267   :  { %v741_v53 = vpop.f32.mrf.mxu0 }
 0x268   :  { %v1221_v10 = vadd.f32 %v1213_v52, %v741_v53  ;;  %v854_v38 = vpop.f32.mrf.mxu1 }
 0x269   :  { %v1245_v45 = vadd.f32 %v1237_v61, %v854_v38  ;;  %v2028_v38 = vld [vmem:[%s5096_s5 + $0x58] sm:$0xff] }
 0x26a   :  { %2618 = vmatmul.msk.f32.gmra.mxu2 %vm1270_vm3, %v4272_v12  ;;  %2642 = vmatmul.msk.f32.gmra.mxu3 %vm1270_vm3, %v4272_v12  ;;  %v1229_v20 = vmax.f32 %v1205_v59, %v1221_v10  ;;  %v2042_v10 = vld [vmem:[%s5096_s5 + $0xc8] sm:$0xff] }
 0x26b   :  { %2714 = vmatmul.msk.f32.gmra.mxu0 %vm1270_vm3, %v4272_v12  ;;  %2738 = vmatmul.msk.f32.gmra.mxu1 %vm1270_vm3, %v4272_v12 }
 0x26c   :  { %v1253_v19 = vmax.f32 %v1229_v20, %v1245_v45  ;;  %2151 = vmatpush.msra.mxu2 %v2042_v10  ;;  %2187 = vmatpush.msrb.mxu3 %v2028_v38 }
 0x26e   :  { %v1261_v63 = vadd.f32 %v4260_v56, %v1253_v19  ;;  %v4458_v21 = vpop.f32.mrf.mxu3  ;;  %v2041_v19 = vld [vmem:[%s5096_s5 + $0xc0] sm:$0xff] }
 0x26f   :  { %v4534_v13 = vpop.f32.mrf.mxu0  ;;  %2152 = vmatpush.msra.mxu2 %v2041_v19 }
 0x270   :  { %v4410_v3 = vmax.f32 %v1261_v63, 0.0  ;;  %v4540_v4 = vpop.f32.mrf.mxu1  ;;  %v2027_v63 = vld [vmem:[%s5096_s5 + $0x50] sm:$0xff] }
 0x271   :  { %2188 = vmatpush.msrb.mxu3 %v2027_v63 }
 0x272   :  { %2619 = vmatmul.msk.f32.gmra.mxu2 %vm1270_vm3, %v4292_v60  ;;  %2643 = vmatmul.msk.f32.gmra.mxu3 %vm1270_vm3, %v4292_v60 }
 0x273   :  { %2715 = vmatmul.msk.f32.gmra.mxu0 %vm1270_vm3, %v4292_v60  ;;  %2739 = vmatmul.msk.f32.gmra.mxu1 %vm1270_vm3, %v4292_v60 }
 0x277   :  { %v4542_v14 = vpop.f32.mrf.mxu0 }
 0x278   :  { %v4552_v15 = vpop.f32.mrf.mxu1 }
 0x27a   :  { %2620 = vmatmul.msk.f32.gmra.mxu2 %vm1270_vm3, %v4312_v35  ;;  %2644 = vmatmul.msk.f32.gmra.mxu3 %vm1270_vm3, %v4312_v35 }
 0x27b   :  { %2716 = vmatmul.msk.f32.gmra.mxu0 %vm1270_vm3, %v4312_v35  ;;  %2740 = vmatmul.msk.f32.gmra.mxu1 %vm1270_vm3, %v4312_v35 }
 0x280   :  { %v4558_v23 = vpop.f32.mrf.mxu0  ;;  %v4564_v1 = vpop.f32.mrf.mxu1 }
 0x282   :  { %2621 = vmatmul.msk.f32.gmra.mxu2 %vm1270_vm3, %v4332_v54  ;;  %2645 = vmatmul.msk.f32.gmra.mxu3 %vm1270_vm3, %v4332_v54 }
 0x283   :  { %2717 = vmatmul.msk.f32.gmra.mxu0 %vm1270_vm3, %v4332_v54  ;;  %2741 = vmatmul.msk.f32.gmra.mxu1 %vm1270_vm3, %v4332_v54 }
 0x285   :  { %v4468_v58 = vpop.f32.mrf.mxu3 }
 0x288   :  { %v4573_v57 = vpop.f32.mrf.mxu0  ;;  %v4581_v24 = vpop.f32.mrf.mxu1 }
 0x28a   :  { %2622 = vmatmul.msk.f32.gmra.mxu2 %vm1270_vm3, %v4358_v41  ;;  %2646 = vmatmul.msk.f32.gmra.mxu3 %vm1270_vm3, %v4358_v41 }
 0x28b   :  { %2718 = vmatmul.msk.f32.gmra.mxu0 %vm1270_vm3, %v4358_v41  ;;  %2742 = vmatmul.msk.f32.gmra.mxu1 %vm1270_vm3, %v4358_v41 }
 0x290   :  { %v4587_v42 = vpop.f32.mrf.mxu0  ;;  %v4596_v52 = vpop.f32.mrf.mxu1 }
 0x292   :  { %2623 = vmatmul.msk.f32.gmra.mxu2 %vm1270_vm3, %v4380_v49  ;;  %2647 = vmatmul.msk.f32.gmra.mxu3 %vm1270_vm3, %v4380_v49 }
 0x293   :  { %2719 = vmatmul.msk.f32.gmra.mxu0 %vm1270_vm3, %v4380_v49  ;;  %2743 = vmatmul.msk.f32.gmra.mxu1 %vm1270_vm3, %v4380_v49 }
 0x29a   :  { %2624 = vmatmul.msk.f32.gmra.mxu2 %vm1270_vm3, %v4399_v62  ;;  %2648 = vmatmul.msk.f32.gmra.mxu3 %vm1270_vm3, %v4399_v62 }
 0x29b   :  { %2720 = vmatmul.msk.f32.gmra.mxu0 %vm1270_vm3, %v4399_v62  ;;  %2744 = vmatmul.msk.f32.gmra.mxu1 %vm1270_vm3, %v4399_v62 }
 0x2a0   :  { %v4608_v28 = vpop.f32.mrf.mxu1 }
 0x2a2   :  { %2625 = vmatmul.msk.f32.gmra.mxu2 %vm1270_vm3, %v4410_v3  ;;  %2649 = vmatmul.msk.f32.gmra.mxu3 %vm1270_vm3, %v4410_v3 }
 0x2a3   :  { %2721 = vmatmul.msk.f32.gmra.mxu0 %vm1270_vm3, %v4410_v3  ;;  %2745 = vmatmul.msk.f32.gmra.mxu1 %vm1270_vm3, %v4410_v3 }
 0x2a5   :  { %v4478_v17 = vpop.f32.mrf.mxu3 }
 0x2aa   :  { %2651 = vmatmul.msk.f32.vlgmr.msrb.gmra.mxu2 %vm3665_vm2, %v3669_v36  ;;  %2675 = vmatmul.msk.f32.vlgmr.msra.gmra.mxu3 %vm3665_vm2, %v3669_v36  ;;  %v4446_v36 = vpop.f32.mrf.mxu2 }
 0x2b2   :  { %2653 = vmatmul.msk.f32.gmra.mxu2 %vm3665_vm2, %v3730_v48  ;;  %2677 = vmatmul.msk.f32.gmra.mxu3 %vm3665_vm2, %v3730_v48  ;;  %v4456_v48 = vpop.f32.mrf.mxu2 }
 0x2ba   :  { %2655 = vmatmul.msk.f32.gmra.mxu2 %vm3665_vm2, %v3831_v16  ;;  %2679 = vmatmul.msk.f32.gmra.mxu3 %vm3665_vm2, %v3831_v16  ;;  %v4466_v16 = vpop.f32.mrf.mxu2 }
 0x2c0   :  { %v4620_v37 = vpop.f32.mrf.mxu1 }
 0x2c2   :  { %2657 = vmatmul.msk.f32.gmra.mxu2 %vm3665_vm2, %v3959_v9  ;;  %2681 = vmatmul.msk.f32.gmra.mxu3 %vm3665_vm2, %v3959_v9  ;;  %v4476_v9 = vpop.f32.mrf.mxu2 }
 0x2c5   :  { %v4488_v46 = vpop.f32.mrf.mxu3 }
 0x2c6   :  { %5178 = vst [vmem:[#allocation9_spill] sm:$0xff] %v4488_v46 }
 0x2ca   :  { %2659 = vmatmul.msk.f32.gmra.mxu2 %vm3665_vm2, %v4028_v11  ;;  %2683 = vmatmul.msk.f32.gmra.mxu3 %vm3665_vm2, %v4028_v11  ;;  %v4486_v11 = vpop.f32.mrf.mxu2 }
 0x2cb   :  { %5177 = vst [vmem:[#allocation8_spill] sm:$0xff] %v4486_v11 }
 0x2d2   :  { %2661 = vmatmul.msk.f32.gmra.mxu2 %vm3665_vm2, %v4089_v0  ;;  %2685 = vmatmul.msk.f32.gmra.mxu3 %vm3665_vm2, %v4089_v0 }
 0x2da   :  { %2663 = vmatmul.msk.f32.gmra.mxu2 %vm3665_vm2, %v4166_v25  ;;  %2687 = vmatmul.msk.f32.gmra.mxu3 %vm3665_vm2, %v4166_v25 }
 0x2e2   :  { %2665 = vmatmul.msk.f32.gmra.mxu2 %vm3665_vm2, %v4237_v43  ;;  %2689 = vmatmul.msk.f32.gmra.mxu3 %vm3665_vm2, %v4237_v43 }
 0x2e5   :  { %v4496_v0 = vpop.f32.mrf.mxu2  ;;  %v4498_v47 = vpop.f32.mrf.mxu3 }
 0x2e6   :  { %5179 = vst [vmem:[#allocation14_spill] sm:$0xff] %v4496_v0 }
 0x2e7   :  { %5180 = vst [vmem:[#allocation15_spill] sm:$0xff] %v4498_v47  ;;  %v4628_v47 = vpop.f32.mrf.mxu1 }
 0x2ea   :  { %2666 = vmatmul.msk.f32.gmra.mxu2 %vm1270_vm3, %v4272_v12  ;;  %2690 = vmatmul.msk.f32.gmra.mxu3 %vm1270_vm3, %v4272_v12 }
 0x2ed   :  { %v4504_v25 = vpop.f32.mrf.mxu2  ;;  %v4506_v50 = vpop.f32.mrf.mxu3 }
 0x2f2   :  { %2667 = vmatmul.msk.f32.gmra.mxu2 %vm1270_vm3, %v4292_v60  ;;  %2691 = vmatmul.msk.f32.gmra.mxu3 %vm1270_vm3, %v4292_v60 }
 0x2f5   :  { %v4512_v51 = vpop.f32.mrf.mxu2  ;;  %v4514_v43 = vpop.f32.mrf.mxu3 }
 0x2fa   :  { %2668 = vmatmul.msk.f32.gmra.mxu2 %vm1270_vm3, %v4312_v35  ;;  %2692 = vmatmul.msk.f32.gmra.mxu3 %vm1270_vm3, %v4312_v35 }
 0x2fd   :  { %v4520_v2 = vpop.f32.mrf.mxu2  ;;  %v4522_v5 = vpop.f32.mrf.mxu3 }
 0x302   :  { %2669 = vmatmul.msk.f32.gmra.mxu2 %vm1270_vm3, %v4332_v54  ;;  %2693 = vmatmul.msk.f32.gmra.mxu3 %vm1270_vm3, %v4332_v54 }
 0x305   :  { %v4528_v59 = vpop.f32.mrf.mxu2  ;;  %v1490_v56 = vpop.f32.mrf.mxu3 }
 0x30a   :  { %2670 = vmatmul.msk.f32.gmra.mxu2 %vm1270_vm3, %v4358_v41  ;;  %2694 = vmatmul.msk.f32.gmra.mxu3 %vm1270_vm3, %v4358_v41 }
 0x30d   :  { %v1428_v8 = vpop.f32.mrf.mxu2  ;;  %v1493_v7 = vpop.f32.mrf.mxu3 }
 0x312   :  { %2671 = vmatmul.msk.f32.gmra.mxu2 %vm1270_vm3, %v4380_v49  ;;  %2695 = vmatmul.msk.f32.gmra.mxu3 %vm1270_vm3, %v4380_v49  ;;  %v4598_v49 = vpop.f32.mrf.mxu0 }
 0x315   :  { %v1431_v12 = vpop.f32.mrf.mxu2  ;;  %v1496_v39 = vpop.f32.mrf.mxu3 }
 0x31a   :  { %2672 = vmatmul.msk.f32.gmra.mxu2 %vm1270_vm3, %v4399_v62  ;;  %2696 = vmatmul.msk.f32.gmra.mxu3 %vm1270_vm3, %v4399_v62  ;;  %v4610_v45 = vpop.f32.mrf.mxu0 }
 0x31d   :  { %v4548_v60 = vpop.f32.mrf.mxu2  ;;  %v4550_v32 = vpop.f32.mrf.mxu3 }
 0x322   :  { %2673 = vmatmul.msk.f32.gmra.mxu2 %vm1270_vm3, %v4410_v3  ;;  %2697 = vmatmul.msk.f32.gmra.mxu3 %vm1270_vm3, %v4410_v3  ;;  %v4622_v10 = vpop.f32.mrf.mxu0 }
 0x323   :  { %5181 = vst [vmem:[#allocation10_spill] sm:$0xff] %v4622_v10 }
 0x325   :  { %v4560_v35 = vpop.f32.mrf.mxu2  ;;  %v4562_v26 = vpop.f32.mrf.mxu3 }
 0x32a   :  { %v1676_v11 = vpop.f32.mrf.mxu0 }
 0x32d   :  { %v4569_v54 = vpop.f32.mrf.mxu2  ;;  %v4571_v40 = vpop.f32.mrf.mxu3 }
 0x335   :  { %v4583_v41 = vpop.f32.mrf.mxu2  ;;  %v4585_v22 = vpop.f32.mrf.mxu3 }
 0x33d   :  { %v4592_v53 = vpop.f32.mrf.mxu2  ;;  %v4594_v44 = vpop.f32.mrf.mxu3 }
 0x345   :  { %v4606_v55 = vpop.f32.mrf.mxu2  ;;  %v1596_v61 = vpop.f32.mrf.mxu3 }
 0x346   :  { %v1937_v20 = vrot.slane %v1596_v61, 1 }
 0x348   :  { %v4612_v62 = vadd.f32 %v1937_v20, %v1490_v56 }
 0x34d   :  { %v1534_v3 = vpop.f32.mrf.mxu2  ;;  %v1599_v27 = vpop.f32.mrf.mxu3 }
 0x34e   :  { %v1866_v33 = vrot.slane %v1534_v3, 1  ;;  %v1938_v18 = vrot.slane %v1599_v27, 1  ;;  %v2040_v3 = vld [vmem:[%s5096_s5 + $0xb8] sm:$0xff] }
 0x34f   :  { %2153 = vmatpush.msra.mxu2 %v2040_v3 }
 0x350   :  { %v4624_v56 = vadd.f32 %v1866_v33, %v1428_v8  ;;  %v4626_v38 = vadd.f32 %v1938_v18, %v1493_v7  ;;  %v1741_v18 = vpop.f32.mrf.mxu1 }
 0x355   :  { %v1537_v61 = vpop.f32.mrf.mxu2  ;;  %v1602_v20 = vpop.f32.mrf.mxu3 }
 0x356   :  { %v1867_v0 = vrot.slane %v1537_v61, 1  ;;  %v1939_v46 = vrot.slane %v1602_v20, 1 }
 0x358   :  { %v4630_v19 = vadd.f32 %v1867_v0, %v1431_v12  ;;  %v4632_v63 = vadd.f32 %v1939_v46, %v1496_v39  ;;  %v2026_v46 = vld [vmem:[%s5096_s5 + $0x48] sm:$0xff]  ;;  %v2039_v0 = vld [vmem:[%s5096_s5 + $0xb0] sm:$0xff]  ;;  %v4649_v12 = vpop.f32.mrf.mxu0 }
 0x359   :  { %2189 = vmatpush.msrb.mxu3 %v2026_v46  ;;  %2154 = vmatpush.msra.mxu2 %v2039_v0  ;;  %v2038_v46 = vld [vmem:[%s5096_s5 + $0xa8] sm:$0xff]  ;;  %v1782_v0 = vrot.slane %v4534_v13, 1 }
 0x35b   :  { %2155 = vmatpush.msra.mxu2 %v2038_v46 }
 0x35d   :  { %v1540_v8 = vpop.f32.mrf.mxu2  ;;  %v1605_v27 = vpop.f32.mrf.mxu3 }
 0x35e   :  { %v1868_v7 = vrot.slane %v1540_v8, 1  ;;  %v1940_v33 = vrot.slane %v1605_v27, 1  ;;  %v4657_v27 = vpop.f32.mrf.mxu1 }
 0x360   :  { %v4638_v10 = vadd.f32 %v1868_v7, %v4548_v60  ;;  %v4641_v61 = vadd.f32 %v1940_v33, %v4550_v32  ;;  %v1862_v7 = vrot.slane %v4569_v54, 1  ;;  %v2025_v33 = vld [vmem:[%s5096_s5 + $0x40] sm:$0xff] }
 0x361   :  { %2190 = vmatpush.msrb.mxu3 %v2025_v33  ;;  %v2024_v33 = vld [vmem:[%s5096_s5 + $0x38] sm:$0xff] }
 0x362   :  { %v1878_v54 = vadd.f32 %v1862_v7, %v4504_v25  ;;  %v1863_v7 = vrot.slane %v4583_v41, 1  ;;  %v2035_v41 = vld [vmem:[%s5096_s5 + $0x90] sm:$0xff] }
 0x363   :  { %2191 = vmatpush.msrb.mxu3 %v2024_v33 }
 0x364   :  { %v1879_v33 = vadd.f32 %v1863_v7, %v4512_v51  ;;  %v1895_v51 = vrot.slane %v4649_v12, 1  ;;  %v1864_v7 = vrot.slane %v4592_v53, 1  ;;  %v1967_v12 = vrot.slane %v4657_v27, 1  ;;  %v2031_v27 = vld [vmem:[%s5096_s5 + $0x70] sm:$0xff] }
 0x365   :  { %v1543_v39 = vpop.f32.mrf.mxu2  ;;  %v1608_v20 = vpop.f32.mrf.mxu3  ;;  %v1784_v53 = vrot.slane %v4558_v23, 1 }
 0x366   :  { %v1869_v3 = vrot.slane %v1543_v39, 1  ;;  %v1941_v60 = vrot.slane %v1608_v20, 1  ;;  %v1822_v20 = vrot.slane %v4540_v4, 1  ;;  %v2037_v4 = vld [vmem:[%s5096_s5 + $0xa0] sm:$0xff] }
 0x367   :  { %2156 = vmatpush.msra.mxu2 %v2037_v4 }
 0x368   :  { %v4652_v8 = vadd.f32 %v1869_v3, %v4560_v35  ;;  %v4655_v32 = vadd.f32 %v1941_v60, %v4562_v26  ;;  %v1934_v35 = vrot.slane %v4571_v40, 1  ;;  %v4669_v3 = vpop.f32.mrf.mxu0  ;;  %v1894_v40 = vrot.slane %v1676_v11, 1  ;;  %v2036_v11 = vld [vmem:[%s5096_s5 + $0x98] sm:$0xff] }
 0x369   :  { %2157 = vmatpush.msra.mxu2 %v2036_v11  ;;  %v1911_v11 = vadd.f32 %v1895_v51, %v1879_v33  ;;  %v2058_v33 = vld [vmem:[%s5096_s5 + $0x148] sm:$0xff]  ;;  %v2071_v51 = vld [vmem:[%s5096_s5 + $0x1b0] sm:$0xff] }
 0x36a   :  { %5182 = vst [vmem:[#allocation11_spill] sm:$0xff] %v4652_v8  ;;  %v1950_v13 = vadd.f32 %v1934_v35, %v4506_v50  ;;  %v1910_v25 = vadd.f32 %v1894_v40, %v1878_v54  ;;  %v2022_v50 = vld [vmem:[%s5096_s5 + $0x28] sm:$0xff]  ;;  %v4706_v40 = vld [vmem:[%s5095_s4] ss:$0 sm:$0xff] }
 0x36b   :  { %5183 = vst [vmem:[#allocation12_spill] sm:$0xff] %v4655_v32  ;;  %2158 = vmatpush.msra.mxu2 %v2035_v41  ;;  %v2017_v41 = vld [vmem:[%s5096_s5] sm:$0xff] }
 0x36d   :  { %v1546_v26 = vpop.f32.mrf.mxu2  ;;  %v1611_v39 = vpop.f32.mrf.mxu3 }
 0x36e   :  { %v1766_v60 = vadd.f32 %v1546_v26, %v4426_v34  ;;  %v1806_v32 = vadd.f32 %v1611_v39, %v4428_v31  ;;  %v2023_v34 = vld [vmem:[%s5096_s5 + $0x30] sm:$0xff]  ;;  %v1966_v31 = vrot.slane %v1741_v18, 1  ;;  %v1783_v39 = vrot.slane %v4542_v14, 1  ;;  %v2034_v14 = vld [vmem:[%s5096_s5 + $0x88] sm:$0xff] }
 0x36f   :  { %2192 = vmatpush.msrb.mxu3 %v2023_v34  ;;  %2159 = vmatpush.msra.mxu2 %v2034_v14 }
 0x370   :  { %v1798_v46 = vadd.f32 %v1782_v0, %v1766_v60  ;;  %v1838_v8 = vadd.f32 %v1822_v20, %v1806_v32  ;;  %v4691_v32 = vpop.f32.mrf.mxu1  ;;  %v1982_v35 = vadd.f32 %v1966_v31, %v1950_v13  ;;  %v1935_v0 = vrot.slane %v4585_v22, 1  ;;  %v4717_v4 = vpop.f32.mrf.mxu0 }
 0x371   :  { %2193 = vmatpush.msrb.mxu3 %v2022_v50  ;;  %v1823_v20 = vrot.slane %v4552_v15, 1  ;;  %v2020_v15 = vld [vmem:[%s5096_s5 + $0x18] sm:$0xff]  ;;  %v1968_v14 = vrot.slane %v4691_v32, 1 }
 0x372   :  { %v1846_v26 = vmax.f32 %v1798_v46, %v1838_v8  ;;  %v2021_v8 = vld [vmem:[%s5096_s5 + $0x20] sm:$0xff]  ;;  %v1951_v34 = vadd.f32 %v1935_v0, %v4514_v43  ;;  %v2018_v0 = vld [vmem:[%s5096_s5 + $0x8] sm:$0xff] }
 0x373   :  { %2194 = vmatpush.msrb.mxu3 %v2021_v8  ;;  %v1824_v8 = vrot.slane %v4564_v1, 1 }
 0x374   :  { %v1918_v18 = vmax.f32 %v1846_v26, %v1910_v25  ;;  %v2019_v25 = vld [vmem:[%s5096_s5 + $0x10] sm:$0xff]  ;;  %v1936_v26 = vrot.slane %v4594_v44, 1  ;;  %v1983_v44 = vadd.f32 %v1967_v12, %v1951_v34  ;;  %v1785_v34 = vrot.slane %v4573_v57, 1 }
 0x375   :  { %v1549_v54 = vpop.f32.mrf.mxu2  ;;  %v1614_v60 = vpop.f32.mrf.mxu3  ;;  %2195 = vmatpush.msrb.mxu3 %v2020_v15  ;;  %v2057_v15 = vld [vmem:[%s5096_s5 + $0x140] sm:$0xff] }
 0x376   :  { %v1990_v22 = vmax.f32 %v1918_v18, %v1982_v35  ;;  %v1767_v13 = vadd.f32 %v1549_v54, %v4436_v6  ;;  %v1807_v46 = vadd.f32 %v1614_v60, %v4438_v29  ;;  %v2033_v29 = vld [vmem:[%s5096_s5 + $0x80] sm:$0xff]  ;;  %v2032_v35 = vld [vmem:[%s5096_s5 + $0x78] sm:$0xff]  ;;  %v1865_v54 = vrot.slane %v4606_v55, 1 }
 0x377   :  { %2160 = vmatpush.msra.mxu2 %v2033_v29  ;;  %2196 = vmatpush.msrb.mxu3 %v2019_v25  ;;  %v2056_v29 = vld [vmem:[%s5096_s5 + $0x138] sm:$0xff]  ;;  %v2070_v25 = vld [vmem:[%s5096_s5 + $0x1a8] sm:$0xff] }
 0x378   :  { %v1799_v31 = vadd.f32 %v1783_v39, %v1767_v13  ;;  %v1839_v6 = vadd.f32 %v1823_v20, %v1807_v46  ;;  %v2001_v43 = vadd.f32 %v4706_v40, %v1990_v22  ;;  %v1880_v39 = vadd.f32 %v1864_v7, %v4520_v2  ;;  %v2072_v22 = vld [vmem:[%s5096_s5 + $0x1b8] sm:$0xff]  ;;  %v4753_v13 = vpop.f32.mrf.mxu1  ;;  %v4776_v57 = vpop.f32.mrf.mxu0 }
 0x379   :  { %2161 = vmatpush.msra.mxu2 %v2032_v35  ;;  %2197 = vmatpush.msrb.mxu3 %v2018_v0  ;;  %v1952_v20 = vadd.f32 %v1936_v26, %v4522_v5  ;;  %v1896_v46 = vrot.slane %v4669_v3, 1  ;;  %v1825_v3 = vrot.slane %v4581_v24, 1  ;;  %v1881_v7 = vadd.f32 %v1865_v54, %v4528_v59 }
 0x37a   :  { %v1847_v50 = vmax.f32 %v1799_v31, %v1839_v6  ;;  %v4755_v1 = vmax.f32 %v2001_v43, 0.0  ;;  %v2069_v43 = vld [vmem:[%s5096_s5 + $0x1a0] sm:$0xff] }
 0x37b   :  { %2162 = vmatpush.msra.mxu2 %v2031_v27  ;;  %2198 = vmatpush.msrb.mxu3 %v2017_v41  ;;  %v1912_v6 = vadd.f32 %v1896_v46, %v1880_v39  ;;  %v1984_v32 = vadd.f32 %v1968_v14, %v1952_v20  ;;  %v2054_v39 = vld [vmem:[%s5096_s5 + $0x128] sm:$0xff]  ;;  %v2068_v20 = vld [vmem:[%s5096_s5 + $0x198] sm:$0xff]  ;;  %v2053_v46 = vld [vmem:[%s5096_s5 + $0x120] sm:$0xff] }
 0x37c   :  { %v1919_v18 = vmax.f32 %v1847_v50, %v1911_v11  ;;  %v2123_v24 = vrot.slane %v4755_v1, 1  ;;  %v2055_v11 = vld [vmem:[%s5096_s5 + $0x130] sm:$0xff]  ;;  %v2203_v50 = vrot.slane %v4755_v1, 2  ;;  %v2240_v35 = vrot.slane %v4755_v1, 3 }
 0x37d   :  { %v1552_v60 = vpop.f32.mrf.mxu2  ;;  %v1617_v23 = vpop.f32.mrf.mxu3  ;;  %2221 = vmatpush.msrb.mxu2 %v2058_v33  ;;  %2258 = vmatpush.msra.mxu3 %v2072_v22  ;;  %v2277_v59 = vrot.slane %v4755_v1, 4  ;;  %v2314_v0 = vrot.slane %v4755_v1, 5  ;;  %v2351_v33 = vrot.slane %v4755_v1, 6  ;;  %v2067_v14 = vld [vmem:[%s5096_s5 + $0x190] sm:$0xff] }
 0x37e   :  { %v1991_v2 = vmax.f32 %v1919_v18, %v1983_v44  ;;  %v1768_v5 = vadd.f32 %v1552_v60, %v4446_v36  ;;  %v1808_v55 = vadd.f32 %v1617_v23, %v4448_v30 }
 0x37f   :  { %2222 = vmatpush.msrb.mxu2 %v2057_v15  ;;  %2259 = vmatpush.msra.mxu3 %v2071_v51 }
 0x380   :  { %v2002_v36 = vadd.f32 %v4706_v40, %v1991_v2  ;;  %v1800_v31 = vadd.f32 %v1784_v53, %v1768_v5  ;;  %v1840_v30 = vadd.f32 %v1824_v8, %v1808_v55 }
 0x381   :  { %2223 = vmatpush.msrb.mxu2 %v2056_v29  ;;  %2260 = vmatpush.msra.mxu3 %v2070_v25  ;;  %v1969_v29 = vrot.slane %v4753_v13, 1  ;;  %v2066_v25 = vld [vmem:[%s5096_s5 + $0x188] sm:$0xff]  ;;  %v1786_v13 = vrot.slane %v4587_v42, 1  ;;  %v1826_v42 = vrot.slane %v4596_v52, 1 }
 0x382   :  { %v2010_v26 = vmax.f32 %v2002_v36, 0.0  ;;  %v1848_v12 = vmax.f32 %v1800_v31, %v1840_v30  ;;  %v1897_v36 = vrot.slane %v4717_v4, 1  ;;  %v4814_v31 = vpop.f32.mrf.mxu1 }
 0x383   :  { %2224 = vmatpush.msrb.mxu2 %v2055_v11  ;;  %2261 = vmatpush.msra.mxu3 %v2069_v43  ;;  %v2051_v11 = vld [vmem:[%s5096_s5 + $0x110] sm:$0xff]  ;;  %v2065_v43 = vld [vmem:[%s5096_s5 + $0x180] sm:$0xff] }
 0x384   :  { %v1920_v53 = vmax.f32 %v1848_v12, %v1912_v6  ;;  %v4791_v44 = vsel %vm2124_vm4, %v2010_v26, %v2123_v24  ;;  %v2167_v18 = vrot.slane %v2010_v26, 7  ;;  %v2204_v27 = vrot.slane %v2010_v26, 1 }
 0x385   :  { %v1555_v41 = vpop.f32.mrf.mxu2  ;;  %v1620_v8 = vpop.f32.mrf.mxu3  ;;  %v2241_v54 = vrot.slane %v2010_v26, 2  ;;  %v2278_v60 = vrot.slane %v2010_v26, 3  ;;  %v2315_v23 = vrot.slane %v2010_v26, 4  ;;  %2225 = vmatpush.msrb.mxu2 %v2054_v39  ;;  %2262 = vmatpush.msra.mxu3 %v2068_v20  ;;  %v2352_v55 = vrot.slane %v2010_v26, 5 }
 0x386   :  { %v1992_v22 = vmax.f32 %v1920_v53, %v1984_v32  ;;  %v1769_v2 = vadd.f32 %v1555_v41, %v4456_v48  ;;  %v1809_v5 = vadd.f32 %v1620_v8, %v4458_v21  ;;  %v2168_v15 = vsel %vm2124_vm4, %v2167_v18, %v4755_v1  ;;  %v2052_v1 = vld [vmem:[%s5096_s5 + $0x118] sm:$0xff]  ;;  %v2050_v18 = vld [vmem:[%s5096_s5 + $0x108] sm:$0xff] }
 0x387   :  { %v2205_v51 = vsel %vm2124_vm4, %v2204_v27, %v2203_v50  ;;  %v2242_v48 = vsel %vm2124_vm4, %v2241_v54, %v2240_v35  ;;  %v2279_v21 = vsel %vm2124_vm4, %v2278_v60, %v2277_v59  ;;  %2226 = vmatpush.msrb.mxu2 %v2053_v46  ;;  %2263 = vmatpush.msra.mxu3 %v2067_v14  ;;  %v4834_v50 = vpop.f32.mrf.mxu0  ;;  %v2064_v27 = vld [vmem:[%s5096_s5 + $0x178] sm:$0xff] }
 0x388   :  { %v2003_v30 = vadd.f32 %v4706_v40, %v1992_v22  ;;  %v1801_v6 = vadd.f32 %v1785_v34, %v1769_v2  ;;  %v1841_v32 = vadd.f32 %v1825_v3, %v1809_v5  ;;  %v2316_v4 = vsel %vm2124_vm4, %v2315_v23, %v2314_v0  ;;  %v2049_v23 = vld [vmem:[%s5096_s5 + $0x100] sm:$0xff] }
 0x389   :  { %v2353_v26 = vsel %vm2124_vm4, %v2352_v55, %v2351_v33  ;;  %v1913_v12 = vadd.f32 %v1897_v36, %v1881_v7  ;;  %2227 = vmatpush.msrb.mxu2 %v2052_v1  ;;  %2264 = vmatpush.msra.mxu3 %v2066_v25  ;;  %v1985_v24 = vadd.f32 %v1969_v29, %v4612_v62  ;;  %v2063_v33 = vld [vmem:[%s5096_s5 + $0x170] sm:$0xff]  ;;  %v1898_v5 = vrot.slane %v4776_v57, 1  ;;  %v2060_v25 = vld [vmem:[%s5096_s5 + $0x158] sm:$0xff] }
 0x38a   :  { %v2011_v34 = vmax.f32 %v2003_v30, 0.0  ;;  %v1849_v3 = vmax.f32 %v1801_v6, %v1841_v32  ;;  %v2061_v32 = vld [vmem:[%s5096_s5 + $0x160] sm:$0xff]  ;;  %v1787_v29 = vrot.slane %v4598_v49, 1  ;;  %v1827_v1 = vrot.slane %v4608_v28, 1  ;;  %v2059_v28 = vld [vmem:[%s5096_s5 + $0x150] sm:$0xff] }
 0x38b   :  { %2228 = vmatpush.msrb.mxu2 %v2051_v11  ;;  %2265 = vmatpush.msra.mxu3 %v2065_v43  ;;  %v1914_v36 = vadd.f32 %v1898_v5, %v4624_v56  ;;  %v2046_v56 = vld [vmem:[%s5096_s5 + $0xe8] sm:$0xff]  ;;  %v2045_v49 = vld [vmem:[%s5096_s5 + $0xe0] sm:$0xff] }
 0x38c   :  { %v1921_v35 = vmax.f32 %v1849_v3, %v1913_v12  ;;  %v2126_v7 = vrot.slane %v2011_v34, 7  ;;  %v2169_v59 = vrot.slane %v2011_v34, 6  ;;  %v4837_v0 = vsel %vm2127_vm5, %v2011_v34, %v2205_v51 }
 0x38d   :  { %v1558_v62 = vpop.f32.mrf.mxu2  ;;  %v1623_v53 = vpop.f32.mrf.mxu3  ;;  %v2243_v41 = vrot.slane %v2011_v34, 1  ;;  %v2280_v8 = vrot.slane %v2011_v34, 2  ;;  %v2317_v39 = vrot.slane %v2011_v34, 3  ;;  %2229 = vmatpush.msrb.mxu2 %v2050_v18  ;;  %2266 = vmatpush.msra.mxu3 %v2064_v27  ;;  %v2354_v52 = vrot.slane %v2011_v34, 4 }
 0x38e   :  { %v1993_v20 = vmax.f32 %v1921_v35, %v1985_v24  ;;  %v1770_v54 = vadd.f32 %v1558_v62, %v4466_v16  ;;  %v1810_v60 = vadd.f32 %v1623_v53, %v4468_v58  ;;  %v2128_v22 = vsel %vm2127_vm5, %v2126_v7, %v4791_v44  ;;  %v2048_v44 = vld [vmem:[%s5096_s5 + $0xf8] sm:$0xff] }
 0x38f   :  { %v2170_v2 = vsel %vm2127_vm5, %v2169_v59, %v2168_v15  ;;  %v2244_v16 = vsel %vm2127_vm5, %v2243_v41, %v2242_v48  ;;  %v2281_v58 = vsel %vm2127_vm5, %v2280_v8, %v2279_v21  ;;  %2230 = vmatpush.msrb.mxu2 %v2049_v23  ;;  %2267 = vmatpush.msra.mxu3 %v2063_v33  ;;  %v1970_v51 = vrot.slane %v4814_v31, 1  ;;  %v2062_v15 = vld [vmem:[%s5096_s5 + $0x168] sm:$0xff]  ;;  %v1756_v21 = vpop.f32.mrf.mxu1  ;;  %v2047_v31 = vld [vmem:[%s5096_s5 + $0xf0] sm:$0xff]  ;;  %v1694_v7 = vpop.f32.mrf.mxu0 }
 0x390   :  { %v2004_v55 = vadd.f32 %v4706_v40, %v1993_v20  ;;  %v1802_v46 = vadd.f32 %v1786_v13, %v1770_v54  ;;  %v1842_v14 = vadd.f32 %v1826_v42, %v1810_v60  ;;  %v2318_v48 = vsel %vm2127_vm5, %v2317_v39, %v2316_v4 }
 0x391   :  { %v2355_v57 = vsel %vm2127_vm5, %v2354_v52, %v2353_v26  ;;  %2231 = vmatpush.msrb.mxu2 %v2048_v44  ;;  %2268 = vmatpush.msra.mxu3 %v2062_v15  ;;  %v1986_v4 = vadd.f32 %v1970_v51, %v4626_v38  ;;  %v1899_v35 = vrot.slane %v4834_v50, 1  ;;  %v1971_v20 = vrot.slane %v1756_v21, 1  ;;  %v5184_v21 = vld [vmem:[#allocation8_spill] sm:$0xff] }
 0x392   :  { %v2012_v30 = vmax.f32 %v2004_v55, 0.0  ;;  %v1850_v6 = vmax.f32 %v1802_v46, %v1842_v14  ;;  %v1828_v33 = vrot.slane %v4620_v37, 1 }
 0x393   :  { %2232 = vmatpush.msrb.mxu2 %v2047_v31  ;;  %2269 = vmatpush.msra.mxu3 %v2061_v32 }
 0x394   :  { %v1922_v26 = vmax.f32 %v1850_v6, %v1914_v36  ;;  %v2129_v12 = vrot.slane %v2012_v30, 6  ;;  %v2171_v34 = vrot.slane %v2012_v30, 5  ;;  %v2207_v24 = vrot.slane %v2012_v30, 7  ;;  %v5185_v36 = vld [vmem:[#allocation9_spill] sm:$0xff] }
 0x395   :  { %v1561_v3 = vpop.f32.mrf.mxu2  ;;  %v1626_v13 = vpop.f32.mrf.mxu3  ;;  %v2245_v11 = vsel %vm2130_vm6, %v2012_v30, %v2244_v16  ;;  %v2282_v43 = vrot.slane %v2012_v30, 1  ;;  %v2319_v38 = vrot.slane %v2012_v30, 2  ;;  %2233 = vmatpush.msrb.mxu2 %v2046_v56  ;;  %2270 = vmatpush.msra.mxu3 %v2060_v25 }
 0x396   :  { %v1994_v59 = vmax.f32 %v1922_v26, %v1986_v4  ;;  %v1771_v42 = vadd.f32 %v1561_v3, %v4476_v9  ;;  %v1811_v62 = vadd.f32 %v1626_v13, %v4478_v17  ;;  %v2131_v53 = vsel %vm2130_vm6, %v2129_v12, %v2128_v22  ;;  %v5186_v13 = vld [vmem:[#allocation10_spill] sm:$0xff] }
 0x397   :  { %v2172_v18 = vsel %vm2130_vm6, %v2171_v34, %v2170_v2  ;;  %v2208_v27 = vsel %vm2130_vm6, %v2207_v24, %v4837_v0  ;;  %v2283_v41 = vsel %vm2130_vm6, %v2282_v43, %v2281_v58  ;;  %2234 = vmatpush.msrb.mxu2 %v2045_v49  ;;  %2271 = vmatpush.msra.mxu3 %v2059_v28  ;;  %v2356_v9 = vrot.slane %v2012_v30, 3  ;;  %v1759_v16 = vpop.f32.mrf.mxu1 }
 0x398   :  { %v2005_v8 = vadd.f32 %v4706_v40, %v1994_v59  ;;  %v1803_v50 = vadd.f32 %v1787_v29, %v1771_v42  ;;  %v1843_v39 = vadd.f32 %v1827_v1, %v1811_v62  ;;  %v1915_v17 = vadd.f32 %v1899_v35, %v4630_v19  ;;  %v1697_v29 = vpop.f32.mrf.mxu0 }
 0x399   :  { %v2320_v54 = vsel %vm2130_vm6, %v2319_v38, %v2318_v48  ;;  %v2357_v23 = vsel %vm2130_vm6, %v2356_v9, %v2355_v57  ;;  %v1788_v0 = vrot.slane %v4610_v45, 1  ;;  %v1900_v22 = vrot.slane %v1694_v7, 1 }
 0x39a   :  { %v2013_v60 = vmax.f32 %v2005_v8, 0.0  ;;  %v1851_v52 = vmax.f32 %v1803_v50, %v1843_v39  ;;  %v1987_v2 = vadd.f32 %v1971_v20, %v4632_v63  ;;  %v1972_v26 = vrot.slane %v1759_v16, 1  ;;  %v5187_v8 = vld [vmem:[#allocation14_spill] sm:$0xff]  ;;  %v5188_v39 = vld [vmem:[#allocation15_spill] sm:$0xff] }
 0x39b   :  { %v1916_v12 = vadd.f32 %v1900_v22, %v4638_v10  ;;  %v1789_v49 = vrot.slane %v5186_v13, 1  ;;  %v1829_v28 = vrot.slane %v4628_v47, 1  ;;  %v1901_v24 = vrot.slane %v1697_v29, 1  ;;  %v5189_v22 = vld [vmem:[#allocation11_spill] sm:$0xff] }
 0x39c   :  { %v1923_v58 = vmax.f32 %v1851_v52, %v1915_v17  ;;  %v2132_v5 = vrot.slane %v2013_v60, 5  ;;  %v2173_v55 = vrot.slane %v2013_v60, 4  ;;  %v2209_v46 = vrot.slane %v2013_v60, 6 }
 0x39d   :  { %v1564_v19 = vpop.f32.mrf.mxu2  ;;  %v1629_v14 = vpop.f32.mrf.mxu3  ;;  %v2246_v51 = vrot.slane %v2013_v60, 7  ;;  %v2284_v44 = vsel %vm2133_vm7, %v2013_v60, %v2283_v41  ;;  %v2321_v15 = vrot.slane %v2013_v60, 1  ;;  %v2358_v48 = vrot.slane %v2013_v60, 2 }
 0x39e   :  { %v1995_v57 = vmax.f32 %v1923_v58, %v1987_v2  ;;  %v1772_v45 = vadd.f32 %v1564_v19, %v5184_v21  ;;  %v1812_v37 = vadd.f32 %v1629_v14, %v5185_v36  ;;  %v2134_v30 = vsel %vm2133_vm7, %v2132_v5, %v2131_v53  ;;  %v5190_v5 = vld [vmem:[#allocation12_spill] sm:$0xff] }
 0x39f   :  { %v2174_v63 = vsel %vm2133_vm7, %v2173_v55, %v2172_v18  ;;  %v2210_v6 = vsel %vm2133_vm7, %v2209_v46, %v2208_v27  ;;  %v2247_v31 = vsel %vm2133_vm7, %v2246_v51, %v2245_v11  ;;  %v2322_v32 = vsel %vm2133_vm7, %v2321_v15, %v2320_v54  ;;  %v1762_v27 = vpop.f32.mrf.mxu1 }
 0x3a0   :  { %v2006_v1 = vadd.f32 %v4706_v40, %v1995_v57  ;;  %v1804_v56 = vadd.f32 %v1788_v0, %v1772_v45  ;;  %v1844_v25 = vadd.f32 %v1828_v33, %v1812_v37  ;;  %v2359_v4 = vsel %vm2133_vm7, %v2358_v48, %v2357_v23 }
 0x3a1   :  { %v1988_v11 = vadd.f32 %v1972_v26, %v4641_v61  ;;  %v1973_v33 = vrot.slane %v1762_v27, 1  ;;  %v1917_v2 = vadd.f32 %v1901_v24, %v5189_v22  ;;  %v2100_v26 = vld [vmem:[%s5096_s5 + $0x298] sm:$0xff]  ;;  %v2085_v24 = vld [vmem:[%s5096_s5 + $0x220] sm:$0xff]  ;;  %v2095_v27 = vld [vmem:[%s5096_s5 + $0x270] sm:$0xff] }
 0x3a2   :  { %v2014_v34 = vmax.f32 %v2006_v1, 0.0  ;;  %v1852_v3 = vmax.f32 %v1804_v56, %v1844_v25  ;;  %v2087_v22 = vld [vmem:[%s5096_s5 + $0x230] sm:$0xff] }
 0x3a3   :  { %v1989_v55 = vadd.f32 %v1973_v33, %v5190_v5  ;;  %v2073_v33 = vld [vmem:[%s5096_s5 + $0x1c0] sm:$0xff]  ;;  %v2111_v5 = vld [vmem:[%s5096_s5 + $0x2f0] sm:$0xff] }
 0x3a4   :  { %v1924_v43 = vmax.f32 %v1852_v3, %v1916_v12  ;;  %v2135_v38 = vrot.slane %v2014_v34, 4  ;;  %v2175_v35 = vrot.slane %v2014_v34, 3  ;;  %v2211_v7 = vrot.slane %v2014_v34, 5 }
 0x3a5   :  { %v1567_v59 = vpop.f32.mrf.mxu2  ;;  %v1632_v42 = vpop.f32.mrf.mxu3  ;;  %v2248_v62 = vrot.slane %v2014_v34, 6  ;;  %v2285_v53 = vrot.slane %v2014_v34, 7  ;;  %v2323_v10 = vsel %vm2136_vm8, %v2014_v34, %v2322_v32  ;;  %v2360_v18 = vrot.slane %v2014_v34, 1 }
 0x3a6   :  { %v1996_v41 = vmax.f32 %v1924_v43, %v1988_v11  ;;  %v1773_v50 = vadd.f32 %v1567_v59, %v5187_v8  ;;  %v1813_v47 = vadd.f32 %v1632_v42, %v5188_v39  ;;  %v2137_v9 = vsel %vm2136_vm8, %v2135_v38, %v2134_v30  ;;  %v2099_v11 = vld [vmem:[%s5096_s5 + $0x290] sm:$0xff]  ;;  %v2098_v59 = vld [vmem:[%s5096_s5 + $0x288] sm:$0xff]  ;;  %v2093_v39 = vld [vmem:[%s5096_s5 + $0x260] sm:$0xff] }
 0x3a7   :  { %v2176_v61 = vsel %vm2136_vm8, %v2175_v35, %v2174_v63  ;;  %v2212_v20 = vsel %vm2136_vm8, %v2211_v7, %v2210_v6  ;;  %v2249_v17 = vsel %vm2136_vm8, %v2248_v62, %v2247_v31  ;;  %v2286_v54 = vsel %vm2136_vm8, %v2285_v53, %v2284_v44  ;;  %v2084_v7 = vld [vmem:[%s5096_s5 + $0x218] sm:$0xff]  ;;  %v2083_v42 = vld [vmem:[%s5096_s5 + $0x210] sm:$0xff]  ;;  %v2097_v62 = vld [vmem:[%s5096_s5 + $0x280] sm:$0xff] }
 0x3a8   :  { %v2007_v60 = vadd.f32 %v4706_v40, %v1996_v41  ;;  %v1805_v52 = vadd.f32 %v1789_v49, %v1773_v50  ;;  %v1845_v23 = vadd.f32 %v1829_v28, %v1813_v47  ;;  %v2361_v0 = vsel %vm2136_vm8, %v2360_v18, %v2359_v4  ;;  %v2086_v4 = vld [vmem:[%s5096_s5 + $0x228] sm:$0xff]  ;;  %v2081_v18 = vld [vmem:[%s5096_s5 + $0x200] sm:$0xff]  ;;  %v2080_v41 = vld [vmem:[%s5096_s5 + $0x1f8] sm:$0xff] }
 0x3a9   :  { %v2082_v53 = vld [vmem:[%s5096_s5 + $0x208] sm:$0xff]  ;;  %v2079_v50 = vld [vmem:[%s5096_s5 + $0x1f0] sm:$0xff] }
 0x3aa   :  { %v2015_v16 = vmax.f32 %v2007_v60, 0.0  ;;  %v1853_v58 = vmax.f32 %v1805_v52, %v1845_v23  ;;  %v2094_v8 = vld [vmem:[%s5096_s5 + $0x268] sm:$0xff]  ;;  %v2075_v60 = vld [vmem:[%s5096_s5 + $0x1d0] sm:$0xff]  ;;  %v2089_v52 = vld [vmem:[%s5096_s5 + $0x240] sm:$0xff] }
 0x3ab   :  { %v2078_v47 = vld [vmem:[%s5096_s5 + $0x1e8] sm:$0xff] }
 0x3ac   :  { %v1925_v46 = vmax.f32 %v1853_v58, %v1917_v2  ;;  %v2138_v19 = vrot.slane %v2015_v16, 3  ;;  %v2177_v14 = vrot.slane %v2015_v16, 2  ;;  %v2213_v51 = vrot.slane %v2015_v16, 4  ;;  %v2074_v23 = vld [vmem:[%s5096_s5 + $0x1c8] sm:$0xff]  ;;  %v2112_v58 = vld [vmem:[%s5096_s5 + $0x2f8] sm:$0xff] }
 0x3ad   :  { %v2250_v15 = vrot.slane %v2015_v16, 5  ;;  %v2287_v44 = vrot.slane %v2015_v16, 6  ;;  %v2324_v48 = vrot.slane %v2015_v16, 7  ;;  %v2362_v57 = vsel %vm2139_vm9, %v2015_v16, %v2361_v0  ;;  %v2088_v0 = vld [vmem:[%s5096_s5 + $0x238] sm:$0xff]  ;;  %v2114_v2 = vld [vmem:[%s5096_s5 + $0x308] sm:$0xff]  ;;  %v2113_v16 = vld [vmem:[%s5096_s5 + $0x300] sm:$0xff] }
 0x3ae   :  { %v1997_v21 = vmax.f32 %v1925_v46, %v1989_v55  ;;  %v2140_v45 = vsel %vm2139_vm9, %v2138_v19, %v2137_v9  ;;  %v2178_v36 = vsel %vm2139_vm9, %v2177_v14, %v2176_v61  ;;  %v2214_v37 = vsel %vm2139_vm9, %v2213_v51, %v2212_v20  ;;  %v2092_v9 = vld [vmem:[%s5096_s5 + $0x258] sm:$0xff]  ;;  %v2077_v61 = vld [vmem:[%s5096_s5 + $0x1e0] sm:$0xff]  ;;  %v2091_v20 = vld [vmem:[%s5096_s5 + $0x250] sm:$0xff] }
 0x3af   :  { %v2251_v30 = vsel %vm2139_vm9, %v2250_v15, %v2249_v17  ;;  %v2288_v63 = vsel %vm2139_vm9, %v2287_v44, %v2286_v54  ;;  %v2325_v6 = vsel %vm2139_vm9, %v2324_v48, %v2323_v10  ;;  %v2096_v10 = vld [vmem:[%s5096_s5 + $0x278] sm:$0xff]  ;;  %v2090_v54 = vld [vmem:[%s5096_s5 + $0x248] sm:$0xff]  ;;  %v2109_v46 = vld [vmem:[%s5096_s5 + $0x2e0] sm:$0xff] }
 0x3b0   :  { %v2008_v31 = vadd.f32 %v4706_v40, %v1997_v21  ;;  %v2076_v17 = vld [vmem:[%s5096_s5 + $0x1d8] sm:$0xff]  ;;  %v2110_v55 = vld [vmem:[%s5096_s5 + $0x2e8] sm:$0xff]  ;;  %v2107_v14 = vld [vmem:[%s5096_s5 + $0x2d0] sm:$0xff] }
 0x3b1   :  { %v2108_v19 = vld [vmem:[%s5096_s5 + $0x2d8] sm:$0xff]  ;;  %v2106_v51 = vld [vmem:[%s5096_s5 + $0x2c8] sm:$0xff]  ;;  %v2105_v15 = vld [vmem:[%s5096_s5 + $0x2c0] sm:$0xff] }
 0x3b2   :  { %v2016_v32 = vmax.f32 %v2008_v31, 0.0  ;;  %v2104_v44 = vld [vmem:[%s5096_s5 + $0x2b8] sm:$0xff]  ;;  %v2103_v48 = vld [vmem:[%s5096_s5 + $0x2b0] sm:$0xff]  ;;  %v2101_v21 = vld [vmem:[%s5096_s5 + $0x2a0] sm:$0xff] }
 0x3b4   :  { %v2141_v29 = vrot.slane %v2016_v32, 2  ;;  %v2179_v1 = vrot.slane %v2016_v32, 1  ;;  %v2215_v56 = vrot.slane %v2016_v32, 3  ;;  %v2252_v25 = vrot.slane %v2016_v32, 4 }
 0x3b5   :  { %v2289_v12 = vrot.slane %v2016_v32, 5  ;;  %v2326_v34 = vrot.slane %v2016_v32, 6  ;;  %v2363_v3 = vrot.slane %v2016_v32, 7 }
 0x3b6   :  { %v2143_v40 = vsel %vm2142_vm10, %v2141_v29, %v2140_v45  ;;  %v2180_v13 = vsel %vm2142_vm10, %v2179_v1, %v2178_v36  ;;  %v2216_v49 = vsel %vm2142_vm10, %v2215_v56, %v2214_v37  ;;  %v2253_v28 = vsel %vm2142_vm10, %v2252_v25, %v2251_v30  ;;  %v2767_v25 = vld [vmem:[%s5097_s6] ss:$0 sm:$0xff] }
 0x3b7   :  { %2746 = vmatmul.msk.f32.vlgmr.msra.gmra.mxu2 %vm2144_vm11, %v2143_v40  ;;  %2747 = vmatmul.msk.f32.vlgmr.msrb.gmra.mxu3 %vm2144_vm11, %v2180_v13  ;;  %v2290_v43 = vsel %vm2142_vm10, %v2289_v12, %v2288_v63  ;;  %v2327_v38 = vsel %vm2142_vm10, %v2326_v34, %v2325_v6  ;;  %v4963_v35 = vsel %vm2142_vm10, %v2363_v3, %v2362_v57  ;;  %v2102_v57 = vld [vmem:[%s5096_s5 + $0x2a8] sm:$0xff] }
 0x3b8   :  { %2295 = vmatpush.msra.mxu2 %v2086_v4  ;;  %2332 = vmatpush.msrb.mxu3 %v2100_v26 }
 0x3ba   :  { %2296 = vmatpush.msra.mxu2 %v2085_v24  ;;  %2333 = vmatpush.msrb.mxu3 %v2099_v11 }
 0x3bc   :  { %2297 = vmatpush.msra.mxu2 %v2084_v7  ;;  %2334 = vmatpush.msrb.mxu3 %v2098_v59 }
 0x3be   :  { %2298 = vmatpush.msra.mxu2 %v2083_v42  ;;  %2335 = vmatpush.msrb.mxu3 %v2097_v62 }
 0x3bf   :  { %2748 = vmatmul.msk.f32.vlgmr.msrb.gmra.mxu2 %vm2144_vm11, %v2216_v49  ;;  %2749 = vmatmul.msk.f32.vlgmr.msra.gmra.mxu3 %vm2144_vm11, %v2253_v28 }
 0x3c0   :  { %2299 = vmatpush.msra.mxu2 %v2082_v53  ;;  %2336 = vmatpush.msrb.mxu3 %v2096_v10 }
 0x3c2   :  { %2300 = vmatpush.msra.mxu2 %v2081_v18  ;;  %2337 = vmatpush.msrb.mxu3 %v2095_v27 }
 0x3c4   :  { %2301 = vmatpush.msra.mxu2 %v2080_v41  ;;  %2338 = vmatpush.msrb.mxu3 %v2094_v8 }
 0x3c6   :  { %2302 = vmatpush.msra.mxu2 %v2079_v50  ;;  %2339 = vmatpush.msrb.mxu3 %v2093_v39 }
 0x3c8   :  { %2303 = vmatpush.msra.mxu2 %v2078_v47  ;;  %2340 = vmatpush.msrb.mxu3 %v2092_v9 }
 0x3ca   :  { %2304 = vmatpush.msra.mxu2 %v2077_v61  ;;  %2341 = vmatpush.msrb.mxu3 %v2091_v20 }
 0x3cc   :  { %2305 = vmatpush.msra.mxu2 %v2076_v17  ;;  %2342 = vmatpush.msrb.mxu3 %v2090_v54 }
 0x3ce   :  { %2306 = vmatpush.msra.mxu2 %v2075_v60  ;;  %2343 = vmatpush.msrb.mxu3 %v2089_v52 }
 0x3d0   :  { %2307 = vmatpush.msra.mxu2 %v2074_v23  ;;  %2344 = vmatpush.msrb.mxu3 %v2088_v0 }
 0x3d2   :  { %2308 = vmatpush.msra.mxu2 %v2073_v33  ;;  %2345 = vmatpush.msrb.mxu3 %v2087_v22 }
 0x3d3   :  { %2750 = vmatmul.msk.f32.vlgmr.msra.gmra.mxu2 %vm2144_vm11, %v2290_v43  ;;  %2751 = vmatmul.msk.f32.vlgmr.msrb.gmra.mxu3 %vm2144_vm11, %v2327_v38 }
 0x3d4   :  { %2369 = vmatpush.msrb.mxu2 %v2114_v2 }
 0x3d6   :  { %2370 = vmatpush.msrb.mxu2 %v2113_v16 }
 0x3d8   :  { %2371 = vmatpush.msrb.mxu2 %v2112_v58 }
 0x3da   :  { %2372 = vmatpush.msrb.mxu2 %v2111_v5 }
 0x3dc   :  { %2373 = vmatpush.msrb.mxu2 %v2110_v55 }
 0x3de   :  { %2374 = vmatpush.msrb.mxu2 %v2109_v46 }
 0x3e0   :  { %2375 = vmatpush.msrb.mxu2 %v2108_v19 }
 0x3e2   :  { %2376 = vmatpush.msrb.mxu2 %v2107_v14 }
 0x3e4   :  { %2377 = vmatpush.msrb.mxu2 %v2106_v51 }
 0x3e6   :  { %2378 = vmatpush.msrb.mxu2 %v2105_v15 }
 0x3e8   :  { %2379 = vmatpush.msrb.mxu2 %v2104_v44 }
 0x3ea   :  { %2380 = vmatpush.msrb.mxu2 %v2103_v48 }
 0x3ec   :  { %2381 = vmatpush.msrb.mxu2 %v2102_v57 }
 0x3ee   :  { %2382 = vmatpush.msrb.mxu2 %v2101_v21 }
 0x3ef   :  { %2752 = vmatmul.msk.f32.vlgmr.msrb.gmra.mxu2 %vm2144_vm11, %v4963_v35 }
 0x43a   :  { %v2164_v45 = vpop.f32.mrf.mxu2  ;;  %v2200_v36 = vpop.f32.mrf.mxu3 }
 0x43b   :  { %v2201_v30 = vadd.f32 %v2200_v36, %v2164_v45 }
 0x442   :  { %v2236_v37 = vpop.f32.mrf.mxu2  ;;  %v2273_v6 = vpop.f32.mrf.mxu3 }
 0x443   :  { %v2239_v63 = vadd.f32 %v2236_v37, %v2201_v30 }
 0x445   :  { %v2276_v32 = vadd.f32 %v2273_v6, %v2239_v63 }
 0x456   :  { %v2310_v31 = vpop.f32.mrf.mxu2  ;;  %v2347_v1 = vpop.f32.mrf.mxu3 }
 0x457   :  { %v2313_v29 = vadd.f32 %v2310_v31, %v2276_v32 }
 0x459   :  { %v2350_v56 = vadd.f32 %v2347_v1, %v2313_v29 }
 0x472   :  { %v2384_v4 = vpop.f32.mrf.mxu2 }
 0x473   :  { %v2387_v26 = vadd.f32 %v2384_v4, %v2350_v56 }
 0x475   :  { %v2392_v12 = vadd.f32 %v2767_v25, %v2387_v26 }
 0x477   :  { %2393 = vmax.xlane.f32.xlu0 %v2392_v12 }
 0x4ea   :  { %v2394_v34 = vpop.xlane.xlu0 %2393 }
 0x4eb   :  { %v2395_v3 = vsub.f32 %v2392_v12, %v2394_v34 }
 0x4ed   :  { %v2396_v40 = vmul.f32 1.442695, %v2395_v3 }
 0x4ef   :  { %2768 = vpow2.f32 %v2396_v40 }
 0x4f5   :  { %v2769_v13 = vpop.eup %2768 }
 0x4f6   :  { %2398 = vadd.xlane.f32.xlu0 %v2769_v13 }
 0x569   :  { %v2399_v49 = vpop.xlane.xlu0 %2398 }
 0x56a   :  { %2770 = vlog2.f32 %v2399_v49 }
 0x570   :  { %v2771_v28 = vpop.eup %2770 }
 0x571   :  { %v2401_v24 = vmul.f32 0.6931472, %v2771_v28 }
 0x573   :  { %v2402_v11 = vadd.f32 %v2401_v24, %v2394_v34 }
 0x575   :  { %v2403_v43 = vsub.f32 %v2392_v12, %v2402_v11 }
 0x577   :  { %2405 = vst.msk [vmem:[%s5098_s7] sm:$0xff] %vm2404_vm12, %v2403_v43 }

</bundles_post_ra>
